<compile_context>
chip_gen: v6e
topology: v6e:2x2x1
jax: 0.10.0
libtpu: 0.0.40
codegen_flags: <defaults>
</compile_context>

<pallas_src>
import functools

import jax
import jax.numpy as jnp
import numpy as np
from jax.experimental import pallas as pl
from jax.experimental.pallas import tpu as pltpu

EPS = 1e-5
LEAKY_SLOPE = 0.01            # PyTorch nn.LeakyReLU default negative_slope
LANE = 128
SUBLANE = 16                  # bf16 sublane packing granularity
VMEM_BUDGET = 20 << 20        # working-set budget used for tile sizing
VMEM_LIMIT = 32 << 20         # scoped VMEM request (safe on v5e/v6e/v7x)


def _round_up(x, m):
    return (x + m - 1) // m * m


def _apply_act(z, act):
    if act == "leaky":
        return jnp.where(z > 0, z, LEAKY_SLOPE * z)
    if act == "relu":
        return jnp.maximum(z, 0.0)
    if act == "sigmoid":
        return jax.nn.sigmoid(z)
    return z


# ---------------------------------------------------------------------------
# Single-pass fused conv(im2col matmul) + BatchNorm(batch stats) + activation.
# Used whenever the whole (M, K) patch matrix fits one VMEM tile (true for
# every layer at the shipped shapes): one MXU matmul, statistics + normalize +
# activate on the resident tile, one lane-dense store. grid = (1,).
# ---------------------------------------------------------------------------
def _conv_bn_act_single_kernel(patch_ref, w_ref, gamma_ref, beta_ref, out_ref,
                               *, act, m_true):
    m_pad = patch_ref.shape[0]
    # bf16 operands on the MXU, f32 accumulation. Conv bias intentionally
    # omitted: with batch-statistics BatchNorm it cancels exactly.
    y = jnp.dot(patch_ref[...], w_ref[...], preferred_element_type=jnp.float32)

    inv_m = 1.0 / m_true
    # Zero-padded rows contribute exactly 0 to the sum (no bias), so the mean
    # over the true m rows is exact.
    mean = jnp.sum(y, axis=0, keepdims=True) * inv_m
    if m_pad != m_true:
        row = jax.lax.broadcasted_iota(jnp.int32, y.shape, 0)
        d = jnp.where(row < m_true, y - mean, 0.0)      # mask padded rows
    else:
        d = y - mean
    var = jnp.sum(d * d, axis=0, keepdims=True) * inv_m  # centered: no cancellation
    inv_std = jax.lax.rsqrt(var + EPS)

    scale = gamma_ref[...] * inv_std
    shift = beta_ref[...] - mean * scale
    z = _apply_act(y * scale + shift, act)
    out_ref[...] = z.astype(out_ref.dtype)


def _conv_bn_act_single(patches, w_flat, gamma_p, beta_p, *, act, m_true, out_dtype):
    m_pad, kk = patches.shape
    c_pad = w_flat.shape[1]
    return pl.pallas_call(
        functools.partial(_conv_bn_act_single_kernel, act=act, m_true=m_true),
        out_shape=jax.ShapeDtypeStruct((m_pad, c_pad), out_dtype),
        grid_spec=pltpu.PrefetchScalarGridSpec(
            num_scalar_prefetch=0,
            grid=(1,),
            in_specs=[
                pl.BlockSpec((m_pad, kk), lambda i: (0, 0)),
                pl.BlockSpec((kk, c_pad), lambda i: (0, 0)),
                pl.BlockSpec((1, c_pad), lambda i: (0, 0)),
                pl.BlockSpec((1, c_pad), lambda i: (0, 0)),
            ],
            out_specs=pl.BlockSpec((m_pad, c_pad), lambda i: (0, 0)),
        ),
        compiler_params=pltpu.CompilerParams(
            dimension_semantics=("arbitrary",),
            vmem_limit_bytes=VMEM_LIMIT,
        ),
    )(patches, w_flat, gamma_p, beta_p)


# ---------------------------------------------------------------------------
# Two-pass fallback for M too large for a single tile (not hit at the shipped
# shapes). Pass 0 accumulates per-channel sum / sum-of-squares; pass 1 derives
# scale/shift once and writes the normalized, activated output.
# TODO(synk): stash y per-tile (or keep the block resident) to avoid the
# recomputed matmul in pass 1; and for v7x, accumulate per-core partial stats
# so the m-tile axis can be "parallel" across both TensorCores.
# ---------------------------------------------------------------------------
def _conv_bn_act_two_pass_kernel(patch_ref, w_ref, gamma_ref, beta_ref, out_ref,
                                 sum_sc, sq_sc, scale_sc, shift_sc,
                                 *, act, m_true):
    p = pl.program_id(0)   # 0 = statistics pass, 1 = normalize/activate pass
    i = pl.program_id(1)   # m-tile index

    y = jnp.dot(patch_ref[...], w_ref[...], preferred_element_type=jnp.float32)

    @pl.when(jnp.logical_and(p == 0, i == 0))
    def _():
        sum_sc[...] = jnp.zeros_like(sum_sc)
        sq_sc[...] = jnp.zeros_like(sq_sc)

    @pl.when(p == 0)
    def _():
        # Zero-padded rows contribute 0 to both sums (no bias) -> exact stats.
        # out_ref is NOT written here; pass 1 revisits and overwrites every block.
        sum_sc[...] += jnp.sum(y, axis=0, keepdims=True)
        sq_sc[...] += jnp.sum(y * y, axis=0, keepdims=True)

    @pl.when(jnp.logical_and(p == 1, i == 0))
    def _():
        inv_m = 1.0 / m_true
        mean = sum_sc[...] * inv_m
        var = jnp.maximum(sq_sc[...] * inv_m - mean * mean, 0.0)
        inv_std = jax.lax.rsqrt(var + EPS)
        scale = gamma_ref[...] * inv_std
        scale_sc[...] = scale
        shift_sc[...] = beta_ref[...] - mean * scale

    @pl.when(p == 1)
    def _():
        z = _apply_act(y * scale_sc[...] + shift_sc[...], act)
        out_ref[...] = z.astype(out_ref.dtype)


def _conv_bn_act_two_pass(patches, w_flat, gamma_p, beta_p, *, act, m_true, tm,
                          out_dtype):
    m_pad, kk = patches.shape
    c_pad = w_flat.shape[1]
    n_tiles = m_pad // tm
    return pl.pallas_call(
        functools.partial(_conv_bn_act_two_pass_kernel, act=act,
                          m_true=float(m_true)),
        out_shape=jax.ShapeDtypeStruct((m_pad, c_pad), out_dtype),
        grid_spec=pltpu.PrefetchScalarGridSpec(
            num_scalar_prefetch=0,
            grid=(2, n_tiles),
            in_specs=[
                pl.BlockSpec((tm, kk), lambda p, i: (i, 0)),
                pl.BlockSpec((kk, c_pad), lambda p, i: (0, 0)),
                pl.BlockSpec((1, c_pad), lambda p, i: (0, 0)),
                pl.BlockSpec((1, c_pad), lambda p, i: (0, 0)),
            ],
            out_specs=pl.BlockSpec((tm, c_pad), lambda p, i: (i, 0)),
            scratch_shapes=[
                pltpu.VMEM((1, c_pad), jnp.float32),   # sum
                pltpu.VMEM((1, c_pad), jnp.float32),   # sum of squares
                pltpu.VMEM((1, c_pad), jnp.float32),   # BN scale
                pltpu.VMEM((1, c_pad), jnp.float32),   # BN shift
            ],
        ),
        compiler_params=pltpu.CompilerParams(
            dimension_semantics=("arbitrary", "arbitrary"),
            vmem_limit_bytes=VMEM_LIMIT,
        ),
    )(patches, w_flat, gamma_p, beta_p)


# ---------------------------------------------------------------------------
# im2col (XLA glue). Optionally folds a 2x nearest-neighbor upsample into the
# gather indices so the 4x-larger upsampled intermediate never materializes.
# TODO(synk): move this into the kernel (memory_space=pl.ANY + strided pl.ds)
# to remove the k^2 HBM read amplification of materialized im2col.
# ---------------------------------------------------------------------------
def _upsample_index(u, size, pad):
    """Map coords in the zero-padded 2x-nearest-upsampled image to coords in
    the zero-padded source image (both padded by `pad` on each side)."""
    inside = np.clip((u - pad) // 2, 0, size - 1) + pad
    return np.where(u < pad, 0,
                    np.where(u >= 2 * size + pad, size + 2 * pad - 1, inside)).astype(np.int32)


def _im2col(x, k, stride, pad, upsample):
    n, h, w, c = x.shape
    xp = jnp.pad(x, ((0, 0), (pad, pad), (pad, pad), (0, 0)))
    hi, wi = (2 * h, 2 * w) if upsample else (h, w)
    ho = (hi + 2 * pad - k) // stride + 1
    wo = (wi + 2 * pad - k) // stride + 1
    cols = []
    for dy in range(k):
        for dx in range(k):
            if upsample:
                ys = _upsample_index(dy + stride * np.arange(ho), h, pad)
                xs = _upsample_index(dx + stride * np.arange(wo), w, pad)
                patch = jnp.take(jnp.take(xp, ys, axis=1), xs, axis=2)
            else:
                patch = xp[:, dy:dy + stride * ho:stride,
                           dx:dx + stride * wo:stride, :]
            cols.append(patch)
    patches = jnp.concatenate(cols, axis=-1).reshape(n * ho * wo, k * k * c)
    return patches, ho, wo


# ---------------------------------------------------------------------------
# ConvBlock / Conv2DAE forward (JAX glue + fused Pallas hot path)
# ---------------------------------------------------------------------------
def conv_block(x_nhwc, params, *, kernel_size, stride, padding, act,
               upsample=False, out_dtype=jnp.bfloat16):
    """[Upsample(x2 nearest)?] -> Conv2d -> BatchNorm2d(batch stats) -> act."""
    w, _b, gamma, beta = params   # _b unused: batch-stat BN cancels conv bias exactly
    n = x_nhwc.shape[0]
    cin = x_nhwc.shape[-1]
    k = kernel_size
    cout = w.shape[0]
    c_pad = _round_up(cout, LANE)
    kk = k * k * cin

    patches, ho, wo = _im2col(x_nhwc, k, stride, padding, upsample)
    patches = patches.astype(jnp.bfloat16)
    m = n * ho * wo

    # Weight: (Cout,Cin,k,k) -> (k,k,Cin,Cout) -> (K,Cout), zero-padded to a
    # lane-dense Cout (multiple of 128), bf16 for the MXU.
    w_flat = jnp.transpose(w, (2, 3, 1, 0)).reshape(kk, cout)
    w_flat = jnp.pad(w_flat, ((0, 0), (0, c_pad - cout))).astype(jnp.bfloat16)
    gamma_p = jnp.pad(gamma.astype(jnp.float32), (0, c_pad - cout)).reshape(1, c_pad)
    beta_p = jnp.pad(beta.astype(jnp.float32), (0, c_pad - cout)).reshape(1, c_pad)

    # Tile-budget: per-row cost of the (double-buffered) patch + output tiles,
    # plus the fixed cost of double-buffered weights, gamma/beta and scratch.
    out_bytes = jnp.dtype(out_dtype).itemsize
    fixed = 2 * kk * c_pad * 2 + 2 * 2 * c_pad * 4 + 4 * c_pad * 4
    per_row = 2 * (kk * 2 + c_pad * out_bytes)
    tm_cap = min(4096, (VMEM_BUDGET - fixed) // per_row)
    tm_cap = max(SUBLANE, tm_cap // SUBLANE * SUBLANE)
    m16 = _round_up(m, SUBLANE)

    if m16 <= tm_cap:
        # Whole layer resident -> single fused pass (always true at shipped shapes).
        m_pad = m16
        if m_pad != m:
            patches = jnp.pad(patches, ((0, m_pad - m), (0, 0)))  # zero rows
        out = _conv_bn_act_single(patches, w_flat, gamma_p, beta_p,
                                  act=act, m_true=m, out_dtype=out_dtype)
    else:
        tm = tm_cap
        m_pad = _round_up(m, tm)
        if m_pad != m:
            patches = jnp.pad(patches, ((0, m_pad - m), (0, 0)))  # zero rows
        out = _conv_bn_act_two_pass(patches, w_flat, gamma_p, beta_p,
                                    act=act, m_true=m, tm=tm, out_dtype=out_dtype)

    return out[:m, :cout].reshape(n, ho, wo, cout)


def conv2d_ae_forward(x_nchw, params):
    enc, dec = params
    x = jnp.transpose(x_nchw, (0, 2, 3, 1))  # NCHW -> NHWC
    # encoder
    x = conv_block(x, enc[0], kernel_size=4, stride=2, padding=1, act="leaky")
    x = conv_block(x, enc[1], kernel_size=4, stride=2, padding=1, act="leaky")
    x = conv_block(x, enc[2], kernel_size=4, stride=2, padding=1, act="leaky")
    # decoder (nearest x2 upsample folded into the im2col gather of each block)
    x = conv_block(x, dec[0], kernel_size=3, stride=1, padding=1, act="relu",
                   upsample=True)
    x = conv_block(x, dec[1], kernel_size=3, stride=1, padding=1, act="relu",
                   upsample=True)
    x = conv_block(x, dec[2], kernel_size=3, stride=1, padding=1, act="sigmoid",
                   upsample=True)
    # intermediate activations are bf16; present the final output as f32 NCHW
    return jnp.transpose(x, (0, 3, 1, 2)).astype(jnp.float32)


# ---------------------------------------------------------------------------
# Deterministic synthetic parameters (shapes from the module's __init__)
# ---------------------------------------------------------------------------
def init_params(key):
    def block_params(k, cin, cout, ksz):
        k1, k2 = jax.random.split(k)
        fan_in = cin * ksz * ksz
        w = jax.random.normal(k1, (cout, cin, ksz, ksz), jnp.float32) / jnp.sqrt(fan_in)
        b = jax.random.normal(k2, (cout,), jnp.float32) * 0.01  # BN (batch stats) cancels it
        gamma = jnp.ones((cout,), jnp.float32)   # BatchNorm2d default init
        beta = jnp.zeros((cout,), jnp.float32)
        return (w, b, gamma, beta)

    keys = jax.random.split(key, 6)
    enc = [
        block_params(keys[0], 3, 32, 4),
        block_params(keys[1], 32, 64, 4),
        block_params(keys[2], 64, 128, 4),
    ]
    dec = [
        block_params(keys[3], 128, 64, 3),
        block_params(keys[4], 64, 32, 3),
        block_params(keys[5], 32, 3, 3),
    ]
    return enc, dec


if __name__ == "__main__":
    key = jax.random.PRNGKey(0)
    pkey, xkey = jax.random.split(key)
    params = init_params(pkey)
    x = jax.random.normal(xkey, (2, 3, 16, 16), jnp.float32)  # NCHW, like PyTorch

    out = jax.jit(conv2d_ae_forward)(x, params)
    out = jax.block_until_ready(out)

    assert out.shape == (2, 3, 16, 16), out.shape
    assert bool(jnp.all(jnp.isfinite(out)))
    assert bool(jnp.all((out >= 0.0) & (out <= 1.0)))  # final sigmoid
    print("KERNEL_OK")
</pallas_src>

<mosaic_0001>
module attributes {stable_mosaic.version = 11 : i64} {
  func.func @_conv_bn_act_single_kernel(%arg0: i32, %arg1: memref<128x48xbf16, #tpu.memory_space<vmem>>, %arg2: memref<48x128xbf16, #tpu.memory_space<vmem>>, %arg3: memref<1x128xf32, #tpu.memory_space<vmem>>, %arg4: memref<1x128xf32, #tpu.memory_space<vmem>>, %arg5: memref<128x128xbf16, #tpu.memory_space<vmem>>) attributes {dimension_semantics = [#tpu.dimension_semantics<arbitrary>], iteration_bounds = array<i64: 1>, scalar_prefetch = 0 : i64, scratch_operands = 0 : i64, tpu.core_type = #tpu.core_type<tc>, window_params = [{pipeline_mode = #tpu.pipeline_mode<synchronous>, transform_indices = @transform_0, window_bounds = array<i64: 128, 48>}, {pipeline_mode = #tpu.pipeline_mode<synchronous>, transform_indices = @transform_1, window_bounds = array<i64: 48, 128>}, {pipeline_mode = #tpu.pipeline_mode<synchronous>, transform_indices = @transform_2, window_bounds = array<i64: 1, 128>}, {pipeline_mode = #tpu.pipeline_mode<synchronous>, transform_indices = @transform_3, window_bounds = array<i64: 1, 128>}, {pipeline_mode = #tpu.pipeline_mode<synchronous>, transform_indices = @transform_4, window_bounds = array<i64: 128, 128>}]} {
    %c0 = arith.constant 0 : index
    %c0_0 = arith.constant 0 : index
    %0 = vector.load %arg1[%c0, %c0_0] : memref<128x48xbf16, #tpu.memory_space<vmem>>, vector<128x48xbf16>
    %c0_1 = arith.constant 0 : index
    %c0_2 = arith.constant 0 : index
    %1 = vector.load %arg2[%c0_1, %c0_2] : memref<48x128xbf16, #tpu.memory_space<vmem>>, vector<48x128xbf16>
    %cst = arith.constant dense<0.000000e+00> : vector<128x128xf32>
    %2 = tpu.matmul %0, %1, %cst {dimension_numbers = #tpu.dot_dimension_numbers<[1], [0], [0], [1], [0, 0, 1, 1], [], []>} : vector<128x48xbf16>, vector<48x128xbf16>, vector<128x128xf32> -> vector<128x128xf32>
    %cst_3 = arith.constant dense<0.000000e+00> : vector<128xf32>
    %3 = vector.multi_reduction <add>, %2, %cst_3 [0] : vector<128x128xf32> to vector<128xf32>
    %4 = vector.shape_cast %3 : vector<128xf32> to vector<1x128xf32>
    %cst_4 = arith.constant 7.812500e-03 : f32
    %5 = vector.broadcast %cst_4 : f32 to vector<1x128xf32>
    %6 = arith.mulf %4, %5 : vector<1x128xf32>
    %7 = vector.broadcast %6 : vector<1x128xf32> to vector<128x128xf32>
    %8 = arith.subf %2, %7 : vector<128x128xf32>
    %9 = arith.mulf %8, %8 : vector<128x128xf32>
    %cst_5 = arith.constant dense<0.000000e+00> : vector<128xf32>
    %10 = vector.multi_reduction <add>, %9, %cst_5 [0] : vector<128x128xf32> to vector<128xf32>
    %11 = vector.shape_cast %10 : vector<128xf32> to vector<1x128xf32>
    %cst_6 = arith.constant 7.812500e-03 : f32
    %12 = vector.broadcast %cst_6 : f32 to vector<1x128xf32>
    %13 = arith.mulf %11, %12 : vector<1x128xf32>
    %cst_7 = arith.constant 9.99999974E-6 : f32
    %14 = vector.broadcast %cst_7 : f32 to vector<1x128xf32>
    %15 = arith.addf %13, %14 : vector<1x128xf32>
    %16 = math.rsqrt %15 : vector<1x128xf32>
    %c0_8 = arith.constant 0 : index
    %c0_9 = arith.constant 0 : index
    %17 = vector.load %arg3[%c0_8, %c0_9] : memref<1x128xf32, #tpu.memory_space<vmem>>, vector<1x128xf32>
    %18 = arith.mulf %17, %16 : vector<1x128xf32>
    %c0_10 = arith.constant 0 : index
    %c0_11 = arith.constant 0 : index
    %19 = vector.load %arg4[%c0_10, %c0_11] : memref<1x128xf32, #tpu.memory_space<vmem>>, vector<1x128xf32>
    %20 = arith.mulf %6, %18 : vector<1x128xf32>
    %21 = arith.subf %19, %20 : vector<1x128xf32>
    %22 = vector.broadcast %18 : vector<1x128xf32> to vector<128x128xf32>
    %23 = arith.mulf %2, %22 : vector<128x128xf32>
    %24 = vector.broadcast %21 : vector<1x128xf32> to vector<128x128xf32>
    %25 = arith.addf %23, %24 : vector<128x128xf32>
    %cst_12 = arith.constant 0.000000e+00 : f32
    %26 = vector.broadcast %cst_12 : f32 to vector<128x128xf32>
    %27 = arith.cmpf ogt, %25, %26 : vector<128x128xf32>
    %cst_13 = arith.constant 0.00999999977 : f32
    %28 = vector.broadcast %cst_13 : f32 to vector<128x128xf32>
    %29 = arith.mulf %28, %25 : vector<128x128xf32>
    %30 = arith.select %27, %25, %29 : vector<128x128xi1>, vector<128x128xf32>
    %31 = arith.truncf %30 : vector<128x128xf32> to vector<128x128xbf16>
    %c0_14 = arith.constant 0 : index
    %c0_15 = arith.constant 0 : index
    %32 = vector.load %arg5[%c0_14, %c0_15] : memref<128x128xbf16, #tpu.memory_space<vmem>>, vector<128x128xbf16>
    tpu.vector_store %arg5[%c0_14, %c0_15], %31 {strides = array<i32>} : memref<128x128xbf16, #tpu.memory_space<vmem>>, vector<128x128xbf16>,
    return
  }
  func.func @transform_0(%arg0: i32) -> (i32, i32) {
    %c0_i32 = arith.constant 0 : i32
    %c0_i32_0 = arith.constant 0 : i32
    %c0_i32_1 = arith.constant 0 : i32
    return %c0_i32, %c0_i32_0 : i32, i32
  }
  func.func @transform_1(%arg0: i32) -> (i32, i32) {
    %c0_i32 = arith.constant 0 : i32
    %c0_i32_0 = arith.constant 0 : i32
    %c0_i32_1 = arith.constant 0 : i32
    return %c0_i32, %c0_i32_0 : i32, i32
  }
  func.func @transform_2(%arg0: i32) -> (i32, i32) {
    %c0_i32 = arith.constant 0 : i32
    %c0_i32_0 = arith.constant 0 : i32
    %c0_i32_1 = arith.constant 0 : i32
    return %c0_i32, %c0_i32_0 : i32, i32
  }
  func.func @transform_3(%arg0: i32) -> (i32, i32) {
    %c0_i32 = arith.constant 0 : i32
    %c0_i32_0 = arith.constant 0 : i32
    %c0_i32_1 = arith.constant 0 : i32
    return %c0_i32, %c0_i32_0 : i32, i32
  }
  func.func @transform_4(%arg0: i32) -> (i32, i32) {
    %c0_i32 = arith.constant 0 : i32
    %c0_i32_0 = arith.constant 0 : i32
    %c0_i32_1 = arith.constant 0 : i32
    return %c0_i32, %c0_i32_0 : i32, i32
  }
}

module attributes {stable_mosaic.version = 11 : i64} {
  func.func @_conv_bn_act_single_kernel(%arg0: i32, %arg1: memref<32x512xbf16, #tpu.memory_space<vmem>>, %arg2: memref<512x128xbf16, #tpu.memory_space<vmem>>, %arg3: memref<1x128xf32, #tpu.memory_space<vmem>>, %arg4: memref<1x128xf32, #tpu.memory_space<vmem>>, %arg5: memref<32x128xbf16, #tpu.memory_space<vmem>>) attributes {dimension_semantics = [#tpu.dimension_semantics<arbitrary>], iteration_bounds = array<i64: 1>, scalar_prefetch = 0 : i64, scratch_operands = 0 : i64, tpu.core_type = #tpu.core_type<tc>, window_params = [{pipeline_mode = #tpu.pipeline_mode<synchronous>, transform_indices = @transform_0, window_bounds = array<i64: 32, 512>}, {pipeline_mode = #tpu.pipeline_mode<synchronous>, transform_indices = @transform_1, window_bounds = array<i64: 512, 128>}, {pipeline_mode = #tpu.pipeline_mode<synchronous>, transform_indices = @transform_2, window_bounds = array<i64: 1, 128>}, {pipeline_mode = #tpu.pipeline_mode<synchronous>, transform_indices = @transform_3, window_bounds = array<i64: 1, 128>}, {pipeline_mode = #tpu.pipeline_mode<synchronous>, transform_indices = @transform_4, window_bounds = array<i64: 32, 128>}]} {
    %c0 = arith.constant 0 : index
    %c0_0 = arith.constant 0 : index
    %0 = vector.load %arg1[%c0, %c0_0] : memref<32x512xbf16, #tpu.memory_space<vmem>>, vector<32x512xbf16>
    %c0_1 = arith.constant 0 : index
    %c0_2 = arith.constant 0 : index
    %1 = vector.load %arg2[%c0_1, %c0_2] : memref<512x128xbf16, #tpu.memory_space<vmem>>, vector<512x128xbf16>
    %cst = arith.constant dense<0.000000e+00> : vector<32x128xf32>
    %2 = tpu.matmul %0, %1, %cst {dimension_numbers = #tpu.dot_dimension_numbers<[1], [0], [0], [1], [0, 0, 1, 1], [], []>} : vector<32x512xbf16>, vector<512x128xbf16>, vector<32x128xf32> -> vector<32x128xf32>
    %cst_3 = arith.constant dense<0.000000e+00> : vector<128xf32>
    %3 = vector.multi_reduction <add>, %2, %cst_3 [0] : vector<32x128xf32> to vector<128xf32>
    %4 = vector.shape_cast %3 : vector<128xf32> to vector<1x128xf32>
    %cst_4 = arith.constant 3.125000e-02 : f32
    %5 = vector.broadcast %cst_4 : f32 to vector<1x128xf32>
    %6 = arith.mulf %4, %5 : vector<1x128xf32>
    %7 = vector.broadcast %6 : vector<1x128xf32> to vector<32x128xf32>
    %8 = arith.subf %2, %7 : vector<32x128xf32>
    %9 = arith.mulf %8, %8 : vector<32x128xf32>
    %cst_5 = arith.constant dense<0.000000e+00> : vector<128xf32>
    %10 = vector.multi_reduction <add>, %9, %cst_5 [0] : vector<32x128xf32> to vector<128xf32>
    %11 = vector.shape_cast %10 : vector<128xf32> to vector<1x128xf32>
    %cst_6 = arith.constant 3.125000e-02 : f32
    %12 = vector.broadcast %cst_6 : f32 to vector<1x128xf32>
    %13 = arith.mulf %11, %12 : vector<1x128xf32>
    %cst_7 = arith.constant 9.99999974E-6 : f32
    %14 = vector.broadcast %cst_7 : f32 to vector<1x128xf32>
    %15 = arith.addf %13, %14 : vector<1x128xf32>
    %16 = math.rsqrt %15 : vector<1x128xf32>
    %c0_8 = arith.constant 0 : index
    %c0_9 = arith.constant 0 : index
    %17 = vector.load %arg3[%c0_8, %c0_9] : memref<1x128xf32, #tpu.memory_space<vmem>>, vector<1x128xf32>
    %18 = arith.mulf %17, %16 : vector<1x128xf32>
    %c0_10 = arith.constant 0 : index
    %c0_11 = arith.constant 0 : index
    %19 = vector.load %arg4[%c0_10, %c0_11] : memref<1x128xf32, #tpu.memory_space<vmem>>, vector<1x128xf32>
    %20 = arith.mulf %6, %18 : vector<1x128xf32>
    %21 = arith.subf %19, %20 : vector<1x128xf32>
    %22 = vector.broadcast %18 : vector<1x128xf32> to vector<32x128xf32>
    %23 = arith.mulf %2, %22 : vector<32x128xf32>
    %24 = vector.broadcast %21 : vector<1x128xf32> to vector<32x128xf32>
    %25 = arith.addf %23, %24 : vector<32x128xf32>
    %cst_12 = arith.constant 0.000000e+00 : f32
    %26 = vector.broadcast %cst_12 : f32 to vector<32x128xf32>
    %27 = arith.cmpf ogt, %25, %26 : vector<32x128xf32>
    %cst_13 = arith.constant 0.00999999977 : f32
    %28 = vector.broadcast %cst_13 : f32 to vector<32x128xf32>
    %29 = arith.mulf %28, %25 : vector<32x128xf32>
    %30 = arith.select %27, %25, %29 : vector<32x128xi1>, vector<32x128xf32>
    %31 = arith.truncf %30 : vector<32x128xf32> to vector<32x128xbf16>
    %c0_14 = arith.constant 0 : index
    %c0_15 = arith.constant 0 : index
    %32 = vector.load %arg5[%c0_14, %c0_15] : memref<32x128xbf16, #tpu.memory_space<vmem>>, vector<32x128xbf16>
    tpu.vector_store %arg5[%c0_14, %c0_15], %31 {strides = array<i32>} : memref<32x128xbf16, #tpu.memory_space<vmem>>, vector<32x128xbf16>,
    return
  }
  func.func @transform_0(%arg0: i32) -> (i32, i32) {
    %c0_i32 = arith.constant 0 : i32
    %c0_i32_0 = arith.constant 0 : i32
    %c0_i32_1 = arith.constant 0 : i32
    return %c0_i32, %c0_i32_0 : i32, i32
  }
  func.func @transform_1(%arg0: i32) -> (i32, i32) {
    %c0_i32 = arith.constant 0 : i32
    %c0_i32_0 = arith.constant 0 : i32
    %c0_i32_1 = arith.constant 0 : i32
    return %c0_i32, %c0_i32_0 : i32, i32
  }
  func.func @transform_2(%arg0: i32) -> (i32, i32) {
    %c0_i32 = arith.constant 0 : i32
    %c0_i32_0 = arith.constant 0 : i32
    %c0_i32_1 = arith.constant 0 : i32
    return %c0_i32, %c0_i32_0 : i32, i32
  }
  func.func @transform_3(%arg0: i32) -> (i32, i32) {
    %c0_i32 = arith.constant 0 : i32
    %c0_i32_0 = arith.constant 0 : i32
    %c0_i32_1 = arith.constant 0 : i32
    return %c0_i32, %c0_i32_0 : i32, i32
  }
  func.func @transform_4(%arg0: i32) -> (i32, i32) {
    %c0_i32 = arith.constant 0 : i32
    %c0_i32_0 = arith.constant 0 : i32
    %c0_i32_1 = arith.constant 0 : i32
    return %c0_i32, %c0_i32_0 : i32, i32
  }
}

module attributes {stable_mosaic.version = 11 : i64} {
  func.func @_conv_bn_act_single_kernel(%arg0: i32, %arg1: memref<16x1024xbf16, #tpu.memory_space<vmem>>, %arg2: memref<1024x128xbf16, #tpu.memory_space<vmem>>, %arg3: memref<1x128xf32, #tpu.memory_space<vmem>>, %arg4: memref<1x128xf32, #tpu.memory_space<vmem>>, %arg5: memref<16x128xbf16, #tpu.memory_space<vmem>>) attributes {dimension_semantics = [#tpu.dimension_semantics<arbitrary>], iteration_bounds = array<i64: 1>, scalar_prefetch = 0 : i64, scratch_operands = 0 : i64, tpu.core_type = #tpu.core_type<tc>, window_params = [{pipeline_mode = #tpu.pipeline_mode<synchronous>, transform_indices = @transform_0, window_bounds = array<i64: 16, 1024>}, {pipeline_mode = #tpu.pipeline_mode<synchronous>, transform_indices = @transform_1, window_bounds = array<i64: 1024, 128>}, {pipeline_mode = #tpu.pipeline_mode<synchronous>, transform_indices = @transform_2, window_bounds = array<i64: 1, 128>}, {pipeline_mode = #tpu.pipeline_mode<synchronous>, transform_indices = @transform_3, window_bounds = array<i64: 1, 128>}, {pipeline_mode = #tpu.pipeline_mode<synchronous>, transform_indices = @transform_4, window_bounds = array<i64: 16, 128>}]} {
    %c0 = arith.constant 0 : index
    %c0_0 = arith.constant 0 : index
    %0 = vector.load %arg1[%c0, %c0_0] : memref<16x1024xbf16, #tpu.memory_space<vmem>>, vector<16x1024xbf16>
    %c0_1 = arith.constant 0 : index
    %c0_2 = arith.constant 0 : index
    %1 = vector.load %arg2[%c0_1, %c0_2] : memref<1024x128xbf16, #tpu.memory_space<vmem>>, vector<1024x128xbf16>
    %cst = arith.constant dense<0.000000e+00> : vector<16x128xf32>
    %2 = tpu.matmul %0, %1, %cst {dimension_numbers = #tpu.dot_dimension_numbers<[1], [0], [0], [1], [0, 0, 1, 1], [], []>} : vector<16x1024xbf16>, vector<1024x128xbf16>, vector<16x128xf32> -> vector<16x128xf32>
    %cst_3 = arith.constant dense<0.000000e+00> : vector<128xf32>
    %3 = vector.multi_reduction <add>, %2, %cst_3 [0] : vector<16x128xf32> to vector<128xf32>
    %4 = vector.shape_cast %3 : vector<128xf32> to vector<1x128xf32>
    %cst_4 = arith.constant 1.250000e-01 : f32
    %5 = vector.broadcast %cst_4 : f32 to vector<1x128xf32>
    %6 = arith.mulf %4, %5 : vector<1x128xf32>
    %7 = tpu.iota {dimensions = array<i32: 0>} : vector<16x128xi32>
    %c8_i32 = arith.constant 8 : i32
    %8 = vector.broadcast %c8_i32 : i32 to vector<16x128xi32>
    %9 = arith.cmpi slt, %7, %8 : vector<16x128xi32>
    %10 = vector.broadcast %6 : vector<1x128xf32> to vector<16x128xf32>
    %11 = arith.subf %2, %10 : vector<16x128xf32>
    %cst_5 = arith.constant 0.000000e+00 : f32
    %12 = vector.broadcast %cst_5 : f32 to vector<16x128xf32>
    %13 = arith.select %9, %11, %12 : vector<16x128xi1>, vector<16x128xf32>
    %14 = arith.mulf %13, %13 : vector<16x128xf32>
    %cst_6 = arith.constant dense<0.000000e+00> : vector<128xf32>
    %15 = vector.multi_reduction <add>, %14, %cst_6 [0] : vector<16x128xf32> to vector<128xf32>
    %16 = vector.shape_cast %15 : vector<128xf32> to vector<1x128xf32>
    %cst_7 = arith.constant 1.250000e-01 : f32
    %17 = vector.broadcast %cst_7 : f32 to vector<1x128xf32>
    %18 = arith.mulf %16, %17 : vector<1x128xf32>
    %cst_8 = arith.constant 9.99999974E-6 : f32
    %19 = vector.broadcast %cst_8 : f32 to vector<1x128xf32>
    %20 = arith.addf %18, %19 : vector<1x128xf32>
    %21 = math.rsqrt %20 : vector<1x128xf32>
    %c0_9 = arith.constant 0 : index
    %c0_10 = arith.constant 0 : index
    %22 = vector.load %arg3[%c0_9, %c0_10] : memref<1x128xf32, #tpu.memory_space<vmem>>, vector<1x128xf32>
    %23 = arith.mulf %22, %21 : vector<1x128xf32>
    %c0_11 = arith.constant 0 : index
    %c0_12 = arith.constant 0 : index
    %24 = vector.load %arg4[%c0_11, %c0_12] : memref<1x128xf32, #tpu.memory_space<vmem>>, vector<1x128xf32>
    %25 = arith.mulf %6, %23 : vector<1x128xf32>
    %26 = arith.subf %24, %25 : vector<1x128xf32>
    %27 = vector.broadcast %23 : vector<1x128xf32> to vector<16x128xf32>
    %28 = arith.mulf %2, %27 : vector<16x128xf32>
    %29 = vector.broadcast %26 : vector<1x128xf32> to vector<16x128xf32>
    %30 = arith.addf %28, %29 : vector<16x128xf32>
    %cst_13 = arith.constant 0.000000e+00 : f32
    %31 = vector.broadcast %cst_13 : f32 to vector<16x128xf32>
    %32 = arith.cmpf ogt, %30, %31 : vector<16x128xf32>
    %cst_14 = arith.constant 0.00999999977 : f32
    %33 = vector.broadcast %cst_14 : f32 to vector<16x128xf32>
    %34 = arith.mulf %33, %30 : vector<16x128xf32>
    %35 = arith.select %32, %30, %34 : vector<16x128xi1>, vector<16x128xf32>
    %36 = arith.truncf %35 : vector<16x128xf32> to vector<16x128xbf16>
    %c0_15 = arith.constant 0 : index
    %c0_16 = arith.constant 0 : index
    %37 = vector.load %arg5[%c0_15, %c0_16] : memref<16x128xbf16, #tpu.memory_space<vmem>>, vector<16x128xbf16>
    tpu.vector_store %arg5[%c0_15, %c0_16], %36 {strides = array<i32>} : memref<16x128xbf16, #tpu.memory_space<vmem>>, vector<16x128xbf16>,
    return
  }
  func.func @transform_0(%arg0: i32) -> (i32, i32) {
    %c0_i32 = arith.constant 0 : i32
    %c0_i32_0 = arith.constant 0 : i32
    %c0_i32_1 = arith.constant 0 : i32
    return %c0_i32, %c0_i32_0 : i32, i32
  }
  func.func @transform_1(%arg0: i32) -> (i32, i32) {
    %c0_i32 = arith.constant 0 : i32
    %c0_i32_0 = arith.constant 0 : i32
    %c0_i32_1 = arith.constant 0 : i32
    return %c0_i32, %c0_i32_0 : i32, i32
  }
  func.func @transform_2(%arg0: i32) -> (i32, i32) {
    %c0_i32 = arith.constant 0 : i32
    %c0_i32_0 = arith.constant 0 : i32
    %c0_i32_1 = arith.constant 0 : i32
    return %c0_i32, %c0_i32_0 : i32, i32
  }
  func.func @transform_3(%arg0: i32) -> (i32, i32) {
    %c0_i32 = arith.constant 0 : i32
    %c0_i32_0 = arith.constant 0 : i32
    %c0_i32_1 = arith.constant 0 : i32
    return %c0_i32, %c0_i32_0 : i32, i32
  }
  func.func @transform_4(%arg0: i32) -> (i32, i32) {
    %c0_i32 = arith.constant 0 : i32
    %c0_i32_0 = arith.constant 0 : i32
    %c0_i32_1 = arith.constant 0 : i32
    return %c0_i32, %c0_i32_0 : i32, i32
  }
}

module attributes {stable_mosaic.version = 11 : i64} {
  func.func @_conv_bn_act_single_kernel(%arg0: i32, %arg1: memref<32x1152xbf16, #tpu.memory_space<vmem>>, %arg2: memref<1152x128xbf16, #tpu.memory_space<vmem>>, %arg3: memref<1x128xf32, #tpu.memory_space<vmem>>, %arg4: memref<1x128xf32, #tpu.memory_space<vmem>>, %arg5: memref<32x128xbf16, #tpu.memory_space<vmem>>) attributes {dimension_semantics = [#tpu.dimension_semantics<arbitrary>], iteration_bounds = array<i64: 1>, scalar_prefetch = 0 : i64, scratch_operands = 0 : i64, tpu.core_type = #tpu.core_type<tc>, window_params = [{pipeline_mode = #tpu.pipeline_mode<synchronous>, transform_indices = @transform_0, window_bounds = array<i64: 32, 1152>}, {pipeline_mode = #tpu.pipeline_mode<synchronous>, transform_indices = @transform_1, window_bounds = array<i64: 1152, 128>}, {pipeline_mode = #tpu.pipeline_mode<synchronous>, transform_indices = @transform_2, window_bounds = array<i64: 1, 128>}, {pipeline_mode = #tpu.pipeline_mode<synchronous>, transform_indices = @transform_3, window_bounds = array<i64: 1, 128>}, {pipeline_mode = #tpu.pipeline_mode<synchronous>, transform_indices = @transform_4, window_bounds = array<i64: 32, 128>}]} {
    %c0 = arith.constant 0 : index
    %c0_0 = arith.constant 0 : index
    %0 = vector.load %arg1[%c0, %c0_0] : memref<32x1152xbf16, #tpu.memory_space<vmem>>, vector<32x1152xbf16>
    %c0_1 = arith.constant 0 : index
    %c0_2 = arith.constant 0 : index
    %1 = vector.load %arg2[%c0_1, %c0_2] : memref<1152x128xbf16, #tpu.memory_space<vmem>>, vector<1152x128xbf16>
    %cst = arith.constant dense<0.000000e+00> : vector<32x128xf32>
    %2 = tpu.matmul %0, %1, %cst {dimension_numbers = #tpu.dot_dimension_numbers<[1], [0], [0], [1], [0, 0, 1, 1], [], []>} : vector<32x1152xbf16>, vector<1152x128xbf16>, vector<32x128xf32> -> vector<32x128xf32>
    %cst_3 = arith.constant dense<0.000000e+00> : vector<128xf32>
    %3 = vector.multi_reduction <add>, %2, %cst_3 [0] : vector<32x128xf32> to vector<128xf32>
    %4 = vector.shape_cast %3 : vector<128xf32> to vector<1x128xf32>
    %cst_4 = arith.constant 3.125000e-02 : f32
    %5 = vector.broadcast %cst_4 : f32 to vector<1x128xf32>
    %6 = arith.mulf %4, %5 : vector<1x128xf32>
    %7 = vector.broadcast %6 : vector<1x128xf32> to vector<32x128xf32>
    %8 = arith.subf %2, %7 : vector<32x128xf32>
    %9 = arith.mulf %8, %8 : vector<32x128xf32>
    %cst_5 = arith.constant dense<0.000000e+00> : vector<128xf32>
    %10 = vector.multi_reduction <add>, %9, %cst_5 [0] : vector<32x128xf32> to vector<128xf32>
    %11 = vector.shape_cast %10 : vector<128xf32> to vector<1x128xf32>
    %cst_6 = arith.constant 3.125000e-02 : f32
    %12 = vector.broadcast %cst_6 : f32 to vector<1x128xf32>
    %13 = arith.mulf %11, %12 : vector<1x128xf32>
    %cst_7 = arith.constant 9.99999974E-6 : f32
    %14 = vector.broadcast %cst_7 : f32 to vector<1x128xf32>
    %15 = arith.addf %13, %14 : vector<1x128xf32>
    %16 = math.rsqrt %15 : vector<1x128xf32>
    %c0_8 = arith.constant 0 : index
    %c0_9 = arith.constant 0 : index
    %17 = vector.load %arg3[%c0_8, %c0_9] : memref<1x128xf32, #tpu.memory_space<vmem>>, vector<1x128xf32>
    %18 = arith.mulf %17, %16 : vector<1x128xf32>
    %c0_10 = arith.constant 0 : index
    %c0_11 = arith.constant 0 : index
    %19 = vector.load %arg4[%c0_10, %c0_11] : memref<1x128xf32, #tpu.memory_space<vmem>>, vector<1x128xf32>
    %20 = arith.mulf %6, %18 : vector<1x128xf32>
    %21 = arith.subf %19, %20 : vector<1x128xf32>
    %22 = vector.broadcast %18 : vector<1x128xf32> to vector<32x128xf32>
    %23 = arith.mulf %2, %22 : vector<32x128xf32>
    %24 = vector.broadcast %21 : vector<1x128xf32> to vector<32x128xf32>
    %25 = arith.addf %23, %24 : vector<32x128xf32>
    %cst_12 = arith.constant 0.000000e+00 : f32
    %26 = vector.broadcast %cst_12 : f32 to vector<32x128xf32>
    %27 = arith.maximumf %25, %26 : vector<32x128xf32>
    %28 = arith.truncf %27 : vector<32x128xf32> to vector<32x128xbf16>
    %c0_13 = arith.constant 0 : index
    %c0_14 = arith.constant 0 : index
    %29 = vector.load %arg5[%c0_13, %c0_14] : memref<32x128xbf16, #tpu.memory_space<vmem>>, vector<32x128xbf16>
    tpu.vector_store %arg5[%c0_13, %c0_14], %28 {strides = array<i32>} : memref<32x128xbf16, #tpu.memory_space<vmem>>, vector<32x128xbf16>,
    return
  }
  func.func @transform_0(%arg0: i32) -> (i32, i32) {
    %c0_i32 = arith.constant 0 : i32
    %c0_i32_0 = arith.constant 0 : i32
    %c0_i32_1 = arith.constant 0 : i32
    return %c0_i32, %c0_i32_0 : i32, i32
  }
  func.func @transform_1(%arg0: i32) -> (i32, i32) {
    %c0_i32 = arith.constant 0 : i32
    %c0_i32_0 = arith.constant 0 : i32
    %c0_i32_1 = arith.constant 0 : i32
    return %c0_i32, %c0_i32_0 : i32, i32
  }
  func.func @transform_2(%arg0: i32) -> (i32, i32) {
    %c0_i32 = arith.constant 0 : i32
    %c0_i32_0 = arith.constant 0 : i32
    %c0_i32_1 = arith.constant 0 : i32
    return %c0_i32, %c0_i32_0 : i32, i32
  }
  func.func @transform_3(%arg0: i32) -> (i32, i32) {
    %c0_i32 = arith.constant 0 : i32
    %c0_i32_0 = arith.constant 0 : i32
    %c0_i32_1 = arith.constant 0 : i32
    return %c0_i32, %c0_i32_0 : i32, i32
  }
  func.func @transform_4(%arg0: i32) -> (i32, i32) {
    %c0_i32 = arith.constant 0 : i32
    %c0_i32_0 = arith.constant 0 : i32
    %c0_i32_1 = arith.constant 0 : i32
    return %c0_i32, %c0_i32_0 : i32, i32
  }
}

module attributes {stable_mosaic.version = 11 : i64} {
  func.func @_conv_bn_act_single_kernel(%arg0: i32, %arg1: memref<128x576xbf16, #tpu.memory_space<vmem>>, %arg2: memref<576x128xbf16, #tpu.memory_space<vmem>>, %arg3: memref<1x128xf32, #tpu.memory_space<vmem>>, %arg4: memref<1x128xf32, #tpu.memory_space<vmem>>, %arg5: memref<128x128xbf16, #tpu.memory_space<vmem>>) attributes {dimension_semantics = [#tpu.dimension_semantics<arbitrary>], iteration_bounds = array<i64: 1>, scalar_prefetch = 0 : i64, scratch_operands = 0 : i64, tpu.core_type = #tpu.core_type<tc>, window_params = [{pipeline_mode = #tpu.pipeline_mode<synchronous>, transform_indices = @transform_0, window_bounds = array<i64: 128, 576>}, {pipeline_mode = #tpu.pipeline_mode<synchronous>, transform_indices = @transform_1, window_bounds = array<i64: 576, 128>}, {pipeline_mode = #tpu.pipeline_mode<synchronous>, transform_indices = @transform_2, window_bounds = array<i64: 1, 128>}, {pipeline_mode = #tpu.pipeline_mode<synchronous>, transform_indices = @transform_3, window_bounds = array<i64: 1, 128>}, {pipeline_mode = #tpu.pipeline_mode<synchronous>, transform_indices = @transform_4, window_bounds = array<i64: 128, 128>}]} {
    %c0 = arith.constant 0 : index
    %c0_0 = arith.constant 0 : index
    %0 = vector.load %arg1[%c0, %c0_0] : memref<128x576xbf16, #tpu.memory_space<vmem>>, vector<128x576xbf16>
    %c0_1 = arith.constant 0 : index
    %c0_2 = arith.constant 0 : index
    %1 = vector.load %arg2[%c0_1, %c0_2] : memref<576x128xbf16, #tpu.memory_space<vmem>>, vector<576x128xbf16>
    %cst = arith.constant dense<0.000000e+00> : vector<128x128xf32>
    %2 = tpu.matmul %0, %1, %cst {dimension_numbers = #tpu.dot_dimension_numbers<[1], [0], [0], [1], [0, 0, 1, 1], [], []>} : vector<128x576xbf16>, vector<576x128xbf16>, vector<128x128xf32> -> vector<128x128xf32>
    %cst_3 = arith.constant dense<0.000000e+00> : vector<128xf32>
    %3 = vector.multi_reduction <add>, %2, %cst_3 [0] : vector<128x128xf32> to vector<128xf32>
    %4 = vector.shape_cast %3 : vector<128xf32> to vector<1x128xf32>
    %cst_4 = arith.constant 7.812500e-03 : f32
    %5 = vector.broadcast %cst_4 : f32 to vector<1x128xf32>
    %6 = arith.mulf %4, %5 : vector<1x128xf32>
    %7 = vector.broadcast %6 : vector<1x128xf32> to vector<128x128xf32>
    %8 = arith.subf %2, %7 : vector<128x128xf32>
    %9 = arith.mulf %8, %8 : vector<128x128xf32>
    %cst_5 = arith.constant dense<0.000000e+00> : vector<128xf32>
    %10 = vector.multi_reduction <add>, %9, %cst_5 [0] : vector<128x128xf32> to vector<128xf32>
    %11 = vector.shape_cast %10 : vector<128xf32> to vector<1x128xf32>
    %cst_6 = arith.constant 7.812500e-03 : f32
    %12 = vector.broadcast %cst_6 : f32 to vector<1x128xf32>
    %13 = arith.mulf %11, %12 : vector<1x128xf32>
    %cst_7 = arith.constant 9.99999974E-6 : f32
    %14 = vector.broadcast %cst_7 : f32 to vector<1x128xf32>
    %15 = arith.addf %13, %14 : vector<1x128xf32>
    %16 = math.rsqrt %15 : vector<1x128xf32>
    %c0_8 = arith.constant 0 : index
    %c0_9 = arith.constant 0 : index
    %17 = vector.load %arg3[%c0_8, %c0_9] : memref<1x128xf32, #tpu.memory_space<vmem>>, vector<1x128xf32>
    %18 = arith.mulf %17, %16 : vector<1x128xf32>
    %c0_10 = arith.constant 0 : index
    %c0_11 = arith.constant 0 : index
    %19 = vector.load %arg4[%c0_10, %c0_11] : memref<1x128xf32, #tpu.memory_space<vmem>>, vector<1x128xf32>
    %20 = arith.mulf %6, %18 : vector<1x128xf32>
    %21 = arith.subf %19, %20 : vector<1x128xf32>
    %22 = vector.broadcast %18 : vector<1x128xf32> to vector<128x128xf32>
    %23 = arith.mulf %2, %22 : vector<128x128xf32>
    %24 = vector.broadcast %21 : vector<1x128xf32> to vector<128x128xf32>
    %25 = arith.addf %23, %24 : vector<128x128xf32>
    %cst_12 = arith.constant 0.000000e+00 : f32
    %26 = vector.broadcast %cst_12 : f32 to vector<128x128xf32>
    %27 = arith.maximumf %25, %26 : vector<128x128xf32>
    %28 = arith.truncf %27 : vector<128x128xf32> to vector<128x128xbf16>
    %c0_13 = arith.constant 0 : index
    %c0_14 = arith.constant 0 : index
    %29 = vector.load %arg5[%c0_13, %c0_14] : memref<128x128xbf16, #tpu.memory_space<vmem>>, vector<128x128xbf16>
    tpu.vector_store %arg5[%c0_13, %c0_14], %28 {strides = array<i32>} : memref<128x128xbf16, #tpu.memory_space<vmem>>, vector<128x128xbf16>,
    return
  }
  func.func @transform_0(%arg0: i32) -> (i32, i32) {
    %c0_i32 = arith.constant 0 : i32
    %c0_i32_0 = arith.constant 0 : i32
    %c0_i32_1 = arith.constant 0 : i32
    return %c0_i32, %c0_i32_0 : i32, i32
  }
  func.func @transform_1(%arg0: i32) -> (i32, i32) {
    %c0_i32 = arith.constant 0 : i32
    %c0_i32_0 = arith.constant 0 : i32
    %c0_i32_1 = arith.constant 0 : i32
    return %c0_i32, %c0_i32_0 : i32, i32
  }
  func.func @transform_2(%arg0: i32) -> (i32, i32) {
    %c0_i32 = arith.constant 0 : i32
    %c0_i32_0 = arith.constant 0 : i32
    %c0_i32_1 = arith.constant 0 : i32
    return %c0_i32, %c0_i32_0 : i32, i32
  }
  func.func @transform_3(%arg0: i32) -> (i32, i32) {
    %c0_i32 = arith.constant 0 : i32
    %c0_i32_0 = arith.constant 0 : i32
    %c0_i32_1 = arith.constant 0 : i32
    return %c0_i32, %c0_i32_0 : i32, i32
  }
  func.func @transform_4(%arg0: i32) -> (i32, i32) {
    %c0_i32 = arith.constant 0 : i32
    %c0_i32_0 = arith.constant 0 : i32
    %c0_i32_1 = arith.constant 0 : i32
    return %c0_i32, %c0_i32_0 : i32, i32
  }
}

module attributes {stable_mosaic.version = 11 : i64} {
  func.func @_conv_bn_act_single_kernel(%arg0: i32, %arg1: memref<512x288xbf16, #tpu.memory_space<vmem>>, %arg2: memref<288x128xbf16, #tpu.memory_space<vmem>>, %arg3: memref<1x128xf32, #tpu.memory_space<vmem>>, %arg4: memref<1x128xf32, #tpu.memory_space<vmem>>, %arg5: memref<512x128xbf16, #tpu.memory_space<vmem>>) attributes {dimension_semantics = [#tpu.dimension_semantics<arbitrary>], iteration_bounds = array<i64: 1>, scalar_prefetch = 0 : i64, scratch_operands = 0 : i64, tpu.core_type = #tpu.core_type<tc>, window_params = [{pipeline_mode = #tpu.pipeline_mode<synchronous>, transform_indices = @transform_0, window_bounds = array<i64: 512, 288>}, {pipeline_mode = #tpu.pipeline_mode<synchronous>, transform_indices = @transform_1, window_bounds = array<i64: 288, 128>}, {pipeline_mode = #tpu.pipeline_mode<synchronous>, transform_indices = @transform_2, window_bounds = array<i64: 1, 128>}, {pipeline_mode = #tpu.pipeline_mode<synchronous>, transform_indices = @transform_3, window_bounds = array<i64: 1, 128>}, {pipeline_mode = #tpu.pipeline_mode<synchronous>, transform_indices = @transform_4, window_bounds = array<i64: 512, 128>}]} {
    %c0 = arith.constant 0 : index
    %c0_0 = arith.constant 0 : index
    %0 = vector.load %arg1[%c0, %c0_0] : memref<512x288xbf16, #tpu.memory_space<vmem>>, vector<512x288xbf16>
    %c0_1 = arith.constant 0 : index
    %c0_2 = arith.constant 0 : index
    %1 = vector.load %arg2[%c0_1, %c0_2] : memref<288x128xbf16, #tpu.memory_space<vmem>>, vector<288x128xbf16>
    %cst = arith.constant dense<0.000000e+00> : vector<512x128xf32>
    %2 = tpu.matmul %0, %1, %cst {dimension_numbers = #tpu.dot_dimension_numbers<[1], [0], [0], [1], [0, 0, 1, 1], [], []>} : vector<512x288xbf16>, vector<288x128xbf16>, vector<512x128xf32> -> vector<512x128xf32>
    %cst_3 = arith.constant dense<0.000000e+00> : vector<128xf32>
    %3 = vector.multi_reduction <add>, %2, %cst_3 [0] : vector<512x128xf32> to vector<128xf32>
    %4 = vector.shape_cast %3 : vector<128xf32> to vector<1x128xf32>
    %cst_4 = arith.constant 0.001953125 : f32
    %5 = vector.broadcast %cst_4 : f32 to vector<1x128xf32>
    %6 = arith.mulf %4, %5 : vector<1x128xf32>
    %7 = vector.broadcast %6 : vector<1x128xf32> to vector<512x128xf32>
    %8 = arith.subf %2, %7 : vector<512x128xf32>
    %9 = arith.mulf %8, %8 : vector<512x128xf32>
    %cst_5 = arith.constant dense<0.000000e+00> : vector<128xf32>
    %10 = vector.multi_reduction <add>, %9, %cst_5 [0] : vector<512x128xf32> to vector<128xf32>
    %11 = vector.shape_cast %10 : vector<128xf32> to vector<1x128xf32>
    %cst_6 = arith.constant 0.001953125 : f32
    %12 = vector.broadcast %cst_6 : f32 to vector<1x128xf32>
    %13 = arith.mulf %11, %12 : vector<1x128xf32>
    %cst_7 = arith.constant 9.99999974E-6 : f32
    %14 = vector.broadcast %cst_7 : f32 to vector<1x128xf32>
    %15 = arith.addf %13, %14 : vector<1x128xf32>
    %16 = math.rsqrt %15 : vector<1x128xf32>
    %c0_8 = arith.constant 0 : index
    %c0_9 = arith.constant 0 : index
    %17 = vector.load %arg3[%c0_8, %c0_9] : memref<1x128xf32, #tpu.memory_space<vmem>>, vector<1x128xf32>
    %18 = arith.mulf %17, %16 : vector<1x128xf32>
    %c0_10 = arith.constant 0 : index
    %c0_11 = arith.constant 0 : index
    %19 = vector.load %arg4[%c0_10, %c0_11] : memref<1x128xf32, #tpu.memory_space<vmem>>, vector<1x128xf32>
    %20 = arith.mulf %6, %18 : vector<1x128xf32>
    %21 = arith.subf %19, %20 : vector<1x128xf32>
    %22 = vector.broadcast %18 : vector<1x128xf32> to vector<512x128xf32>
    %23 = arith.mulf %2, %22 : vector<512x128xf32>
    %24 = vector.broadcast %21 : vector<1x128xf32> to vector<512x128xf32>
    %25 = arith.addf %23, %24 : vector<512x128xf32>
    %26 = arith.negf %25 : vector<512x128xf32>
    %27 = math.exp %26 : vector<512x128xf32>
    %cst_12 = arith.constant 1.000000e+00 : f32
    %28 = vector.broadcast %cst_12 : f32 to vector<512x128xf32>
    %29 = arith.addf %28, %27 : vector<512x128xf32>
    %30 = arith.divf %28, %29 : vector<512x128xf32>
    %31 = arith.truncf %30 : vector<512x128xf32> to vector<512x128xbf16>
    %c0_13 = arith.constant 0 : index
    %c0_14 = arith.constant 0 : index
    %32 = vector.load %arg5[%c0_13, %c0_14] : memref<512x128xbf16, #tpu.memory_space<vmem>>, vector<512x128xbf16>
    tpu.vector_store %arg5[%c0_13, %c0_14], %31 {strides = array<i32>} : memref<512x128xbf16, #tpu.memory_space<vmem>>, vector<512x128xbf16>,
    return
  }
  func.func @transform_0(%arg0: i32) -> (i32, i32) {
    %c0_i32 = arith.constant 0 : i32
    %c0_i32_0 = arith.constant 0 : i32
    %c0_i32_1 = arith.constant 0 : i32
    return %c0_i32, %c0_i32_0 : i32, i32
  }
  func.func @transform_1(%arg0: i32) -> (i32, i32) {
    %c0_i32 = arith.constant 0 : i32
    %c0_i32_0 = arith.constant 0 : i32
    %c0_i32_1 = arith.constant 0 : i32
    return %c0_i32, %c0_i32_0 : i32, i32
  }
  func.func @transform_2(%arg0: i32) -> (i32, i32) {
    %c0_i32 = arith.constant 0 : i32
    %c0_i32_0 = arith.constant 0 : i32
    %c0_i32_1 = arith.constant 0 : i32
    return %c0_i32, %c0_i32_0 : i32, i32
  }
  func.func @transform_3(%arg0: i32) -> (i32, i32) {
    %c0_i32 = arith.constant 0 : i32
    %c0_i32_0 = arith.constant 0 : i32
    %c0_i32_1 = arith.constant 0 : i32
    return %c0_i32, %c0_i32_0 : i32, i32
  }
  func.func @transform_4(%arg0: i32) -> (i32, i32) {
    %c0_i32 = arith.constant 0 : i32
    %c0_i32_0 = arith.constant 0 : i32
    %c0_i32_1 = arith.constant 0 : i32
    return %c0_i32, %c0_i32_0 : i32, i32
  }
}

</mosaic_0001>

<bundles_post_ra>
// kernel: conv2d_ae_forward.6
= control target key start
LH: loop header
LB: loop body
LE: loop exit
PB: predicated region body
PF: predicated region fallthrough
CT: control target
= control target key end

     0   :  { %vm98_vm0 = vcmask 392192   ;;  %s840_s1 = inlined_call_operand.vmem [shape: bf16[48,128], index: 1, kind: input, shape index: {}]   ;;  %s841_s0 = inlined_call_operand.vmem [shape: bf16[128,48], index: 0, kind: input, shape index: {}]   ;;  %s842_s2 = inlined_call_operand.vmem [shape: f32[1,128], index: 2, kind: input, shape index: {}]   ;;  %s843_s3 = inlined_call_operand.vmem [shape: f32[1,128], index: 3, kind: input, shape index: {}]   ;;  %s844_s4 = inlined_call_operand.vmem [shape: bf16[128,128], index: 4, kind: output, shape index: {}]  }
   0x1   :  { %v616_v0 = vld [vmem:[%s840_s1 + $0x10] sm:$0xff]   ;;  %v617_v1 = vld [vmem:[%s840_s1 + $0x8] sm:$0xff]   ;;  %v619_v2 = vld [vmem:[%s841_s0] sm:$0xff]  }
   0x2   :  { %588 = vmatprep.subr.bf16.mxu0 %v616_v0  ;;  %610 = vmatprep.subr.bf16.mxu1 %v616_v0  ;;  %v618_v3 = vld [vmem:[%s840_s1] sm:$0xff]   ;;  %v620_v5 = vld [vmem:[%s841_s0 + $0x8] sm:$0xff]   ;;  %v621_v7 = vld [vmem:[%s841_s0 + $0x10] sm:$0xff]  }
   0x3   :  { %589 = vmatpush3.bf16.msra.mxu0 %v616_v0  ;;  %613 = vmatpush3.bf16.msra.mxu1 %v616_v0  ;;  %v623_v4 = vld [vmem:[%s841_s0 + $0x20] sm:$0xff]   ;;  %v624_v6 = vld [vmem:[%s841_s0 + $0x28] sm:$0xff]   ;;  %v625_v8 = vld [vmem:[%s841_s0 + $0x30] sm:$0xff]  }
   0x4   :  { %590 = vmatprep.subr.bf16.mxu0 %v617_v1  ;;  %611 = vmatprep.subr.bf16.mxu1 %v617_v1  ;;  %v622_v9 = vld [vmem:[%s841_s0 + $0x18] sm:$0xff]  }
   0x5   :  { %594 = vmatprep.mubr.msk.bf16.mxu0 %vm98_vm0, %v619_v2  ;;  %602 = vmatprep.mubr.msk.bf16.mxu1 %vm98_vm0, %v623_v4  ;;  %v626_v10 = vld [vmem:[%s841_s0 + $0x38] sm:$0xff]  }
   0x7   :  { %591 = vmatpush3.bf16.msra.mxu0 %v617_v1  ;;  %614 = vmatpush3.bf16.msra.mxu1 %v617_v1 }
   0x8   :  { %592 = vmatprep.subr.bf16.mxu0 %v618_v3  ;;  %612 = vmatprep.subr.bf16.mxu1 %v618_v3 }
   0xb   :  { %593 = vmatpush3.bf16.msra.mxu0 %v618_v3  ;;  %615 = vmatpush3.bf16.msra.mxu1 %v618_v3 }
   0xe   :  { %595 = vmatmul.mubr.msk.bf16.vlgmr.msra.gmra.mxu0 %vm98_vm0, %v620_v5  ;;  %603 = vmatmul.mubr.msk.bf16.vlgmr.msra.gmra.mxu1 %vm98_vm0, %v624_v6 }
   0xf   :  { %598 = vmatprep.mubr.msk.bf16.mxu0 %vm98_vm0, %v621_v7  ;;  %606 = vmatprep.mubr.msk.bf16.mxu1 %vm98_vm0, %v625_v8 }
  0x16   :  { %599 = vmatmul.mubr.msk.bf16.gmra.mxu0 %vm98_vm0, %v622_v9  ;;  %607 = vmatmul.mubr.msk.bf16.gmra.mxu1 %vm98_vm0, %v626_v10 }
  0xce   :  { %v695_v11 = vpop.f32.mrf.mxu0  ;;  %v699_v13 = vpop.f32.mrf.mxu1 }
  0xd0   :  { %v697_v12 = vpop.f32.mrf.mxu0  ;;  %v705_v16 = vpop.f32.mrf.mxu1 }
  0xd2   :  { %v701_v14 = vpop.f32.mrf.mxu0  ;;  %v714_v21 = vpop.f32.mrf.mxu1 }
  0xd4   :  { %v703_v15 = vpop.f32.mrf.mxu0  ;;  %v722_v26 = vpop.f32.mrf.mxu1 }
  0xd5   :  { %v220_v17 = vadd.f32 %v703_v15, %v697_v12 }
  0xd6   :  { %v709_v18 = vpop.f32.mrf.mxu0  ;;  %v726_v29 = vpop.f32.mrf.mxu1 }
  0xd7   :  { %v221_v19 = vadd.f32 %v695_v11, %v220_v17 }
  0xd8   :  { %v712_v20 = vpop.f32.mrf.mxu0  ;;  %v730_v32 = vpop.f32.mrf.mxu1 }
  0xd9   :  { %v222_v22 = vadd.f32 %v701_v14, %v221_v19 }
  0xda   :  { %v717_v23 = vpop.f32.mrf.mxu0  ;;  %v734_v35 = vpop.f32.mrf.mxu1 }
  0xdb   :  { %v223_v24 = vadd.f32 %v222_v22, %v712_v20 }
  0xdc   :  { %v720_v25 = vpop.f32.mrf.mxu0  ;;  %v738_v38 = vpop.f32.mrf.mxu1 }
  0xdd   :  { %v224_v27 = vadd.f32 %v223_v24, %v720_v25 }
  0xdf   :  { %v225_v28 = vadd.f32 %v709_v18, %v224_v27 }
  0xe1   :  { %v226_v30 = vadd.f32 %v717_v23, %v225_v28 }
  0xe3   :  { %v227_v31 = vadd.f32 %v226_v30, %v705_v16 }
  0xe5   :  { %v228_v33 = vadd.f32 %v227_v31, %v722_v26 }
  0xe7   :  { %v229_v34 = vadd.f32 %v699_v13, %v228_v33 }
  0xe9   :  { %v230_v36 = vadd.f32 %v714_v21, %v229_v34 }
  0xeb   :  { %v231_v37 = vadd.f32 %v230_v36, %v730_v32 }
  0xed   :  { %v232_v39 = vadd.f32 %v231_v37, %v738_v38 }
  0xef   :  { %v233_v40 = vadd.f32 %v726_v29, %v232_v39 }
  0xf1   :  { %v234_v41 = vadd.f32 %v734_v35, %v233_v40 }
  0xf3   :  { %v235_v42 = vrot.slane %v234_v41, 4 }
  0xf5   :  { %v236_v43 = vadd.f32 %v235_v42, %v234_v41 }
  0xf7   :  { %v237_v44 = vrot.slane %v236_v43, 2 }
  0xf9   :  { %v238_v45 = vadd.f32 %v237_v44, %v236_v43 }
  0xfb   :  { %v239_v46 = vrot.slane %v238_v45, 1 }
  0xfd   :  { %v240_v47 = vadd.f32 %v239_v46, %v238_v45 }
  0xff   :  { %v743_v48 = vmul.f32 0.0078125, %v240_v47 }
 0x101   :  { %v242_v49 = vsub.f32 %v697_v12, %v743_v48  ;;  %v243_v50 = vsub.f32 %v703_v15, %v743_v48  ;;  %v244_v51 = vsub.f32 %v695_v11, %v743_v48  ;;  %v245_v54 = vsub.f32 %v701_v14, %v743_v48 }
 0x102   :  { %v246_v55 = vsub.f32 %v712_v20, %v743_v48  ;;  %v247_v58 = vsub.f32 %v720_v25, %v743_v48  ;;  %v248_v61 = vsub.f32 %v709_v18, %v743_v48  ;;  %v249_v0 = vsub.f32 %v717_v23, %v743_v48 }
 0x103   :  { %v258_v52 = vmul.f32 %v242_v49, %v242_v49  ;;  %v259_v53 = vmul.f32 %v243_v50, %v243_v50  ;;  %v260_v56 = vmul.f32 %v244_v51, %v244_v51  ;;  %v261_v59 = vmul.f32 %v245_v54, %v245_v54 }
 0x104   :  { %v262_v62 = vmul.f32 %v246_v55, %v246_v55  ;;  %v263_v1 = vmul.f32 %v247_v58, %v247_v58  ;;  %v250_v3 = vsub.f32 %v705_v16, %v743_v48  ;;  %v264_v4 = vmul.f32 %v248_v61, %v248_v61 }
 0x105   :  { %v274_v57 = vadd.f32 %v259_v53, %v258_v52  ;;  %v251_v6 = vsub.f32 %v722_v26, %v743_v48  ;;  %v265_v7 = vmul.f32 %v249_v0, %v249_v0  ;;  %v252_v9 = vsub.f32 %v699_v13, %v743_v48 }
 0x106   :  { %v266_v10 = vmul.f32 %v250_v3, %v250_v3  ;;  %v253_v19 = vsub.f32 %v714_v21, %v743_v48  ;;  %v254_v27 = vsub.f32 %v730_v32, %v743_v48  ;;  %v255_v31 = vsub.f32 %v738_v38, %v743_v48 }
 0x107   :  { %v275_v60 = vadd.f32 %v274_v57, %v260_v56  ;;  %v267_v22 = vmul.f32 %v251_v6, %v251_v6  ;;  %v268_v28 = vmul.f32 %v252_v9, %v252_v9  ;;  %v256_v36 = vsub.f32 %v726_v29, %v743_v48 }
 0x108   :  { %v269_v33 = vmul.f32 %v253_v19, %v253_v19  ;;  %v270_v37 = vmul.f32 %v254_v27, %v254_v27  ;;  %v257_v40 = vsub.f32 %v734_v35, %v743_v48  ;;  %v271_v41 = vmul.f32 %v255_v31, %v255_v31 }
 0x109   :  { %v276_v63 = vadd.f32 %v275_v60, %v261_v59  ;;  %v272_v43 = vmul.f32 %v256_v36, %v256_v36  ;;  %v304_v57 = vlaneseq  ;;  %v298_v59 = vld [vmem:[%s842_s2] sm:$0x1] }
 0x10a   :  { %v273_v45 = vmul.f32 %v257_v40, %v257_v40 }
 0x10b   :  { %v277_v2 = vadd.f32 %v276_v63, %v262_v62  ;;  %v305_v58 = vshrl.u32 %v304_v57, 7  ;;  %v300_v63 = vld [vmem:[%s843_s3] sm:$0x1] }
 0x10d   :  { %v278_v5 = vadd.f32 %v277_v2, %v263_v1  ;;  %v306_v60 = vsub.s32 0, %v305_v58 }
 0x10f   :  { %v279_v8 = vadd.f32 %v278_v5, %v264_v4 }
 0x111   :  { %v280_v17 = vadd.f32 %v279_v8, %v265_v7 }
 0x113   :  { %v281_v24 = vadd.f32 %v280_v17, %v266_v10 }
 0x115   :  { %v282_v30 = vadd.f32 %v281_v24, %v267_v22 }
 0x117   :  { %v283_v34 = vadd.f32 %v282_v30, %v268_v28 }
 0x119   :  { %v284_v39 = vadd.f32 %v283_v34, %v269_v33 }
 0x11b   :  { %v285_v42 = vadd.f32 %v284_v39, %v270_v37 }
 0x11d   :  { %v286_v44 = vadd.f32 %v285_v42, %v271_v41 }
 0x11f   :  { %v287_v46 = vadd.f32 %v286_v44, %v272_v43 }
 0x121   :  { %v288_v47 = vadd.f32 %v287_v46, %v273_v45 }
 0x123   :  { %v289_v49 = vrot.slane %v288_v47, 4 }
 0x125   :  { %v290_v50 = vadd.f32 %v289_v49, %v288_v47 }
 0x127   :  { %v291_v51 = vrot.slane %v290_v50, 2 }
 0x129   :  { %v292_v52 = vadd.f32 %v291_v51, %v290_v50 }
 0x12b   :  { %v293_v53 = vrot.slane %v292_v52, 1 }
 0x12d   :  { %v294_v54 = vadd.f32 %v293_v53, %v292_v52 }
 0x12f   :  { %v295_v55 = vmul.f32 0.0078125, %v294_v54 }
 0x131   :  { %v296_v56 = vadd.f32 1e-05, %v295_v55 }
 0x133   :  { %627 = vrsqrt.f32 %v296_v56 }
 0x140   :  { %v628_v61 = vpop.eup %627 }
 0x141   :  { %v299_v62 = vmul.f32 %v628_v61, %v298_v59 }
 0x143   :  { %v301_v0 = vmul.f32 %v299_v62, %v743_v48  ;;  %v307_v1 = vrot.slane %v299_v62, %v306_v60 }
 0x145   :  { %v302_v2 = vsub.f32 %v300_v63, %v301_v0  ;;  %v309_v3 = vmul.f32 %v307_v1, %v697_v12  ;;  %v310_v4 = vmul.f32 %v307_v1, %v703_v15  ;;  %v311_v5 = vmul.f32 %v695_v11, %v307_v1 }
 0x146   :  { %v312_v6 = vmul.f32 %v701_v14, %v307_v1  ;;  %v313_v7 = vmul.f32 %v307_v1, %v712_v20  ;;  %v314_v8 = vmul.f32 %v307_v1, %v720_v25  ;;  %v315_v9 = vmul.f32 %v709_v18, %v307_v1 }
 0x147   :  { %v316_v10 = vmul.f32 %v717_v23, %v307_v1  ;;  %v317_v48 = vmul.f32 %v307_v1, %v705_v16  ;;  %v318_v17 = vmul.f32 %v307_v1, %v722_v26  ;;  %v319_v12 = vmul.f32 %v699_v13, %v307_v1 }
 0x148   :  { %v320_v15 = vmul.f32 %v714_v21, %v307_v1  ;;  %v329_v19 = vrot.slane %v302_v2, %v306_v60  ;;  %v321_v11 = vmul.f32 %v307_v1, %v730_v32  ;;  %v322_v14 = vmul.f32 %v307_v1, %v738_v38 }
 0x149   :  { %v323_v20 = vmul.f32 %v726_v29, %v307_v1  ;;  %v324_v25 = vmul.f32 %v734_v35, %v307_v1 }
 0x14a   :  { %v331_v18 = vadd.f32 %v329_v19, %v309_v3  ;;  %v332_v22 = vadd.f32 %v329_v19, %v310_v4  ;;  %v333_v23 = vadd.f32 %v329_v19, %v311_v5  ;;  %v334_v24 = vadd.f32 %v329_v19, %v312_v6 }
 0x14b   :  { %v335_v16 = vadd.f32 %v329_v19, %v313_v7  ;;  %v336_v27 = vadd.f32 %v329_v19, %v314_v8  ;;  %v337_v26 = vadd.f32 %v329_v19, %v315_v9  ;;  %v338_v28 = vadd.f32 %v329_v19, %v316_v10 }
 0x14c   :  { %v339_v13 = vadd.f32 %v329_v19, %v317_v48  ;;  %v340_v30 = vadd.f32 %v329_v19, %v318_v17  ;;  %v341_v21 = vadd.f32 %v329_v19, %v319_v12  ;;  %v342_v31 = vadd.f32 %v329_v19, %v320_v15 }
 0x14d   :  { %v343_v33 = vadd.f32 %v329_v19, %v321_v11  ;;  %v344_v32 = vadd.f32 %v329_v19, %v322_v14  ;;  %v345_v34 = vadd.f32 %v329_v19, %v323_v20  ;;  %v346_v38 = vadd.f32 %v329_v19, %v324_v25 }
 0x14e   :  { %vm347_vm1 = vcmp.gt.f32.partialorder %v331_v18, 0.0  ;;  %vm348_vm2 = vcmp.gt.f32.partialorder %v332_v22, 0.0  ;;  %vm349_vm3 = vcmp.gt.f32.partialorder %v333_v23, 0.0  ;;  %vm350_vm4 = vcmp.gt.f32.partialorder %v334_v24, 0.0 }
 0x14f   :  { %vm351_vm5 = vcmp.gt.f32.partialorder %v335_v16, 0.0  ;;  %vm352_vm6 = vcmp.gt.f32.partialorder %v336_v27, 0.0  ;;  %vm353_vm7 = vcmp.gt.f32.partialorder %v337_v26, 0.0  ;;  %vm354_vm8 = vcmp.gt.f32.partialorder %v338_v28, 0.0 }
 0x150   :  { %vm355_vm9 = vcmp.gt.f32.partialorder %v339_v13, 0.0  ;;  %vm356_vm10 = vcmp.gt.f32.partialorder %v340_v30, 0.0  ;;  %vm357_vm11 = vcmp.gt.f32.partialorder %v341_v21, 0.0  ;;  %vm358_vm12 = vcmp.gt.f32.partialorder %v342_v31, 0.0 }
 0x151   :  { %vm359_vm13 = vcmp.gt.f32.partialorder %v343_v33, 0.0  ;;  %vm360_vm14 = vcmp.gt.f32.partialorder %v344_v32, 0.0  ;;  %vm361_vm15 = vcmp.gt.f32.partialorder %v345_v34, 0.0  ;;  %vm362_vm0 = vcmp.gt.f32.partialorder %v346_v38, 0.0 }
 0x152   :  { %v363_v29 = vmul.f32 0.01, %v331_v18  ;;  %v364_v35 = vmul.f32 0.01, %v332_v22  ;;  %v365_v36 = vmul.f32 0.01, %v333_v23 }
 0x153   :  { %v366_v37 = vmul.f32 0.01, %v334_v24  ;;  %v367_v39 = vmul.f32 0.01, %v335_v16  ;;  %v368_v40 = vmul.f32 0.01, %v336_v27 }
 0x154   :  { %v369_v41 = vmul.f32 0.01, %v337_v26  ;;  %v370_v42 = vmul.f32 0.01, %v338_v28  ;;  %v371_v43 = vmul.f32 0.01, %v339_v13  ;;  %v379_v44 = vsel %vm347_vm1, %v331_v18, %v363_v29 }
 0x155   :  { %v372_v45 = vmul.f32 0.01, %v340_v30  ;;  %v373_v46 = vmul.f32 0.01, %v341_v21  ;;  %v374_v47 = vmul.f32 0.01, %v342_v31  ;;  %v380_v49 = vsel %vm348_vm2, %v332_v22, %v364_v35 }
 0x156   :  { %v375_v50 = vmul.f32 0.01, %v343_v33  ;;  %v376_v51 = vmul.f32 0.01, %v344_v32  ;;  %v377_v52 = vmul.f32 0.01, %v345_v34  ;;  %v381_v53 = vsel %vm349_vm3, %v333_v23, %v365_v36 }
 0x157   :  { %v378_v54 = vmul.f32 0.01, %v346_v38  ;;  %v382_v55 = vsel %vm350_vm4, %v334_v24, %v366_v37  ;;  %v383_v56 = vsel %vm351_vm5, %v335_v16, %v367_v39  ;;  %v384_v57 = vsel %vm352_vm6, %v336_v27, %v368_v40 }
 0x158   :  { %v385_v58 = vsel %vm353_vm7, %v337_v26, %v369_v41  ;;  %v386_v59 = vsel %vm354_vm8, %v338_v28, %v370_v42  ;;  %v387_v60 = vsel %vm355_vm9, %v339_v13, %v371_v43  ;;  %v388_v61 = vsel %vm356_vm10, %v340_v30, %v372_v45 }
 0x159   :  { %v389_v62 = vsel %vm357_vm11, %v341_v21, %v373_v46  ;;  %v390_v63 = vsel %vm358_vm12, %v342_v31, %v374_v47  ;;  %v391_v0 = vsel %vm359_vm13, %v343_v33, %v375_v50  ;;  %v392_v1 = vsel %vm360_vm14, %v344_v32, %v376_v51 }
 0x15a   :  { %v393_v2 = vsel %vm361_vm15, %v345_v34, %v377_v52  ;;  %v394_v3 = vsel %vm362_vm0, %v346_v38, %v378_v54  ;;  %v533_v4 = vpack.c.bf16 %v380_v49, %v379_v44  ;;  %v538_v5 = vpack.c.bf16 %v382_v55, %v381_v53 }
 0x15b   :  { %v543_v6 = vpack.c.bf16 %v384_v57, %v383_v56  ;;  %v548_v7 = vpack.c.bf16 %v386_v59, %v385_v58  ;;  %v553_v8 = vpack.c.bf16 %v388_v61, %v387_v60  ;;  %v558_v9 = vpack.c.bf16 %v390_v63, %v389_v62 }
 0x15c   :  { %534 = vst [vmem:[%s844_s4] sm:$0xff] %v533_v4   ;;  %570 = vst [vmem:[%s844_s4 + $0x8] sm:$0xff] %v538_v5   ;;  %v563_v10 = vpack.c.bf16 %v392_v1, %v391_v0  ;;  %v568_v48 = vpack.c.bf16 %v394_v3, %v393_v2 }
 0x15d   :  { %571 = vst [vmem:[%s844_s4 + $0x10] sm:$0xff] %v543_v6   ;;  %572 = vst [vmem:[%s844_s4 + $0x18] sm:$0xff] %v548_v7  }
 0x15e   :  { %573 = vst [vmem:[%s844_s4 + $0x20] sm:$0xff] %v553_v8   ;;  %574 = vst [vmem:[%s844_s4 + $0x28] sm:$0xff] %v558_v9  }
 0x15f   :  { %575 = vst [vmem:[%s844_s4 + $0x30] sm:$0xff] %v563_v10   ;;  %576 = vst [vmem:[%s844_s4 + $0x38] sm:$0xff] %v568_v48  }

// kernel: conv2d_ae_forward.7
= control target key start
LH: loop header
LB: loop body
LE: loop exit
PB: predicated region body
PF: predicated region fallthrough
CT: control target
= control target key end

     0   :  { %s829_s1 = inlined_call_operand.vmem [shape: bf16[512,128], index: 1, kind: input, shape index: {}]   ;;  %s830_s0 = inlined_call_operand.vmem [shape: bf16[32,512], index: 0, kind: input, shape index: {}]   ;;  %s831_s2 = inlined_call_operand.vmem [shape: f32[1,128], index: 2, kind: input, shape index: {}]   ;;  %s832_s3 = inlined_call_operand.vmem [shape: f32[1,128], index: 3, kind: input, shape index: {}]   ;;  %s833_s4 = inlined_call_operand.vmem [shape: bf16[32,128], index: 4, kind: output, shape index: {}]  }
   0x1   :  { %v626_v0 = vld [vmem:[%s829_s1 + $0x78] sm:$0xff]   ;;  %v630_v4 = vld [vmem:[%s829_s1 + $0x70] sm:$0xff]   ;;  %v634_v8 = vld [vmem:[%s829_s1 + $0x68] sm:$0xff]  }
   0x2   :  { %v627_v1 = vld [vmem:[%s829_s1 + $0xf8] sm:$0xff]   ;;  %570 = vmatprep.subr.bf16.mxu0 %v626_v0  ;;  %v631_v5 = vld [vmem:[%s829_s1 + $0xf0] sm:$0xff]   ;;  %v635_v9 = vld [vmem:[%s829_s1 + $0xe8] sm:$0xff]  }
   0x3   :  { %v628_v2 = vld [vmem:[%s829_s1 + $0x38] sm:$0xff]   ;;  %598 = vmatprep.subr.bf16.mxu1 %v627_v1  ;;  %v632_v6 = vld [vmem:[%s829_s1 + $0x30] sm:$0xff]   ;;  %v636_v10 = vld [vmem:[%s829_s1 + $0x28] sm:$0xff]  }
   0x4   :  { %v629_v3 = vld [vmem:[%s829_s1 + $0xb8] sm:$0xff]   ;;  %571 = vmatpush3.bf16.msra.mxu0 %v628_v2  ;;  %v633_v7 = vld [vmem:[%s829_s1 + $0xb0] sm:$0xff]   ;;  %v637_v11 = vld [vmem:[%s829_s1 + $0xa8] sm:$0xff]  }
   0x5   :  { %599 = vmatpush3.bf16.msra.mxu1 %v629_v3  ;;  %572 = vmatprep.subr.bf16.mxu0 %v630_v4  ;;  %v638_v12 = vld [vmem:[%s829_s1 + $0x60] sm:$0xff]   ;;  %v642_v16 = vld [vmem:[%s829_s1 + $0x58] sm:$0xff]   ;;  %v646_v20 = vld [vmem:[%s829_s1 + $0x50] sm:$0xff]  }
   0x6   :  { %600 = vmatprep.subr.bf16.mxu1 %v631_v5  ;;  %v639_v13 = vld [vmem:[%s829_s1 + $0xe0] sm:$0xff]   ;;  %v643_v17 = vld [vmem:[%s829_s1 + $0xd8] sm:$0xff]   ;;  %v647_v21 = vld [vmem:[%s829_s1 + $0xd0] sm:$0xff]  }
   0x7   :  { %v640_v14 = vld [vmem:[%s829_s1 + $0x20] sm:$0xff]   ;;  %v644_v18 = vld [vmem:[%s829_s1 + $0x18] sm:$0xff]   ;;  %v648_v22 = vld [vmem:[%s829_s1 + $0x10] sm:$0xff]  }
   0x8   :  { %573 = vmatpush3.bf16.msra.mxu0 %v632_v6  ;;  %v641_v15 = vld [vmem:[%s829_s1 + $0xa0] sm:$0xff]   ;;  %v645_v19 = vld [vmem:[%s829_s1 + $0x98] sm:$0xff]   ;;  %v649_v23 = vld [vmem:[%s829_s1 + $0x90] sm:$0xff]  }
   0x9   :  { %601 = vmatpush3.bf16.msra.mxu1 %v633_v7  ;;  %574 = vmatprep.subr.bf16.mxu0 %v634_v8  ;;  %v650_v24 = vld [vmem:[%s829_s1 + $0x48] sm:$0xff]   ;;  %v654_v28 = vld [vmem:[%s829_s1 + $0x40] sm:$0xff]  }
   0xa   :  { %602 = vmatprep.subr.bf16.mxu1 %v635_v9  ;;  %v651_v25 = vld [vmem:[%s829_s1 + $0xc8] sm:$0xff]   ;;  %v655_v29 = vld [vmem:[%s829_s1 + $0xc0] sm:$0xff]  }
   0xb   :  { %v652_v26 = vld [vmem:[%s829_s1 + $0x8] sm:$0xff]   ;;  %v656_v30 = vld [vmem:[%s829_s1] sm:$0xff]  }
   0xc   :  { %575 = vmatpush3.bf16.msra.mxu0 %v636_v10  ;;  %v653_v27 = vld [vmem:[%s829_s1 + $0x88] sm:$0xff]   ;;  %v657_v31 = vld [vmem:[%s829_s1 + $0x80] sm:$0xff]  }
   0xd   :  { %603 = vmatpush3.bf16.msra.mxu1 %v637_v11  ;;  %576 = vmatprep.subr.bf16.mxu0 %v638_v12  ;;  %v658_v32 = vld [vmem:[%s830_s0] ss:$16 sps:$4 sm:$0xff]   ;;  %v660_v33 = vld [vmem:[%s830_s0 + $0x4] ss:$16 sps:$4 sm:$0xff]   ;;  %v661_v34 = vld [vmem:[%s830_s0 + $0x8] ss:$16 sps:$4 sm:$0xff]  }
   0xe   :  { %604 = vmatprep.subr.bf16.mxu1 %v639_v13  ;;  %v663_v35 = vld [vmem:[%s830_s0 + $0xc] ss:$16 sps:$4 sm:$0xff]   ;;  %354 = vmatprep.mubr.bf16.mxu0 %v660_v33  ;;  %v664_v36 = vld [vmem:[%s830_s0 + $0x24] ss:$16 sps:$4 sm:$0xff]   ;;  %v668_v38 = vld [vmem:[%s830_s0 + $0x20] ss:$16 sps:$4 sm:$0xff]   ;;  %v456_v33 = vlaneseq }
   0xf   :  { %403 = vmatprep.mubr.bf16.mxu1 %v663_v35  ;;  %v666_v37 = vld [vmem:[%s830_s0 + $0x2c] ss:$16 sps:$4 sm:$0xff]   ;;  %v669_v39 = vld [vmem:[%s830_s0 + $0x28] ss:$16 sps:$4 sm:$0xff]   ;;  %v450_v35 = vld [vmem:[%s831_s2] sm:$0x1] }
  0x10   :  { %577 = vmatpush3.bf16.msra.mxu0 %v640_v14 }
  0x11   :  { %605 = vmatpush3.bf16.msra.mxu1 %v641_v15  ;;  %578 = vmatprep.subr.bf16.mxu0 %v642_v16 }
  0x12   :  { %606 = vmatprep.subr.bf16.mxu1 %v643_v17 }
  0x14   :  { %579 = vmatpush3.bf16.msra.mxu0 %v644_v18 }
  0x15   :  { %607 = vmatpush3.bf16.msra.mxu1 %v645_v19  ;;  %580 = vmatprep.subr.bf16.mxu0 %v646_v20 }
  0x16   :  { %608 = vmatprep.subr.bf16.mxu1 %v647_v21 }
  0x18   :  { %581 = vmatpush3.bf16.msra.mxu0 %v648_v22 }
  0x19   :  { %609 = vmatpush3.bf16.msra.mxu1 %v649_v23  ;;  %582 = vmatprep.subr.bf16.mxu0 %v650_v24 }
  0x1a   :  { %610 = vmatprep.subr.bf16.mxu1 %v651_v25 }
  0x1c   :  { %583 = vmatpush3.bf16.msra.mxu0 %v652_v26 }
  0x1d   :  { %611 = vmatpush3.bf16.msra.mxu1 %v653_v27  ;;  %584 = vmatprep.subr.bf16.mxu0 %v654_v28 }
  0x1e   :  { %612 = vmatprep.subr.bf16.mxu1 %v655_v29 }
  0x20   :  { %585 = vmatpush3.bf16.msra.mxu0 %v656_v30 }
  0x21   :  { %613 = vmatpush3.bf16.msra.mxu1 %v657_v31 }
  0x23   :  { %355 = vmatmul.mubr.bf16.vlgmr.msra.gmra.mxu0 %v658_v32 }
  0x24   :  { %404 = vmatmul.mubr.bf16.vlgmr.msra.gmra.mxu1 %v661_v34  ;;  %362 = vmatprep.mubr.bf16.mxu0 %v664_v36  ;;  %v457_v34 = vshrl.u32 %v456_v33, 7 }
  0x25   :  { %411 = vmatprep.mubr.bf16.mxu1 %v666_v37 }
  0x26   :  { %v458_v36 = vsub.s32 0, %v457_v34 }
  0x2b   :  { %363 = vmatmul.mubr.bf16.gmra.mxu0 %v668_v38 }
  0x2c   :  { %412 = vmatmul.mubr.bf16.gmra.mxu1 %v669_v39  ;;  %v452_v39 = vld [vmem:[%s832_s3] sm:$0x1] }
  0xe3   :  { %v586_v40 = vpop.f32.mrf.mxu0 }
  0xe4   :  { %v614_v41 = vpop.f32.mrf.mxu1 }
  0xe5   :  { %v587_v42 = vpop.f32.mrf.mxu0 }
  0xe6   :  { %v615_v43 = vpop.f32.mrf.mxu1  ;;  %v588_v52 = vadd.f32 %v587_v42, %v586_v40 }
  0xe7   :  { %v589_v44 = vpop.f32.mrf.mxu0  ;;  %v616_v53 = vadd.f32 %v615_v43, %v614_v41 }
  0xe8   :  { %v617_v45 = vpop.f32.mrf.mxu1 }
  0xe9   :  { %v590_v46 = vpop.f32.mrf.mxu0  ;;  %v406_v61 = vadd.f32 %v616_v53, %v588_v52 }
  0xea   :  { %v618_v47 = vpop.f32.mrf.mxu1  ;;  %v591_v48 = vadd.f32 %v590_v46, %v589_v44 }
  0xeb   :  { %v619_v49 = vadd.f32 %v618_v47, %v617_v45  ;;  %v592_v50 = vpop.f32.mrf.mxu0 }
  0xec   :  { %v620_v51 = vpop.f32.mrf.mxu1 }
  0xed   :  { %v593_v54 = vpop.f32.mrf.mxu0  ;;  %v409_v57 = vadd.f32 %v619_v49, %v591_v48 }
  0xee   :  { %v594_v55 = vadd.f32 %v593_v54, %v592_v50  ;;  %v621_v56 = vpop.f32.mrf.mxu1 }
  0xef   :  { %v622_v58 = vadd.f32 %v621_v56, %v620_v51  ;;  %v595_v59 = vpop.f32.mrf.mxu0  ;;  %v420_v2 = vadd.f32 %v409_v57, %v406_v61 }
  0xf0   :  { %v623_v60 = vpop.f32.mrf.mxu1 }
  0xf1   :  { %v414_v62 = vadd.f32 %v622_v58, %v594_v55  ;;  %v596_v63 = vpop.f32.mrf.mxu0 }
  0xf2   :  { %v597_v0 = vadd.f32 %v596_v63, %v595_v59  ;;  %v624_v1 = vpop.f32.mrf.mxu1 }
  0xf3   :  { %v625_v3 = vadd.f32 %v624_v1, %v623_v60  ;;  %v421_v4 = vadd.f32 %v420_v2, %v414_v62 }
  0xf5   :  { %v417_v5 = vadd.f32 %v625_v3, %v597_v0 }
  0xf7   :  { %v422_v6 = vadd.f32 %v421_v4, %v417_v5 }
  0xf9   :  { %v423_v7 = vrot.slane %v422_v6, 4 }
  0xfb   :  { %v424_v8 = vadd.f32 %v423_v7, %v422_v6 }
  0xfd   :  { %v425_v9 = vrot.slane %v424_v8, 2 }
  0xff   :  { %v426_v10 = vadd.f32 %v425_v9, %v424_v8 }
 0x101   :  { %v427_v11 = vrot.slane %v426_v10, 1 }
 0x103   :  { %v428_v12 = vadd.f32 %v427_v11, %v426_v10 }
 0x105   :  { %v429_v13 = vmul.f32 0.03125, %v428_v12 }
 0x107   :  { %v430_v14 = vsub.f32 %v406_v61, %v429_v13  ;;  %v431_v15 = vsub.f32 %v409_v57, %v429_v13  ;;  %v432_v16 = vsub.f32 %v414_v62, %v429_v13  ;;  %v433_v17 = vsub.f32 %v417_v5, %v429_v13 }
 0x109   :  { %v434_v18 = vmul.f32 %v430_v14, %v430_v14  ;;  %v435_v19 = vmul.f32 %v431_v15, %v431_v15  ;;  %v436_v20 = vmul.f32 %v432_v16, %v432_v16  ;;  %v437_v22 = vmul.f32 %v433_v17, %v433_v17 }
 0x10b   :  { %v438_v21 = vadd.f32 %v435_v19, %v434_v18 }
 0x10d   :  { %v439_v23 = vadd.f32 %v438_v21, %v436_v20 }
 0x10f   :  { %v440_v24 = vadd.f32 %v439_v23, %v437_v22 }
 0x111   :  { %v441_v25 = vrot.slane %v440_v24, 4 }
 0x113   :  { %v442_v26 = vadd.f32 %v441_v25, %v440_v24 }
 0x115   :  { %v443_v27 = vrot.slane %v442_v26, 2 }
 0x117   :  { %v444_v28 = vadd.f32 %v443_v27, %v442_v26 }
 0x119   :  { %v445_v29 = vrot.slane %v444_v28, 1 }
 0x11b   :  { %v446_v30 = vadd.f32 %v445_v29, %v444_v28 }
 0x11d   :  { %v447_v31 = vmul.f32 0.03125, %v446_v30 }
 0x11f   :  { %v448_v32 = vadd.f32 1e-05, %v447_v31 }
 0x121   :  { %670 = vrsqrt.f32 %v448_v32 }
 0x12e   :  { %v671_v37 = vpop.eup %670 }
 0x12f   :  { %v451_v38 = vmul.f32 %v671_v37, %v450_v35 }
 0x131   :  { %v453_v40 = vmul.f32 %v451_v38, %v429_v13  ;;  %v459_v41 = vrot.slane %v451_v38, %v458_v36 }
 0x133   :  { %v454_v42 = vsub.f32 %v452_v39, %v453_v40  ;;  %v461_v43 = vmul.f32 %v459_v41, %v406_v61  ;;  %v462_v44 = vmul.f32 %v459_v41, %v409_v57  ;;  %v463_v45 = vmul.f32 %v459_v41, %v414_v62 }
 0x134   :  { %v464_v46 = vmul.f32 %v459_v41, %v417_v5 }
 0x135   :  { %v469_v47 = vrot.slane %v454_v42, %v458_v36 }
 0x137   :  { %v471_v48 = vadd.f32 %v469_v47, %v461_v43  ;;  %v472_v49 = vadd.f32 %v469_v47, %v462_v44  ;;  %v473_v50 = vadd.f32 %v469_v47, %v463_v45  ;;  %v474_v51 = vadd.f32 %v469_v47, %v464_v46 }
 0x139   :  { %vm475_vm0 = vcmp.gt.f32.partialorder %v471_v48, 0.0  ;;  %vm476_vm1 = vcmp.gt.f32.partialorder %v472_v49, 0.0  ;;  %vm477_vm2 = vcmp.gt.f32.partialorder %v473_v50, 0.0  ;;  %vm478_vm3 = vcmp.gt.f32.partialorder %v474_v51, 0.0 }
 0x13a   :  { %v479_v52 = vmul.f32 0.01, %v471_v48  ;;  %v480_v53 = vmul.f32 0.01, %v472_v49  ;;  %v481_v54 = vmul.f32 0.01, %v473_v50 }
 0x13b   :  { %v482_v55 = vmul.f32 0.01, %v474_v51 }
 0x13c   :  { %v483_v56 = vsel %vm475_vm0, %v471_v48, %v479_v52  ;;  %v484_v58 = vsel %vm476_vm1, %v472_v49, %v480_v53  ;;  %v485_v59 = vsel %vm477_vm2, %v473_v50, %v481_v54 }
 0x13d   :  { %v486_v60 = vsel %vm478_vm3, %v474_v51, %v482_v55  ;;  %v562_v57 = vpack.c.bf16 %v484_v58, %v483_v56 }
 0x13e   :  { %v567_v61 = vpack.c.bf16 %v486_v60, %v485_v59 }
 0x13f   :  { %563 = vst [vmem:[%s833_s4] sm:$0xff] %v562_v57  }
 0x140   :  { %569 = vst [vmem:[%s833_s4 + $0x8] sm:$0xff] %v567_v61  }

// kernel: conv2d_ae_forward.8
= control target key start
LH: loop header
LB: loop body
LE: loop exit
PB: predicated region body
PF: predicated region fallthrough
CT: control target
= control target key end

     0   :  { %s1297_s1 = inlined_call_operand.vmem [shape: bf16[1024,128], index: 1, kind: input, shape index: {}]   ;;  %s1298_s0 = inlined_call_operand.vmem [shape: bf16[16,1024], index: 0, kind: input, shape index: {}]   ;;  %s1299_s2 = inlined_call_operand.vmem [shape: f32[1,128], index: 2, kind: input, shape index: {}]   ;;  %s1300_s3 = inlined_call_operand.vmem [shape: f32[1,128], index: 3, kind: input, shape index: {}]   ;;  %s1301_s4 = inlined_call_operand.vmem [shape: bf16[16,128], index: 4, kind: output, shape index: {}]  }
   0x1   :  { %v981_v0 = vld [vmem:[%s1297_s1 + $0x78] sm:$0xff]   ;;  %v985_v4 = vld [vmem:[%s1297_s1 + $0x70] sm:$0xff]   ;;  %v989_v8 = vld [vmem:[%s1297_s1 + $0x68] sm:$0xff]  }
   0x2   :  { %v982_v1 = vld [vmem:[%s1297_s1 + $0xf8] sm:$0xff]   ;;  %893 = vmatprep.subr.bf16.mxu0 %v981_v0  ;;  %v986_v5 = vld [vmem:[%s1297_s1 + $0xf0] sm:$0xff]   ;;  %v990_v9 = vld [vmem:[%s1297_s1 + $0xe8] sm:$0xff]  }
   0x3   :  { %v983_v2 = vld [vmem:[%s1297_s1 + $0x38] sm:$0xff]   ;;  %915 = vmatprep.subr.bf16.mxu1 %v982_v1  ;;  %v987_v6 = vld [vmem:[%s1297_s1 + $0x30] sm:$0xff]   ;;  %v991_v10 = vld [vmem:[%s1297_s1 + $0x28] sm:$0xff]  }
   0x4   :  { %v984_v3 = vld [vmem:[%s1297_s1 + $0xb8] sm:$0xff]   ;;  %894 = vmatpush3.bf16.msra.mxu0 %v983_v2  ;;  %v988_v7 = vld [vmem:[%s1297_s1 + $0xb0] sm:$0xff]   ;;  %v992_v11 = vld [vmem:[%s1297_s1 + $0xa8] sm:$0xff]  }
   0x5   :  { %916 = vmatpush3.bf16.msra.mxu1 %v984_v3  ;;  %895 = vmatprep.subr.bf16.mxu0 %v985_v4  ;;  %v993_v12 = vld [vmem:[%s1297_s1 + $0x60] sm:$0xff]   ;;  %v997_v16 = vld [vmem:[%s1297_s1 + $0x58] sm:$0xff]   ;;  %v1001_v20 = vld [vmem:[%s1297_s1 + $0x50] sm:$0xff]  }
   0x6   :  { %917 = vmatprep.subr.bf16.mxu1 %v986_v5  ;;  %v994_v13 = vld [vmem:[%s1297_s1 + $0xe0] sm:$0xff]   ;;  %v998_v17 = vld [vmem:[%s1297_s1 + $0xd8] sm:$0xff]   ;;  %v1002_v21 = vld [vmem:[%s1297_s1 + $0xd0] sm:$0xff]  }
   0x7   :  { %v995_v14 = vld [vmem:[%s1297_s1 + $0x20] sm:$0xff]   ;;  %v999_v18 = vld [vmem:[%s1297_s1 + $0x18] sm:$0xff]   ;;  %v1003_v22 = vld [vmem:[%s1297_s1 + $0x10] sm:$0xff]  }
   0x8   :  { %896 = vmatpush3.bf16.msra.mxu0 %v987_v6  ;;  %v996_v15 = vld [vmem:[%s1297_s1 + $0xa0] sm:$0xff]   ;;  %v1000_v19 = vld [vmem:[%s1297_s1 + $0x98] sm:$0xff]   ;;  %v1004_v23 = vld [vmem:[%s1297_s1 + $0x90] sm:$0xff]  }
   0x9   :  { %918 = vmatpush3.bf16.msra.mxu1 %v988_v7  ;;  %897 = vmatprep.subr.bf16.mxu0 %v989_v8  ;;  %v1005_v24 = vld [vmem:[%s1297_s1 + $0x48] sm:$0xff]   ;;  %v1009_v28 = vld [vmem:[%s1297_s1 + $0x40] sm:$0xff]   ;;  %v1013_v40 = vld [vmem:[%s1297_s1 + $0x178] sm:$0xff]  }
   0xa   :  { %919 = vmatprep.subr.bf16.mxu1 %v990_v9  ;;  %v1006_v25 = vld [vmem:[%s1297_s1 + $0xc8] sm:$0xff]   ;;  %v1010_v29 = vld [vmem:[%s1297_s1 + $0xc0] sm:$0xff]   ;;  %v1014_v41 = vld [vmem:[%s1297_s1 + $0x1f8] sm:$0xff]  }
   0xb   :  { %v1007_v26 = vld [vmem:[%s1297_s1 + $0x8] sm:$0xff]   ;;  %v1011_v30 = vld [vmem:[%s1297_s1] sm:$0xff]   ;;  %v1015_v42 = vld [vmem:[%s1297_s1 + $0x138] sm:$0xff]  }
   0xc   :  { %898 = vmatpush3.bf16.msra.mxu0 %v991_v10  ;;  %v1008_v27 = vld [vmem:[%s1297_s1 + $0x88] sm:$0xff]   ;;  %v1012_v31 = vld [vmem:[%s1297_s1 + $0x80] sm:$0xff]   ;;  %v1016_v43 = vld [vmem:[%s1297_s1 + $0x1b8] sm:$0xff]  }
   0xd   :  { %920 = vmatpush3.bf16.msra.mxu1 %v992_v11  ;;  %899 = vmatprep.subr.bf16.mxu0 %v993_v12  ;;  %v18_v32 = vld [vmem:[%s1298_s0] sm:$0xff]  ;;  %v19_v34 = vld [vmem:[%s1298_s0 + $0x8] sm:$0xff]  ;;  %v1017_v44 = vld [vmem:[%s1297_s1 + $0x170] sm:$0xff]  }
   0xe   :  { %921 = vmatprep.subr.bf16.mxu1 %v994_v13  ;;  %v22_v33 = vld [vmem:[%s1298_s0 + $0x20] sm:$0xff]  ;;  %v23_v37 = vld [vmem:[%s1298_s0 + $0x28] sm:$0xff]  ;;  %v1018_v45 = vld [vmem:[%s1297_s1 + $0x1f0] sm:$0xff]  }
   0xf   :  { %v812_v35 = vcombine.low %v18_v32, %v22_v33  ;;  %v813_v36 = vcombine.high %v18_v32, %v22_v33  ;;  %v814_v38 = vcombine.low %v19_v34, %v23_v37  ;;  %v815_v39 = vcombine.high %v19_v34, %v23_v37  ;;  %v1019_v46 = vld [vmem:[%s1297_s1 + $0x130] sm:$0xff]   ;;  %v1021_v48 = vld [vmem:[%s1297_s1 + $0x168] sm:$0xff]   ;;  %v1025_v52 = vld [vmem:[%s1297_s1 + $0x160] sm:$0xff]  }
  0x10   :  { %900 = vmatpush3.bf16.msra.mxu0 %v995_v14  ;;  %v1020_v47 = vld [vmem:[%s1297_s1 + $0x1b0] sm:$0xff]   ;;  %v1022_v49 = vld [vmem:[%s1297_s1 + $0x1e8] sm:$0xff]   ;;  %v1026_v53 = vld [vmem:[%s1297_s1 + $0x1e0] sm:$0xff]  }
  0x11   :  { %922 = vmatpush3.bf16.msra.mxu1 %v996_v15  ;;  %901 = vmatprep.subr.bf16.mxu0 %v997_v16  ;;  %v1023_v50 = vld [vmem:[%s1297_s1 + $0x128] sm:$0xff]   ;;  %v1027_v54 = vld [vmem:[%s1297_s1 + $0x120] sm:$0xff]   ;;  %v1029_v56 = vld [vmem:[%s1297_s1 + $0x158] sm:$0xff]  }
  0x12   :  { %923 = vmatprep.subr.bf16.mxu1 %v998_v17  ;;  %610 = vmatprep.mubr.bf16.mxu0 %v813_v36  ;;  %v1024_v51 = vld [vmem:[%s1297_s1 + $0x1a8] sm:$0xff]   ;;  %v1028_v55 = vld [vmem:[%s1297_s1 + $0x1a0] sm:$0xff]   ;;  %v1030_v57 = vld [vmem:[%s1297_s1 + $0x1d8] sm:$0xff]  }
  0x13   :  { %651 = vmatprep.mubr.bf16.mxu1 %v815_v39  ;;  %v1031_v58 = vld [vmem:[%s1297_s1 + $0x118] sm:$0xff]   ;;  %v1033_v60 = vld [vmem:[%s1297_s1 + $0x150] sm:$0xff]   ;;  %v1037_v0 = vld [vmem:[%s1297_s1 + $0x148] sm:$0xff]  }
  0x14   :  { %902 = vmatpush3.bf16.msra.mxu0 %v999_v18  ;;  %v1032_v59 = vld [vmem:[%s1297_s1 + $0x198] sm:$0xff]   ;;  %v1034_v61 = vld [vmem:[%s1297_s1 + $0x1d0] sm:$0xff]   ;;  %v1038_v1 = vld [vmem:[%s1297_s1 + $0x1c8] sm:$0xff]  }
  0x15   :  { %924 = vmatpush3.bf16.msra.mxu1 %v1000_v19  ;;  %903 = vmatprep.subr.bf16.mxu0 %v1001_v20  ;;  %v1035_v62 = vld [vmem:[%s1297_s1 + $0x110] sm:$0xff]   ;;  %v1039_v2 = vld [vmem:[%s1297_s1 + $0x108] sm:$0xff]   ;;  %v1041_v4 = vld [vmem:[%s1297_s1 + $0x140] sm:$0xff]  }
  0x16   :  { %925 = vmatprep.subr.bf16.mxu1 %v1002_v21  ;;  %v1036_v63 = vld [vmem:[%s1297_s1 + $0x190] sm:$0xff]   ;;  %v1040_v3 = vld [vmem:[%s1297_s1 + $0x188] sm:$0xff]   ;;  %v1042_v5 = vld [vmem:[%s1297_s1 + $0x1c0] sm:$0xff]  }
  0x17   :  { %v1043_v6 = vld [vmem:[%s1297_s1 + $0x100] sm:$0xff]   ;;  %v20_v8 = vld [vmem:[%s1298_s0 + $0x10] sm:$0xff]  ;;  %v21_v12 = vld [vmem:[%s1298_s0 + $0x18] sm:$0xff] }
  0x18   :  { %904 = vmatpush3.bf16.msra.mxu0 %v1003_v22  ;;  %v1044_v7 = vld [vmem:[%s1297_s1 + $0x180] sm:$0xff]   ;;  %v24_v9 = vld [vmem:[%s1298_s0 + $0x30] sm:$0xff]  ;;  %v25_v13 = vld [vmem:[%s1298_s0 + $0x38] sm:$0xff] }
  0x19   :  { %926 = vmatpush3.bf16.msra.mxu1 %v1004_v23  ;;  %905 = vmatprep.subr.bf16.mxu0 %v1005_v24  ;;  %v816_v10 = vcombine.low %v20_v8, %v24_v9  ;;  %v817_v11 = vcombine.high %v20_v8, %v24_v9  ;;  %v818_v14 = vcombine.low %v21_v12, %v25_v13 }
  0x1a   :  { %927 = vmatprep.subr.bf16.mxu1 %v1006_v25  ;;  %v819_v15 = vcombine.high %v21_v12, %v25_v13 }
  0x1c   :  { %906 = vmatpush3.bf16.msra.mxu0 %v1007_v26 }
  0x1d   :  { %928 = vmatpush3.bf16.msra.mxu1 %v1008_v27  ;;  %907 = vmatprep.subr.bf16.mxu0 %v1009_v28 }
  0x1e   :  { %929 = vmatprep.subr.bf16.mxu1 %v1010_v29 }
  0x20   :  { %908 = vmatpush3.bf16.msra.mxu0 %v1011_v30 }
  0x21   :  { %930 = vmatpush3.bf16.msra.mxu1 %v1012_v31  ;;  %937 = vmatprep.subr.bf16.mxu0 %v1013_v40 }
  0x22   :  { %959 = vmatprep.subr.bf16.mxu1 %v1014_v41 }
  0x23   :  { %611 = vmatmul.mubr.bf16.vlgmr.msra.gmra.mxu0 %v812_v35 }
  0x24   :  { %652 = vmatmul.mubr.bf16.vlgmr.msra.gmra.mxu1 %v814_v38  ;;  %938 = vmatpush3.bf16.msra.mxu0 %v1015_v42 }
  0x25   :  { %960 = vmatpush3.bf16.msra.mxu1 %v1016_v43  ;;  %939 = vmatprep.subr.bf16.mxu0 %v1017_v44 }
  0x26   :  { %961 = vmatprep.subr.bf16.mxu1 %v1018_v45  ;;  %692 = vmatprep.mubr.bf16.mxu0 %v817_v11 }
  0x27   :  { %733 = vmatprep.mubr.bf16.mxu1 %v819_v15 }
  0x28   :  { %940 = vmatpush3.bf16.msra.mxu0 %v1019_v46 }
  0x29   :  { %962 = vmatpush3.bf16.msra.mxu1 %v1020_v47  ;;  %941 = vmatprep.subr.bf16.mxu0 %v1021_v48 }
  0x2a   :  { %963 = vmatprep.subr.bf16.mxu1 %v1022_v49 }
  0x2c   :  { %942 = vmatpush3.bf16.msra.mxu0 %v1023_v50 }
  0x2d   :  { %964 = vmatpush3.bf16.msra.mxu1 %v1024_v51  ;;  %943 = vmatprep.subr.bf16.mxu0 %v1025_v52 }
  0x2e   :  { %965 = vmatprep.subr.bf16.mxu1 %v1026_v53 }
  0x30   :  { %944 = vmatpush3.bf16.msra.mxu0 %v1027_v54 }
  0x31   :  { %966 = vmatpush3.bf16.msra.mxu1 %v1028_v55  ;;  %945 = vmatprep.subr.bf16.mxu0 %v1029_v56 }
  0x32   :  { %967 = vmatprep.subr.bf16.mxu1 %v1030_v57 }
  0x34   :  { %946 = vmatpush3.bf16.msra.mxu0 %v1031_v58 }
  0x35   :  { %968 = vmatpush3.bf16.msra.mxu1 %v1032_v59  ;;  %947 = vmatprep.subr.bf16.mxu0 %v1033_v60 }
  0x36   :  { %969 = vmatprep.subr.bf16.mxu1 %v1034_v61 }
  0x38   :  { %948 = vmatpush3.bf16.msra.mxu0 %v1035_v62 }
  0x39   :  { %970 = vmatpush3.bf16.msra.mxu1 %v1036_v63  ;;  %949 = vmatprep.subr.bf16.mxu0 %v1037_v0  ;;  %v777_v0 = vlaneseq }
  0x3a   :  { %971 = vmatprep.subr.bf16.mxu1 %v1038_v1 }
  0x3b   :  { %v778_v1 = vshrl.u32 %v777_v0, 7 }
  0x3c   :  { %950 = vmatpush3.bf16.msra.mxu0 %v1039_v2  ;;  %v771_v2 = vld [vmem:[%s1299_s2] sm:$0x1] }
  0x3d   :  { %972 = vmatpush3.bf16.msra.mxu1 %v1040_v3  ;;  %951 = vmatprep.subr.bf16.mxu0 %v1041_v4  ;;  %v779_v3 = vsub.s32 0, %v778_v1 }
  0x3e   :  { %973 = vmatprep.subr.bf16.mxu1 %v1042_v5 }
  0x40   :  { %952 = vmatpush3.bf16.msra.mxu0 %v1043_v6  ;;  %v773_v6 = vld [vmem:[%s1300_s3] sm:$0x1] }
  0x41   :  { %974 = vmatpush3.bf16.msra.mxu1 %v1044_v7 }
  0x43   :  { %693 = vmatmul.mubr.bf16.vlgmr.msra.gmra.mxu0 %v816_v10 }
  0x44   :  { %734 = vmatmul.mubr.bf16.vlgmr.msra.gmra.mxu1 %v818_v14 }
  0xe3   :  { %v909_v16 = vpop.f32.mrf.mxu0 }
  0xe4   :  { %v931_v17 = vpop.f32.mrf.mxu1 }
  0xe5   :  { %v910_v18 = vpop.f32.mrf.mxu0 }
  0xe6   :  { %v932_v19 = vpop.f32.mrf.mxu1  ;;  %v911_v25 = vadd.f32 %v910_v18, %v909_v16 }
  0xe7   :  { %v912_v20 = vpop.f32.mrf.mxu0  ;;  %v933_v26 = vadd.f32 %v932_v19, %v931_v17 }
  0xe8   :  { %v934_v21 = vpop.f32.mrf.mxu1 }
  0xe9   :  { %v913_v22 = vpop.f32.mrf.mxu0  ;;  %v654_v34 = vadd.f32 %v933_v26, %v911_v25 }
  0xea   :  { %v935_v23 = vpop.f32.mrf.mxu1  ;;  %v914_v29 = vadd.f32 %v913_v22, %v912_v20 }
  0xeb   :  { %v936_v30 = vadd.f32 %v935_v23, %v934_v21 }
  0xed   :  { %v657_v37 = vadd.f32 %v936_v30, %v914_v29 }
 0x103   :  { %v953_v24 = vpop.f32.mrf.mxu0 }
 0x104   :  { %v975_v27 = vpop.f32.mrf.mxu1 }
 0x105   :  { %v954_v28 = vpop.f32.mrf.mxu0 }
 0x106   :  { %v955_v31 = vadd.f32 %v954_v28, %v953_v24  ;;  %v976_v32 = vpop.f32.mrf.mxu1 }
 0x107   :  { %v956_v33 = vpop.f32.mrf.mxu0  ;;  %v977_v41 = vadd.f32 %v976_v32, %v975_v27 }
 0x108   :  { %v978_v35 = vpop.f32.mrf.mxu1  ;;  %v695_v38 = vadd.f32 %v955_v31, %v654_v34 }
 0x109   :  { %v957_v36 = vpop.f32.mrf.mxu0 }
 0x10a   :  { %v958_v39 = vadd.f32 %v957_v36, %v956_v33  ;;  %v979_v40 = vpop.f32.mrf.mxu1  ;;  %v736_v44 = vadd.f32 %v977_v41, %v695_v38 }
 0x10b   :  { %v980_v43 = vadd.f32 %v979_v40, %v978_v35 }
 0x10c   :  { %v698_v42 = vadd.f32 %v958_v39, %v657_v37 }
 0x10e   :  { %v739_v45 = vadd.f32 %v980_v43, %v698_v42 }
 0x110   :  { %v742_v46 = vadd.f32 %v739_v45, %v736_v44 }
 0x112   :  { %v743_v47 = vrot.slane %v742_v46, 4 }
 0x114   :  { %v744_v48 = vadd.f32 %v743_v47, %v742_v46 }
 0x116   :  { %v745_v49 = vrot.slane %v744_v48, 2 }
 0x118   :  { %v746_v50 = vadd.f32 %v745_v49, %v744_v48 }
 0x11a   :  { %v747_v51 = vrot.slane %v746_v50, 1 }
 0x11c   :  { %v748_v52 = vadd.f32 %v747_v51, %v746_v50 }
 0x11e   :  { %v749_v53 = vmul.f32 0.125, %v748_v52 }
 0x120   :  { %v755_v54 = vsub.f32 %v736_v44, %v749_v53 }
 0x122   :  { %v759_v55 = vmul.f32 %v755_v54, %v755_v54 }
 0x124   :  { %v762_v56 = vrot.slane %v759_v55, 4 }
 0x126   :  { %v763_v57 = vadd.f32 %v762_v56, %v759_v55 }
 0x128   :  { %v764_v58 = vrot.slane %v763_v57, 2 }
 0x12a   :  { %v765_v59 = vadd.f32 %v764_v58, %v763_v57 }
 0x12c   :  { %v766_v60 = vrot.slane %v765_v59, 1 }
 0x12e   :  { %v767_v61 = vadd.f32 %v766_v60, %v765_v59 }
 0x130   :  { %v768_v62 = vmul.f32 0.125, %v767_v61 }
 0x132   :  { %v769_v63 = vadd.f32 1e-05, %v768_v62 }
 0x134   :  { %1045 = vrsqrt.f32 %v769_v63 }
 0x141   :  { %v1046_v4 = vpop.eup %1045 }
 0x142   :  { %v772_v5 = vmul.f32 %v1046_v4, %v771_v2 }
 0x144   :  { %v774_v7 = vmul.f32 %v772_v5, %v749_v53  ;;  %v780_v8 = vrot.slane %v772_v5, %v779_v3 }
 0x146   :  { %v775_v9 = vsub.f32 %v773_v6, %v774_v7  ;;  %v782_v10 = vmul.f32 %v780_v8, %v736_v44  ;;  %v783_v11 = vmul.f32 %v780_v8, %v739_v45 }
 0x148   :  { %v788_v12 = vrot.slane %v775_v9, %v779_v3 }
 0x14a   :  { %v790_v13 = vadd.f32 %v788_v12, %v782_v10  ;;  %v791_v14 = vadd.f32 %v788_v12, %v783_v11 }
 0x14c   :  { %vm792_vm0 = vcmp.gt.f32.partialorder %v790_v13, 0.0  ;;  %vm793_vm1 = vcmp.gt.f32.partialorder %v791_v14, 0.0  ;;  %v794_v15 = vmul.f32 0.01, %v790_v13  ;;  %v795_v16 = vmul.f32 0.01, %v791_v14 }
 0x14e   :  { %v796_v17 = vsel %vm792_vm0, %v790_v13, %v794_v15  ;;  %v797_v18 = vsel %vm793_vm1, %v791_v14, %v795_v16 }
 0x14f   :  { %v891_v19 = vpack.c.bf16 %v797_v18, %v796_v17 }
 0x151   :  { %892 = vst [vmem:[%s1301_s4] sm:$0xff] %v891_v19  }

// kernel: conv2d_ae_forward.9
= control target key start
LH: loop header
LB: loop body
LE: loop exit
PB: predicated region body
PF: predicated region fallthrough
CT: control target
= control target key end

     0   :  { %s1692_s1 = inlined_call_operand.vmem [shape: bf16[1152,128], index: 1, kind: input, shape index: {}]   ;;  %s1693_s0 = inlined_call_operand.vmem [shape: bf16[32,1152], index: 0, kind: input, shape index: {}]   ;;  %s1694_s2 = inlined_call_operand.vmem [shape: f32[1,128], index: 2, kind: input, shape index: {}]   ;;  %s1695_s3 = inlined_call_operand.vmem [shape: f32[1,128], index: 3, kind: input, shape index: {}]   ;;  %s1696_s4 = inlined_call_operand.vmem [shape: bf16[32,128], index: 4, kind: output, shape index: {}]  }
   0x1   :  { %v1285_v0 = vld [vmem:[%s1692_s1 + $0x78] sm:$0xff]   ;;  %v1289_v4 = vld [vmem:[%s1692_s1 + $0x70] sm:$0xff]   ;;  %v1293_v8 = vld [vmem:[%s1692_s1 + $0x68] sm:$0xff]  }
   0x2   :  { %v1286_v1 = vld [vmem:[%s1692_s1 + $0xf8] sm:$0xff]   ;;  %1143 = vmatprep.subr.bf16.mxu0 %v1285_v0  ;;  %v1290_v5 = vld [vmem:[%s1692_s1 + $0xf0] sm:$0xff]   ;;  %v1294_v9 = vld [vmem:[%s1692_s1 + $0xe8] sm:$0xff]  }
   0x3   :  { %v1287_v2 = vld [vmem:[%s1692_s1 + $0x38] sm:$0xff]   ;;  %1171 = vmatprep.subr.bf16.mxu1 %v1286_v1  ;;  %v1291_v6 = vld [vmem:[%s1692_s1 + $0x30] sm:$0xff]   ;;  %v1295_v10 = vld [vmem:[%s1692_s1 + $0x28] sm:$0xff]  }
   0x4   :  { %v1288_v3 = vld [vmem:[%s1692_s1 + $0xb8] sm:$0xff]   ;;  %1144 = vmatpush3.bf16.msra.mxu0 %v1287_v2  ;;  %v1292_v7 = vld [vmem:[%s1692_s1 + $0xb0] sm:$0xff]   ;;  %v1296_v11 = vld [vmem:[%s1692_s1 + $0xa8] sm:$0xff]  }
   0x5   :  { %1172 = vmatpush3.bf16.msra.mxu1 %v1288_v3  ;;  %1145 = vmatprep.subr.bf16.mxu0 %v1289_v4  ;;  %v1297_v12 = vld [vmem:[%s1692_s1 + $0x60] sm:$0xff]   ;;  %v1301_v16 = vld [vmem:[%s1692_s1 + $0x58] sm:$0xff]   ;;  %v1305_v20 = vld [vmem:[%s1692_s1 + $0x50] sm:$0xff]  }
   0x6   :  { %1173 = vmatprep.subr.bf16.mxu1 %v1290_v5  ;;  %v1298_v13 = vld [vmem:[%s1692_s1 + $0xe0] sm:$0xff]   ;;  %v1302_v17 = vld [vmem:[%s1692_s1 + $0xd8] sm:$0xff]   ;;  %v1306_v21 = vld [vmem:[%s1692_s1 + $0xd0] sm:$0xff]  }
   0x7   :  { %v1299_v14 = vld [vmem:[%s1692_s1 + $0x20] sm:$0xff]   ;;  %v1303_v18 = vld [vmem:[%s1692_s1 + $0x18] sm:$0xff]   ;;  %v1307_v22 = vld [vmem:[%s1692_s1 + $0x10] sm:$0xff]  }
   0x8   :  { %1146 = vmatpush3.bf16.msra.mxu0 %v1291_v6  ;;  %v1300_v15 = vld [vmem:[%s1692_s1 + $0xa0] sm:$0xff]   ;;  %v1304_v19 = vld [vmem:[%s1692_s1 + $0x98] sm:$0xff]   ;;  %v1308_v23 = vld [vmem:[%s1692_s1 + $0x90] sm:$0xff]  }
   0x9   :  { %1174 = vmatpush3.bf16.msra.mxu1 %v1292_v7  ;;  %1147 = vmatprep.subr.bf16.mxu0 %v1293_v8  ;;  %v1309_v24 = vld [vmem:[%s1692_s1 + $0x48] sm:$0xff]   ;;  %v1313_v28 = vld [vmem:[%s1692_s1 + $0x40] sm:$0xff]   ;;  %v1323_v36 = vld [vmem:[%s1692_s1 + $0x178] sm:$0xff]  }
   0xa   :  { %1175 = vmatprep.subr.bf16.mxu1 %v1294_v9  ;;  %v1310_v25 = vld [vmem:[%s1692_s1 + $0xc8] sm:$0xff]   ;;  %v1314_v29 = vld [vmem:[%s1692_s1 + $0xc0] sm:$0xff]   ;;  %v1324_v37 = vld [vmem:[%s1692_s1 + $0x138] sm:$0xff]  }
   0xb   :  { %v1311_v26 = vld [vmem:[%s1692_s1 + $0x8] sm:$0xff]   ;;  %v1315_v30 = vld [vmem:[%s1692_s1] sm:$0xff]   ;;  %v1325_v38 = vld [vmem:[%s1692_s1 + $0x1f8] sm:$0xff]  }
   0xc   :  { %1148 = vmatpush3.bf16.msra.mxu0 %v1295_v10  ;;  %v1312_v27 = vld [vmem:[%s1692_s1 + $0x88] sm:$0xff]   ;;  %v1316_v31 = vld [vmem:[%s1692_s1 + $0x80] sm:$0xff]   ;;  %v1326_v39 = vld [vmem:[%s1692_s1 + $0x1b8] sm:$0xff]  }
   0xd   :  { %1176 = vmatpush3.bf16.msra.mxu1 %v1296_v11  ;;  %1149 = vmatprep.subr.bf16.mxu0 %v1297_v12  ;;  %v1317_v32 = vld [vmem:[%s1693_s0] ss:$36 sps:$4 sm:$0xff]   ;;  %v1320_v34 = vld [vmem:[%s1693_s0 + $0x8] ss:$36 sps:$4 sm:$0xff]   ;;  %v1327_v40 = vld [vmem:[%s1692_s1 + $0x170] sm:$0xff]  }
   0xe   :  { %1177 = vmatprep.subr.bf16.mxu1 %v1298_v13  ;;  %v1319_v33 = vld [vmem:[%s1693_s0 + $0x4] ss:$36 sps:$4 sm:$0xff]   ;;  %v1322_v35 = vld [vmem:[%s1693_s0 + $0xc] ss:$36 sps:$4 sm:$0xff]   ;;  %v1339_v52 = vld [vmem:[%s1692_s1 + $0x158] sm:$0xff]  }
   0xf   :  { %738 = vmatprep.mubr.bf16.mxu0 %v1319_v33  ;;  %787 = vmatprep.mubr.bf16.mxu1 %v1322_v35  ;;  %v1328_v41 = vld [vmem:[%s1692_s1 + $0x130] sm:$0xff]   ;;  %v1331_v44 = vld [vmem:[%s1692_s1 + $0x168] sm:$0xff]   ;;  %v1335_v48 = vld [vmem:[%s1692_s1 + $0x160] sm:$0xff]  }
  0x10   :  { %1150 = vmatpush3.bf16.msra.mxu0 %v1299_v14  ;;  %v1329_v42 = vld [vmem:[%s1692_s1 + $0x1f0] sm:$0xff]   ;;  %v1332_v45 = vld [vmem:[%s1692_s1 + $0x128] sm:$0xff]   ;;  %v1336_v49 = vld [vmem:[%s1692_s1 + $0x120] sm:$0xff]  }
  0x11   :  { %1178 = vmatpush3.bf16.msra.mxu1 %v1300_v15  ;;  %1151 = vmatprep.subr.bf16.mxu0 %v1301_v16  ;;  %v1330_v43 = vld [vmem:[%s1692_s1 + $0x1b0] sm:$0xff]   ;;  %v1333_v46 = vld [vmem:[%s1692_s1 + $0x1e8] sm:$0xff]   ;;  %v1337_v50 = vld [vmem:[%s1692_s1 + $0x1e0] sm:$0xff]  }
  0x12   :  { %1179 = vmatprep.subr.bf16.mxu1 %v1302_v17  ;;  %v1334_v47 = vld [vmem:[%s1692_s1 + $0x1a8] sm:$0xff]   ;;  %v1338_v51 = vld [vmem:[%s1692_s1 + $0x1a0] sm:$0xff]   ;;  %v1340_v53 = vld [vmem:[%s1692_s1 + $0x118] sm:$0xff]  }
  0x13   :  { %v1341_v54 = vld [vmem:[%s1693_s0 + $0x4c] ss:$36 sps:$4 sm:$0xff]   ;;  %v1343_v55 = vld [vmem:[%s1693_s0 + $0x54] ss:$36 sps:$4 sm:$0xff]   ;;  %v1357_v4 = vld [vmem:[%s1692_s1 + $0x140] sm:$0xff]  }
  0x14   :  { %1152 = vmatpush3.bf16.msra.mxu0 %v1303_v18  ;;  %v1345_v56 = vld [vmem:[%s1692_s1 + $0x1d8] sm:$0xff]   ;;  %v1346_v57 = vld [vmem:[%s1693_s0 + $0x48] ss:$36 sps:$4 sm:$0xff]   ;;  %v1347_v58 = vld [vmem:[%s1693_s0 + $0x50] ss:$36 sps:$4 sm:$0xff]  }
  0x15   :  { %1180 = vmatpush3.bf16.msra.mxu1 %v1304_v19  ;;  %1153 = vmatprep.subr.bf16.mxu0 %v1305_v20  ;;  %v1348_v59 = vld [vmem:[%s1692_s1 + $0x198] sm:$0xff]   ;;  %v1349_v60 = vld [vmem:[%s1692_s1 + $0x150] sm:$0xff]   ;;  %v1353_v0 = vld [vmem:[%s1692_s1 + $0x148] sm:$0xff]  }
  0x16   :  { %1181 = vmatprep.subr.bf16.mxu1 %v1306_v21  ;;  %v1350_v61 = vld [vmem:[%s1692_s1 + $0x110] sm:$0xff]   ;;  %v1354_v1 = vld [vmem:[%s1692_s1 + $0x108] sm:$0xff]   ;;  %v1358_v5 = vld [vmem:[%s1692_s1 + $0x100] sm:$0xff]  }
  0x17   :  { %v1351_v62 = vld [vmem:[%s1692_s1 + $0x1d0] sm:$0xff]   ;;  %v1355_v2 = vld [vmem:[%s1692_s1 + $0x1c8] sm:$0xff]   ;;  %v1359_v6 = vld [vmem:[%s1692_s1 + $0x1c0] sm:$0xff]  }
  0x18   :  { %1154 = vmatpush3.bf16.msra.mxu0 %v1307_v22  ;;  %v1352_v63 = vld [vmem:[%s1692_s1 + $0x190] sm:$0xff]   ;;  %v1356_v3 = vld [vmem:[%s1692_s1 + $0x188] sm:$0xff]   ;;  %v1363_v9 = vld [vmem:[%s1692_s1 + $0x180] sm:$0xff]  }
  0x19   :  { %1182 = vmatpush3.bf16.msra.mxu1 %v1308_v23  ;;  %1155 = vmatprep.subr.bf16.mxu0 %v1309_v24  ;;  %v1360_v7 = vld [vmem:[%s1693_s0 + $0x10] ss:$36 sps:$4 sm:$0xff]   ;;  %v1364_v10 = vld [vmem:[%s1692_s1 + $0x238] sm:$0xff]   ;;  %v1372_v16 = vld [vmem:[%s1692_s1 + $0x228] sm:$0xff]  }
  0x1a   :  { %1183 = vmatprep.subr.bf16.mxu1 %v1310_v25  ;;  %v1362_v8 = vld [vmem:[%s1693_s0 + $0x14] ss:$36 sps:$4 sm:$0xff]   ;;  %v1367_v12 = vld [vmem:[%s1693_s0 + $0x1c] ss:$36 sps:$4 sm:$0xff]   ;;  %v1373_v17 = vld [vmem:[%s1693_s0 + $0x64] ss:$36 sps:$4 sm:$0xff]  }
  0x1b   :  { %v1365_v11 = vld [vmem:[%s1693_s0 + $0x18] ss:$36 sps:$4 sm:$0xff]   ;;  %v1368_v13 = vld [vmem:[%s1692_s1 + $0x230] sm:$0xff]   ;;  %v1375_v18 = vld [vmem:[%s1693_s0 + $0x60] ss:$36 sps:$4 sm:$0xff]  }
  0x1c   :  { %1156 = vmatpush3.bf16.msra.mxu0 %v1311_v26  ;;  %v1369_v14 = vld [vmem:[%s1693_s0 + $0x5c] ss:$36 sps:$4 sm:$0xff]   ;;  %v1378_v22 = vld [vmem:[%s1692_s1 + $0x210] sm:$0xff]   ;;  %v1379_v23 = vld [vmem:[%s1692_s1 + $0x208] sm:$0xff]  }
  0x1d   :  { %1184 = vmatpush3.bf16.msra.mxu1 %v1312_v27  ;;  %1157 = vmatprep.subr.bf16.mxu0 %v1313_v28  ;;  %v1371_v15 = vld [vmem:[%s1693_s0 + $0x58] ss:$36 sps:$4 sm:$0xff]   ;;  %v1376_v19 = vld [vmem:[%s1692_s1 + $0x220] sm:$0xff]   ;;  %v1382_v25 = vld [vmem:[%s1693_s0 + $0x68] ss:$36 sps:$4 sm:$0xff]  }
  0x1e   :  { %1185 = vmatprep.subr.bf16.mxu1 %v1314_v29  ;;  %v1377_v20 = vld [vmem:[%s1692_s1 + $0x218] sm:$0xff]   ;;  %v1381_v21 = vld [vmem:[%s1693_s0 + $0x20] ss:$36 sps:$4 sm:$0xff]  }
  0x1f   :  { %v1380_v24 = vld [vmem:[%s1692_s1 + $0x200] sm:$0xff]  }
  0x20   :  { %1158 = vmatpush3.bf16.msra.mxu0 %v1315_v30 }
  0x21   :  { %1186 = vmatpush3.bf16.msra.mxu1 %v1316_v31  ;;  %1199 = vmatprep.subr.bf16.mxu0 %v1323_v36 }
  0x22   :  { %1227 = vmatprep.subr.bf16.mxu1 %v1325_v38 }
  0x23   :  { %739 = vmatmul.mubr.bf16.vlgmr.msra.gmra.mxu0 %v1317_v32 }
  0x24   :  { %788 = vmatmul.mubr.bf16.vlgmr.msra.gmra.mxu1 %v1320_v34  ;;  %1200 = vmatpush3.bf16.msra.mxu0 %v1324_v37 }
  0x25   :  { %1228 = vmatpush3.bf16.msra.mxu1 %v1326_v39  ;;  %1201 = vmatprep.subr.bf16.mxu0 %v1327_v40 }
  0x26   :  { %1229 = vmatprep.subr.bf16.mxu1 %v1329_v42  ;;  %746 = vmatprep.mubr.bf16.mxu0 %v1341_v54 }
  0x27   :  { %795 = vmatprep.mubr.bf16.mxu1 %v1343_v55 }
  0x28   :  { %1202 = vmatpush3.bf16.msra.mxu0 %v1328_v41 }
  0x29   :  { %1230 = vmatpush3.bf16.msra.mxu1 %v1330_v43  ;;  %1203 = vmatprep.subr.bf16.mxu0 %v1331_v44 }
  0x2a   :  { %1231 = vmatprep.subr.bf16.mxu1 %v1333_v46 }
  0x2b   :  { %747 = vmatmul.mubr.bf16.gmra.mxu0 %v1346_v57 }
  0x2c   :  { %1204 = vmatpush3.bf16.msra.mxu0 %v1332_v45  ;;  %796 = vmatmul.mubr.bf16.gmra.mxu1 %v1347_v58 }
  0x2d   :  { %1232 = vmatpush3.bf16.msra.mxu1 %v1334_v47  ;;  %1205 = vmatprep.subr.bf16.mxu0 %v1335_v48 }
  0x2e   :  { %1233 = vmatprep.subr.bf16.mxu1 %v1337_v50  ;;  %836 = vmatprep.mubr.bf16.mxu0 %v1362_v8 }
  0x2f   :  { %885 = vmatprep.mubr.bf16.mxu1 %v1367_v12 }
  0x30   :  { %1206 = vmatpush3.bf16.msra.mxu0 %v1336_v49 }
  0x31   :  { %1234 = vmatpush3.bf16.msra.mxu1 %v1338_v51  ;;  %1207 = vmatprep.subr.bf16.mxu0 %v1339_v52 }
  0x32   :  { %1235 = vmatprep.subr.bf16.mxu1 %v1345_v56 }
  0x34   :  { %1208 = vmatpush3.bf16.msra.mxu0 %v1340_v53 }
  0x35   :  { %1236 = vmatpush3.bf16.msra.mxu1 %v1348_v59  ;;  %1209 = vmatprep.subr.bf16.mxu0 %v1349_v60 }
  0x36   :  { %1237 = vmatprep.subr.bf16.mxu1 %v1351_v62 }
  0x38   :  { %1210 = vmatpush3.bf16.msra.mxu0 %v1350_v61 }
  0x39   :  { %1238 = vmatpush3.bf16.msra.mxu1 %v1352_v63  ;;  %1211 = vmatprep.subr.bf16.mxu0 %v1353_v0 }
  0x3a   :  { %1239 = vmatprep.subr.bf16.mxu1 %v1355_v2 }
  0x3c   :  { %1212 = vmatpush3.bf16.msra.mxu0 %v1354_v1 }
  0x3d   :  { %1240 = vmatpush3.bf16.msra.mxu1 %v1356_v3  ;;  %1213 = vmatprep.subr.bf16.mxu0 %v1357_v4 }
  0x3e   :  { %1241 = vmatprep.subr.bf16.mxu1 %v1359_v6 }
  0x40   :  { %1214 = vmatpush3.bf16.msra.mxu0 %v1358_v5 }
  0x41   :  { %1242 = vmatpush3.bf16.msra.mxu1 %v1363_v9  ;;  %1265 = vmatprep.subr.bf16.mxu0 %v1364_v10 }
  0x43   :  { %837 = vmatmul.mubr.bf16.vlgmr.msra.gmra.mxu0 %v1360_v7 }
  0x44   :  { %1266 = vmatpush3.bf16.msra.mxu0 %v1364_v10  ;;  %886 = vmatmul.mubr.bf16.vlgmr.msra.gmra.mxu1 %v1365_v11 }
  0x45   :  { %1267 = vmatprep.subr.bf16.mxu0 %v1368_v13  ;;  %844 = vmatprep.mubr.bf16.mxu0 %v1369_v14 }
  0x46   :  { %893 = vmatprep.mubr.bf16.mxu1 %v1373_v17 }
  0x48   :  { %1268 = vmatpush3.bf16.msra.mxu0 %v1368_v13 }
  0x49   :  { %1269 = vmatprep.subr.bf16.mxu0 %v1372_v16 }
  0x4b   :  { %845 = vmatmul.mubr.bf16.gmra.mxu0 %v1371_v15 }
  0x4c   :  { %1270 = vmatpush3.bf16.msra.mxu0 %v1372_v16  ;;  %894 = vmatmul.mubr.bf16.gmra.mxu1 %v1375_v18 }
  0x4d   :  { %1271 = vmatprep.subr.bf16.mxu0 %v1376_v19  ;;  %1281 = vmatprep.mubr.bf16.mxu0 %v1381_v21 }
  0x50   :  { %1272 = vmatpush3.bf16.msra.mxu0 %v1376_v19 }
  0x51   :  { %1273 = vmatprep.subr.bf16.mxu0 %v1377_v20 }
  0x54   :  { %1274 = vmatpush3.bf16.msra.mxu0 %v1377_v20 }
  0x55   :  { %1275 = vmatprep.subr.bf16.mxu0 %v1378_v22 }
  0x58   :  { %1276 = vmatpush3.bf16.msra.mxu0 %v1378_v22 }
  0x59   :  { %1277 = vmatprep.subr.bf16.mxu0 %v1379_v23 }
  0x5c   :  { %1278 = vmatpush3.bf16.msra.mxu0 %v1379_v23 }
  0x5d   :  { %1279 = vmatprep.subr.bf16.mxu0 %v1380_v24 }
  0x60   :  { %1280 = vmatpush3.bf16.msra.mxu0 %v1380_v24 }
  0x63   :  { %1282 = vmatmul.mubr.bf16.vlgmr.msra.gmra.mxu0 %v1382_v25 }
  0xe3   :  { %v1159_v26 = vpop.f32.mrf.mxu0 }
  0xe4   :  { %v1187_v27 = vpop.f32.mrf.mxu1 }
  0xe5   :  { %v1160_v28 = vpop.f32.mrf.mxu0 }
  0xe6   :  { %v1188_v29 = vpop.f32.mrf.mxu1  ;;  %v1161_v53 = vadd.f32 %v1160_v28, %v1159_v26 }
  0xe7   :  { %v1162_v30 = vpop.f32.mrf.mxu0  ;;  %v1189_v54 = vadd.f32 %v1188_v29, %v1187_v27 }
  0xe8   :  { %v1190_v31 = vpop.f32.mrf.mxu1 }
  0xe9   :  { %v1163_v32 = vpop.f32.mrf.mxu0  ;;  %v790_v63 = vadd.f32 %v1189_v54, %v1161_v53 }
  0xea   :  { %v1191_v34 = vpop.f32.mrf.mxu1  ;;  %v1164_v57 = vadd.f32 %v1163_v32, %v1162_v30 }
  0xeb   :  { %v1165_v33 = vpop.f32.mrf.mxu0  ;;  %v1192_v58 = vadd.f32 %v1191_v34, %v1190_v31 }
  0xec   :  { %v1193_v35 = vpop.f32.mrf.mxu1 }
  0xed   :  { %v1166_v36 = vpop.f32.mrf.mxu0  ;;  %v793_v2 = vadd.f32 %v1192_v58, %v1164_v57 }
  0xee   :  { %v1194_v37 = vpop.f32.mrf.mxu1  ;;  %v1167_v59 = vadd.f32 %v1166_v36, %v1165_v33 }
  0xef   :  { %v1168_v38 = vpop.f32.mrf.mxu0  ;;  %v1195_v60 = vadd.f32 %v1194_v37, %v1193_v35 }
  0xf0   :  { %v1196_v39 = vpop.f32.mrf.mxu1 }
  0xf1   :  { %v1169_v40 = vpop.f32.mrf.mxu0  ;;  %v798_v6 = vadd.f32 %v1195_v60, %v1167_v59  ;;  %v987_v59 = vlaneseq }
  0xf2   :  { %v1197_v42 = vpop.f32.mrf.mxu1  ;;  %v1170_v3 = vadd.f32 %v1169_v40, %v1168_v38 }
  0xf3   :  { %v1198_v4 = vadd.f32 %v1197_v42, %v1196_v39  ;;  %v988_v60 = vshrl.u32 %v987_v59, 7 }
  0xf5   :  { %v801_v15 = vadd.f32 %v1198_v4, %v1170_v3 }
 0x103   :  { %v1215_v41 = vpop.f32.mrf.mxu0 }
 0x104   :  { %v1243_v44 = vpop.f32.mrf.mxu1 }
 0x105   :  { %v1216_v43 = vpop.f32.mrf.mxu0 }
 0x106   :  { %v1244_v46 = vpop.f32.mrf.mxu1  ;;  %v1217_v61 = vadd.f32 %v1216_v43, %v1215_v41 }
 0x107   :  { %v1218_v45 = vpop.f32.mrf.mxu0  ;;  %v1245_v9 = vadd.f32 %v1244_v46, %v1243_v44 }
 0x108   :  { %v1246_v48 = vpop.f32.mrf.mxu1  ;;  %v839_v7 = vadd.f32 %v1217_v61, %v790_v63  ;;  %v981_v61 = vld [vmem:[%s1694_s2] sm:$0x1] }
 0x109   :  { %v1219_v47 = vpop.f32.mrf.mxu0 }
 0x10a   :  { %v1247_v50 = vpop.f32.mrf.mxu1  ;;  %v1220_v62 = vadd.f32 %v1219_v47, %v1218_v45  ;;  %v888_v21 = vadd.f32 %v1245_v9, %v839_v7 }
 0x10b   :  { %v1221_v49 = vpop.f32.mrf.mxu0  ;;  %v1248_v11 = vadd.f32 %v1247_v50, %v1246_v48 }
 0x10c   :  { %v1249_v52 = vpop.f32.mrf.mxu1  ;;  %v842_v10 = vadd.f32 %v1220_v62, %v793_v2  ;;  %v989_v62 = vsub.s32 0, %v988_v60 }
 0x10d   :  { %v1222_v51 = vpop.f32.mrf.mxu0 }
 0x10e   :  { %v1250_v56 = vpop.f32.mrf.mxu1  ;;  %v1223_v5 = vadd.f32 %v1222_v51, %v1221_v49  ;;  %v891_v22 = vadd.f32 %v1248_v11, %v842_v10 }
 0x10f   :  { %v1224_v55 = vpop.f32.mrf.mxu0  ;;  %v1251_v17 = vadd.f32 %v1250_v56, %v1249_v52 }
 0x110   :  { %v1252_v1 = vpop.f32.mrf.mxu1  ;;  %v847_v16 = vadd.f32 %v1223_v5, %v798_v6 }
 0x111   :  { %v1225_v0 = vpop.f32.mrf.mxu0 }
 0x112   :  { %v1226_v12 = vadd.f32 %v1225_v0, %v1224_v55  ;;  %v1253_v13 = vpop.f32.mrf.mxu1  ;;  %v896_v24 = vadd.f32 %v1251_v17, %v847_v16 }
 0x113   :  { %v1254_v20 = vadd.f32 %v1253_v13, %v1252_v1  ;;  %v983_v1 = vld [vmem:[%s1695_s3] sm:$0x1] }
 0x114   :  { %v850_v19 = vadd.f32 %v1226_v12, %v801_v15 }
 0x116   :  { %v899_v28 = vadd.f32 %v1254_v20, %v850_v19 }
 0x123   :  { %v1283_v8 = vpop.f32.mrf.mxu0 }
 0x124   :  { %v945_v27 = vadd.f32 %v1283_v8, %v896_v24 }
 0x125   :  { %v936_v14 = vpop.f32.mrf.mxu0 }
 0x126   :  { %v937_v25 = vadd.f32 %v936_v14, %v888_v21 }
 0x127   :  { %v1284_v18 = vpop.f32.mrf.mxu0 }
 0x128   :  { %v948_v30 = vadd.f32 %v1284_v18, %v899_v28 }
 0x129   :  { %v939_v23 = vpop.f32.mrf.mxu0 }
 0x12a   :  { %v940_v26 = vadd.f32 %v939_v23, %v891_v22 }
 0x12c   :  { %v951_v29 = vadd.f32 %v940_v26, %v937_v25 }
 0x12e   :  { %v952_v31 = vadd.f32 %v951_v29, %v945_v27 }
 0x130   :  { %v953_v32 = vadd.f32 %v952_v31, %v948_v30 }
 0x132   :  { %v954_v33 = vrot.slane %v953_v32, 4 }
 0x134   :  { %v955_v34 = vadd.f32 %v954_v33, %v953_v32 }
 0x136   :  { %v956_v35 = vrot.slane %v955_v34, 2 }
 0x138   :  { %v957_v36 = vadd.f32 %v956_v35, %v955_v34 }
 0x13a   :  { %v958_v37 = vrot.slane %v957_v36, 1 }
 0x13c   :  { %v959_v38 = vadd.f32 %v958_v37, %v957_v36 }
 0x13e   :  { %v960_v39 = vmul.f32 0.03125, %v959_v38 }
 0x140   :  { %v961_v40 = vsub.f32 %v937_v25, %v960_v39  ;;  %v962_v41 = vsub.f32 %v940_v26, %v960_v39  ;;  %v963_v42 = vsub.f32 %v945_v27, %v960_v39  ;;  %v964_v43 = vsub.f32 %v948_v30, %v960_v39 }
 0x142   :  { %v965_v44 = vmul.f32 %v961_v40, %v961_v40  ;;  %v966_v45 = vmul.f32 %v962_v41, %v962_v41  ;;  %v967_v46 = vmul.f32 %v963_v42, %v963_v42  ;;  %v968_v48 = vmul.f32 %v964_v43, %v964_v43 }
 0x144   :  { %v969_v47 = vadd.f32 %v966_v45, %v965_v44 }
 0x146   :  { %v970_v49 = vadd.f32 %v969_v47, %v967_v46 }
 0x148   :  { %v971_v50 = vadd.f32 %v970_v49, %v968_v48 }
 0x14a   :  { %v972_v51 = vrot.slane %v971_v50, 4 }
 0x14c   :  { %v973_v52 = vadd.f32 %v972_v51, %v971_v50 }
 0x14e   :  { %v974_v53 = vrot.slane %v973_v52, 2 }
 0x150   :  { %v975_v54 = vadd.f32 %v974_v53, %v973_v52 }
 0x152   :  { %v976_v55 = vrot.slane %v975_v54, 1 }
 0x154   :  { %v977_v56 = vadd.f32 %v976_v55, %v975_v54 }
 0x156   :  { %v978_v57 = vmul.f32 0.03125, %v977_v56 }
 0x158   :  { %v979_v58 = vadd.f32 1e-05, %v978_v57 }
 0x15a   :  { %1383 = vrsqrt.f32 %v979_v58 }
 0x167   :  { %v1384_v63 = vpop.eup %1383 }
 0x168   :  { %v982_v0 = vmul.f32 %v1384_v63, %v981_v61 }
 0x16a   :  { %v984_v2 = vmul.f32 %v982_v0, %v960_v39  ;;  %v990_v3 = vrot.slane %v982_v0, %v989_v62 }
 0x16c   :  { %v985_v4 = vsub.f32 %v983_v1, %v984_v2  ;;  %v992_v5 = vmul.f32 %v990_v3, %v937_v25  ;;  %v993_v6 = vmul.f32 %v990_v3, %v940_v26  ;;  %v994_v7 = vmul.f32 %v990_v3, %v945_v27 }
 0x16d   :  { %v995_v8 = vmul.f32 %v990_v3, %v948_v30 }
 0x16e   :  { %v1000_v9 = vrot.slane %v985_v4, %v989_v62 }
 0x170   :  { %v1002_v10 = vadd.f32 %v1000_v9, %v992_v5  ;;  %v1003_v11 = vadd.f32 %v1000_v9, %v993_v6  ;;  %v1004_v12 = vadd.f32 %v1000_v9, %v994_v7  ;;  %v1005_v13 = vadd.f32 %v1000_v9, %v995_v8 }
 0x172   :  { %v1006_v14 = vmax.f32 %v1002_v10, 0.0  ;;  %v1007_v15 = vmax.f32 %v1003_v11, 0.0  ;;  %v1008_v16 = vmax.f32 %v1004_v12, 0.0  ;;  %v1009_v17 = vmax.f32 %v1005_v13, 0.0 }
 0x174   :  { %v1135_v18 = vpack.c.bf16 %v1007_v15, %v1006_v14  ;;  %v1140_v19 = vpack.c.bf16 %v1009_v17, %v1008_v16 }
 0x176   :  { %1136 = vst [vmem:[%s1696_s4] sm:$0xff] %v1135_v18   ;;  %1142 = vst [vmem:[%s1696_s4 + $0x8] sm:$0xff] %v1140_v19  }

// kernel: conv2d_ae_forward.10
= control target key start
LH: loop header
LB: loop body
LE: loop exit
PB: predicated region body
PF: predicated region fallthrough
CT: control target
= control target key end

     0   :  { %vm554_vm0 = vcmask 523264   ;;  %s2051_s1 = inlined_call_operand.vmem [shape: bf16[576,128], index: 1, kind: input, shape index: {}]   ;;  %s2052_s0 = inlined_call_operand.vmem [shape: bf16[128,576], index: 0, kind: input, shape index: {}]   ;;  %s2053_s2 = inlined_call_operand.vmem [shape: f32[1,128], index: 2, kind: input, shape index: {}]   ;;  %s2054_s3 = inlined_call_operand.vmem [shape: f32[1,128], index: 3, kind: input, shape index: {}]   ;;  %s2055_s4 = inlined_call_operand.vmem [shape: bf16[128,128], index: 4, kind: output, shape index: {}]  }
   0x1   :  { %v1432_v0 = vld [vmem:[%s2051_s1 + $0x78] sm:$0xff]   ;;  %v1436_v4 = vld [vmem:[%s2051_s1 + $0x70] sm:$0xff]   ;;  %v1440_v8 = vld [vmem:[%s2051_s1 + $0x68] sm:$0xff]  }
   0x2   :  { %v1433_v1 = vld [vmem:[%s2051_s1 + $0xf8] sm:$0xff]   ;;  %1260 = vmatprep.subr.bf16.mxu0 %v1432_v0  ;;  %v1437_v5 = vld [vmem:[%s2051_s1 + $0xf0] sm:$0xff]   ;;  %v1441_v9 = vld [vmem:[%s2051_s1 + $0xe8] sm:$0xff]  }
   0x3   :  { %v1434_v2 = vld [vmem:[%s2051_s1 + $0x38] sm:$0xff]   ;;  %1324 = vmatprep.subr.bf16.mxu1 %v1433_v1  ;;  %v1438_v6 = vld [vmem:[%s2051_s1 + $0x30] sm:$0xff]   ;;  %v1442_v10 = vld [vmem:[%s2051_s1 + $0x28] sm:$0xff]  }
   0x4   :  { %v1435_v3 = vld [vmem:[%s2051_s1 + $0xb8] sm:$0xff]   ;;  %1261 = vmatpush3.bf16.msra.mxu0 %v1434_v2  ;;  %v1439_v7 = vld [vmem:[%s2051_s1 + $0xb0] sm:$0xff]   ;;  %v1443_v11 = vld [vmem:[%s2051_s1 + $0xa8] sm:$0xff]  }
   0x5   :  { %1325 = vmatpush3.bf16.msra.mxu1 %v1435_v3  ;;  %1262 = vmatprep.subr.bf16.mxu0 %v1436_v4  ;;  %v1444_v12 = vld [vmem:[%s2051_s1 + $0x60] sm:$0xff]   ;;  %v1448_v16 = vld [vmem:[%s2051_s1 + $0x58] sm:$0xff]   ;;  %v1452_v20 = vld [vmem:[%s2051_s1 + $0x50] sm:$0xff]  }
   0x6   :  { %1326 = vmatprep.subr.bf16.mxu1 %v1437_v5  ;;  %v1445_v13 = vld [vmem:[%s2051_s1 + $0xe0] sm:$0xff]   ;;  %v1449_v17 = vld [vmem:[%s2051_s1 + $0xd8] sm:$0xff]   ;;  %v1453_v21 = vld [vmem:[%s2051_s1 + $0xd0] sm:$0xff]  }
   0x7   :  { %v1446_v14 = vld [vmem:[%s2051_s1 + $0x20] sm:$0xff]   ;;  %v1450_v18 = vld [vmem:[%s2051_s1 + $0x18] sm:$0xff]   ;;  %v1454_v22 = vld [vmem:[%s2051_s1 + $0x10] sm:$0xff]  }
   0x8   :  { %1263 = vmatpush3.bf16.msra.mxu0 %v1438_v6  ;;  %v1447_v15 = vld [vmem:[%s2051_s1 + $0xa0] sm:$0xff]   ;;  %v1451_v19 = vld [vmem:[%s2051_s1 + $0x98] sm:$0xff]   ;;  %v1455_v23 = vld [vmem:[%s2051_s1 + $0x90] sm:$0xff]  }
   0x9   :  { %1327 = vmatpush3.bf16.msra.mxu1 %v1439_v7  ;;  %1264 = vmatprep.subr.bf16.mxu0 %v1440_v8  ;;  %v1456_v24 = vld [vmem:[%s2051_s1 + $0x48] sm:$0xff]   ;;  %v1460_v28 = vld [vmem:[%s2051_s1 + $0x40] sm:$0xff]   ;;  %v1470_v36 = vld [vmem:[%s2051_s1 + $0x118] sm:$0xff]  }
   0xa   :  { %1328 = vmatprep.subr.bf16.mxu1 %v1441_v9  ;;  %v1457_v25 = vld [vmem:[%s2051_s1 + $0xc8] sm:$0xff]   ;;  %v1461_v29 = vld [vmem:[%s2051_s1 + $0xc0] sm:$0xff]   ;;  %v1483_v42 = vld [vmem:[%s2051_s1 + $0x110] sm:$0xff]  }
   0xb   :  { %v1458_v26 = vld [vmem:[%s2051_s1 + $0x8] sm:$0xff]   ;;  %v1462_v30 = vld [vmem:[%s2051_s1] sm:$0xff]   ;;  %v1479_v43 = vld [vmem:[%s2052_s0 + $0x5c] ss:$20 sps:$4 sm:$0xff]  }
   0xc   :  { %1265 = vmatpush3.bf16.msra.mxu0 %v1442_v10  ;;  %v1459_v27 = vld [vmem:[%s2051_s1 + $0x88] sm:$0xff]   ;;  %v1463_v31 = vld [vmem:[%s2051_s1 + $0x80] sm:$0xff]   ;;  %v1484_v47 = vld [vmem:[%s2052_s0 + $0x7c] ss:$20 sps:$4 sm:$0xff]  }
   0xd   :  { %1329 = vmatpush3.bf16.msra.mxu1 %v1443_v11  ;;  %1266 = vmatprep.subr.bf16.mxu0 %v1444_v12  ;;  %v1464_v32 = vld [vmem:[%s2052_s0] ss:$20 sps:$4 sm:$0xff]   ;;  %v1466_v33 = vld [vmem:[%s2052_s0 + $0x4] ss:$20 sps:$4 sm:$0xff]   ;;  %v1467_v34 = vld [vmem:[%s2052_s0 + $0x8] ss:$20 sps:$4 sm:$0xff]  }
   0xe   :  { %1330 = vmatprep.subr.bf16.mxu1 %v1445_v13  ;;  %v1469_v35 = vld [vmem:[%s2052_s0 + $0xc] ss:$20 sps:$4 sm:$0xff]   ;;  %611 = vmatprep.mubr.bf16.mxu0 %v1466_v33  ;;  %v1473_v38 = vld [vmem:[%s2052_s0 + $0x34] ss:$20 sps:$4 sm:$0xff]   ;;  %v1476_v40 = vld [vmem:[%s2052_s0 + $0x30] ss:$20 sps:$4 sm:$0xff]  }
   0xf   :  { %708 = vmatprep.mubr.bf16.mxu1 %v1469_v35  ;;  %v1471_v37 = vld [vmem:[%s2052_s0 + $0x2c] ss:$20 sps:$4 sm:$0xff]   ;;  %v1475_v39 = vld [vmem:[%s2052_s0 + $0x28] ss:$20 sps:$4 sm:$0xff]   ;;  %v1481_v44 = vld [vmem:[%s2052_s0 + $0x50] ss:$20 sps:$4 sm:$0xff]  }
  0x10   :  { %1267 = vmatpush3.bf16.msra.mxu0 %v1446_v14  ;;  %v1477_v41 = vld [vmem:[%s2052_s0 + $0x54] ss:$20 sps:$4 sm:$0xff]   ;;  %v1482_v45 = vld [vmem:[%s2052_s0 + $0x58] ss:$20 sps:$4 sm:$0xff]   ;;  %v1509_v49 = vld [vmem:[%s2051_s1 + $0x100] sm:$0xff]  }
  0x11   :  { %1331 = vmatpush3.bf16.msra.mxu1 %v1447_v15  ;;  %1268 = vmatprep.subr.bf16.mxu0 %v1448_v16  ;;  %v1496_v46 = vld [vmem:[%s2051_s1 + $0x108] sm:$0xff]   ;;  %v1486_v48 = vld [vmem:[%s2052_s0 + $0x84] ss:$20 sps:$4 sm:$0xff]   ;;  %v1489_v51 = vld [vmem:[%s2052_s0 + $0x80] ss:$20 sps:$4 sm:$0xff]  }
  0x12   :  { %1332 = vmatprep.subr.bf16.mxu1 %v1449_v17  ;;  %v1488_v50 = vld [vmem:[%s2052_s0 + $0x78] ss:$20 sps:$4 sm:$0xff]   ;;  %v1494_v54 = vld [vmem:[%s2052_s0 + $0xa0] ss:$20 sps:$4 sm:$0xff]   ;;  %v1495_v55 = vld [vmem:[%s2052_s0 + $0xa8] ss:$20 sps:$4 sm:$0xff]  }
  0x13   :  { %v1490_v52 = vld [vmem:[%s2052_s0 + $0xa4] ss:$20 sps:$4 sm:$0xff]   ;;  %v1492_v53 = vld [vmem:[%s2052_s0 + $0xac] ss:$20 sps:$4 sm:$0xff]   ;;  %v1499_v57 = vld [vmem:[%s2052_s0 + $0xd4] ss:$20 sps:$4 sm:$0xff]  }
  0x14   :  { %1269 = vmatpush3.bf16.msra.mxu0 %v1450_v18  ;;  %v1497_v56 = vld [vmem:[%s2052_s0 + $0xcc] ss:$20 sps:$4 sm:$0xff]   ;;  %v1501_v58 = vld [vmem:[%s2052_s0 + $0xc8] ss:$20 sps:$4 sm:$0xff]   ;;  %v1502_v59 = vld [vmem:[%s2052_s0 + $0xd0] ss:$20 sps:$4 sm:$0xff]  }
  0x15   :  { %1333 = vmatpush3.bf16.msra.mxu1 %v1451_v19  ;;  %1270 = vmatprep.subr.bf16.mxu0 %v1452_v20  ;;  %v1503_v60 = vld [vmem:[%s2052_s0 + $0xf4] ss:$20 sps:$4 sm:$0xff]   ;;  %v1505_v61 = vld [vmem:[%s2052_s0 + $0xfc] ss:$20 sps:$4 sm:$0xff]   ;;  %v1508_v63 = vld [vmem:[%s2052_s0 + $0xf8] ss:$20 sps:$4 sm:$0xff]  }
  0x16   :  { %1334 = vmatprep.subr.bf16.mxu1 %v1453_v21  ;;  %v1507_v62 = vld [vmem:[%s2052_s0 + $0xf0] ss:$20 sps:$4 sm:$0xff]   ;;  %v1514_v2 = vld [vmem:[%s2052_s0 + $0x118] ss:$20 sps:$4 sm:$0xff]   ;;  %v1515_v3 = vld [vmem:[%s2052_s0 + $0x120] ss:$20 sps:$4 sm:$0xff]  }
  0x17   :  { %v1510_v0 = vld [vmem:[%s2052_s0 + $0x11c] ss:$20 sps:$4 sm:$0xff]   ;;  %v1512_v1 = vld [vmem:[%s2052_s0 + $0x124] ss:$20 sps:$4 sm:$0xff]   ;;  %v1520_v8 = vld [vmem:[%s2052_s0 + $0x60] ss:$20 sps:$4 sm:$0xff]  }
  0x18   :  { %1271 = vmatpush3.bf16.msra.mxu0 %v1454_v22  ;;  %v1516_v4 = vld [vmem:[%s2052_s0 + $0x10] ss:$20 sps:$4 sm:$0xff]   ;;  %v1518_v6 = vld [vmem:[%s2052_s0 + $0x38] ss:$20 sps:$4 sm:$0xff]   ;;  %v1521_v9 = vld [vmem:[%s2052_s0 + $0x100] ss:$20 sps:$4 sm:$0xff]  }
  0x19   :  { %1335 = vmatpush3.bf16.msra.mxu1 %v1455_v23  ;;  %1272 = vmatprep.subr.bf16.mxu0 %v1456_v24  ;;  %v1517_v5 = vld [vmem:[%s2052_s0 + $0xb0] ss:$20 sps:$4 sm:$0xff]   ;;  %v1519_v7 = vld [vmem:[%s2052_s0 + $0xd8] ss:$20 sps:$4 sm:$0xff]   ;;  %v1522_v10 = vld [vmem:[%s2052_s0 + $0x88] ss:$20 sps:$4 sm:$0xff]  }
  0x1a   :  { %1336 = vmatprep.subr.bf16.mxu1 %v1457_v25  ;;  %v1523_v11 = vld [vmem:[%s2052_s0 + $0x128] ss:$20 sps:$4 sm:$0xff]  }
  0x1c   :  { %1273 = vmatpush3.bf16.msra.mxu0 %v1458_v26 }
  0x1d   :  { %1337 = vmatpush3.bf16.msra.mxu1 %v1459_v27  ;;  %1274 = vmatprep.subr.bf16.mxu0 %v1460_v28 }
  0x1e   :  { %1338 = vmatprep.subr.bf16.mxu1 %v1461_v29 }
  0x20   :  { %1275 = vmatpush3.bf16.msra.mxu0 %v1462_v30 }
  0x21   :  { %1339 = vmatpush3.bf16.msra.mxu1 %v1463_v31  ;;  %1400 = vmatprep.subr.bf16.mxu0 %v1470_v36 }
  0x22   :  { %1424 = vmatprep.subr.bf16.mxu1 %v1470_v36 }
  0x23   :  { %612 = vmatmul.mubr.bf16.vlgmr.msra.gmra.mxu0 %v1464_v32 }
  0x24   :  { %709 = vmatmul.mubr.bf16.vlgmr.msra.gmra.mxu1 %v1467_v34  ;;  %1401 = vmatpush3.bf16.msra.mxu0 %v1470_v36 }
  0x25   :  { %619 = vmatprep.mubr.bf16.mxu0 %v1471_v37  ;;  %716 = vmatprep.mubr.bf16.mxu1 %v1473_v38 }
  0x26   :  { %1428 = vmatpush3.bf16.msra.mxu1 %v1470_v36  ;;  %1402 = vmatprep.subr.bf16.mxu0 %v1483_v42 }
  0x27   :  { %1425 = vmatprep.subr.bf16.mxu1 %v1483_v42 }
  0x28   :  { %1403 = vmatpush3.bf16.msra.mxu0 %v1483_v42 }
  0x29   :  { %1404 = vmatprep.subr.bf16.mxu0 %v1496_v46 }
  0x2a   :  { %1429 = vmatpush3.bf16.msra.mxu1 %v1483_v42 }
  0x2b   :  { %620 = vmatmul.mubr.bf16.gmra.mxu0 %v1475_v39  ;;  %1426 = vmatprep.subr.bf16.mxu1 %v1496_v46 }
  0x2c   :  { %717 = vmatmul.mubr.bf16.gmra.mxu1 %v1476_v40  ;;  %627 = vmatprep.mubr.bf16.mxu0 %v1477_v41 }
  0x2d   :  { %724 = vmatprep.mubr.bf16.mxu1 %v1479_v43  ;;  %1405 = vmatpush3.bf16.msra.mxu0 %v1496_v46 }
  0x2e   :  { %1430 = vmatpush3.bf16.msra.mxu1 %v1496_v46  ;;  %1406 = vmatprep.subr.bf16.mxu0 %v1509_v49 }
  0x2f   :  { %1427 = vmatprep.subr.bf16.mxu1 %v1509_v49 }
  0x31   :  { %1407 = vmatpush3.bf16.msra.mxu0 %v1509_v49 }
  0x32   :  { %1431 = vmatpush3.bf16.msra.mxu1 %v1509_v49 }
  0x33   :  { %628 = vmatmul.mubr.bf16.gmra.mxu0 %v1481_v44 }
  0x34   :  { %725 = vmatmul.mubr.bf16.gmra.mxu1 %v1482_v45  ;;  %635 = vmatprep.mubr.bf16.mxu0 %v1484_v47 }
  0x35   :  { %732 = vmatprep.mubr.bf16.mxu1 %v1486_v48 }
  0x3b   :  { %636 = vmatmul.mubr.bf16.gmra.mxu0 %v1488_v50 }
  0x3c   :  { %733 = vmatmul.mubr.bf16.gmra.mxu1 %v1489_v51  ;;  %643 = vmatprep.mubr.bf16.mxu0 %v1490_v52 }
  0x3d   :  { %740 = vmatprep.mubr.bf16.mxu1 %v1492_v53 }
  0x43   :  { %644 = vmatmul.mubr.bf16.gmra.mxu0 %v1494_v54 }
  0x44   :  { %741 = vmatmul.mubr.bf16.gmra.mxu1 %v1495_v55  ;;  %651 = vmatprep.mubr.bf16.mxu0 %v1497_v56 }
  0x45   :  { %748 = vmatprep.mubr.bf16.mxu1 %v1499_v57 }
  0x4b   :  { %652 = vmatmul.mubr.bf16.gmra.mxu0 %v1501_v58 }
  0x4c   :  { %749 = vmatmul.mubr.bf16.gmra.mxu1 %v1502_v59  ;;  %659 = vmatprep.mubr.bf16.mxu0 %v1503_v60 }
  0x4d   :  { %756 = vmatprep.mubr.bf16.mxu1 %v1505_v61 }
  0x53   :  { %660 = vmatmul.mubr.bf16.gmra.mxu0 %v1507_v62 }
  0x54   :  { %757 = vmatmul.mubr.bf16.gmra.mxu1 %v1508_v63  ;;  %667 = vmatprep.mubr.bf16.mxu0 %v1510_v0 }
  0x55   :  { %764 = vmatprep.mubr.bf16.mxu1 %v1512_v1 }
  0x5b   :  { %668 = vmatmul.mubr.bf16.gmra.mxu0 %v1514_v2 }
  0x5c   :  { %765 = vmatmul.mubr.bf16.gmra.mxu1 %v1515_v3  ;;  %1408 = vmatprep.mubr.msk.bf16.mxu0 %vm554_vm0, %v1516_v4 }
  0x5d   :  { %1416 = vmatprep.mubr.msk.bf16.mxu1 %vm554_vm0, %v1517_v5 }
  0x63   :  { %1409 = vmatmul.mubr.msk.bf16.vlgmr.msra.gmra.mxu0 %vm554_vm0, %v1518_v6 }
  0x64   :  { %1417 = vmatmul.mubr.msk.bf16.vlgmr.msra.gmra.mxu1 %vm554_vm0, %v1519_v7  ;;  %1412 = vmatprep.mubr.msk.bf16.mxu0 %vm554_vm0, %v1520_v8 }
  0x65   :  { %1420 = vmatprep.mubr.msk.bf16.mxu1 %vm554_vm0, %v1521_v9 }
  0x6b   :  { %1413 = vmatmul.mubr.msk.bf16.gmra.mxu0 %vm554_vm0, %v1522_v10 }
  0x6c   :  { %1421 = vmatmul.mubr.msk.bf16.gmra.mxu1 %vm554_vm0, %v1523_v11 }
  0xe3   :  { %v1276_v12 = vpop.f32.mrf.mxu0 }
  0xe4   :  { %v1787_v13 = vpop.f32.mrf.mxu1 }
  0xe5   :  { %v1277_v14 = vpop.f32.mrf.mxu0 }
  0xe6   :  { %v1789_v15 = vadd.f32 %v1277_v14, %v1276_v12  ;;  %v1341_v16 = vpop.f32.mrf.mxu1 }
  0xe7   :  { %v1279_v17 = vpop.f32.mrf.mxu0 }
  0xe8   :  { %v1343_v18 = vpop.f32.mrf.mxu1 }
  0xe9   :  { %v1280_v19 = vpop.f32.mrf.mxu0 }
  0xea   :  { %v1344_v20 = vpop.f32.mrf.mxu1 }
  0xeb   :  { %v1282_v21 = vpop.f32.mrf.mxu0 }
  0xec   :  { %v1346_v22 = vpop.f32.mrf.mxu1 }
  0xed   :  { %v1283_v23 = vpop.f32.mrf.mxu0 }
  0xee   :  { %v1347_v24 = vpop.f32.mrf.mxu1 }
  0xef   :  { %v1285_v25 = vpop.f32.mrf.mxu0 }
  0xf0   :  { %v1349_v26 = vpop.f32.mrf.mxu1 }
  0xf1   :  { %v1286_v27 = vpop.f32.mrf.mxu0 }
  0xf2   :  { %v1350_v28 = vpop.f32.mrf.mxu1 }
  0xf3   :  { %v1288_v29 = vpop.f32.mrf.mxu0 }
  0xf4   :  { %v1352_v30 = vpop.f32.mrf.mxu1 }
  0xf5   :  { %v1289_v31 = vpop.f32.mrf.mxu0 }
  0xf6   :  { %v1353_v32 = vpop.f32.mrf.mxu1 }
  0xf7   :  { %v1791_v33 = vpop.f32.mrf.mxu0 }
  0xf8   :  { %v1793_v34 = vpop.f32.mrf.mxu1 }
  0xf9   :  { %v1292_v35 = vpop.f32.mrf.mxu0 }
  0xfa   :  { %v1356_v36 = vpop.f32.mrf.mxu1 }
  0xfb   :  { %v1795_v37 = vpop.f32.mrf.mxu0 }
  0xfc   :  { %v1797_v38 = vpop.f32.mrf.mxu1 }
  0xfd   :  { %v1799_v39 = vpop.f32.mrf.mxu0 }
  0xfe   :  { %v1801_v40 = vpop.f32.mrf.mxu1 }
  0xff   :  { %v1803_v41 = vpop.f32.mrf.mxu0 }
 0x100   :  { %v1805_v42 = vpop.f32.mrf.mxu1 }
 0x101   :  { %v1807_v43 = vpop.f32.mrf.mxu0 }
 0x102   :  { %v1809_v44 = vpop.f32.mrf.mxu1 }
 0x103   :  { %v1811_v45 = vpop.f32.mrf.mxu0 }
 0x104   :  { %v1813_v46 = vpop.f32.mrf.mxu1 }
 0x105   :  { %v1815_v47 = vpop.f32.mrf.mxu0 }
 0x106   :  { %v1817_v48 = vpop.f32.mrf.mxu1 }
 0x107   :  { %v1819_v49 = vpop.f32.mrf.mxu0 }
 0x108   :  { %v1821_v50 = vpop.f32.mrf.mxu1 }
 0x109   :  { %v1823_v51 = vpop.f32.mrf.mxu0 }
 0x10a   :  { %v1825_v52 = vpop.f32.mrf.mxu1 }
 0x10b   :  { %v1827_v53 = vpop.f32.mrf.mxu0 }
 0x10c   :  { %v1829_v54 = vpop.f32.mrf.mxu1 }
 0x10d   :  { %v1831_v55 = vpop.f32.mrf.mxu0 }
 0x10e   :  { %v1833_v56 = vpop.f32.mrf.mxu1 }
 0x10f   :  { %v1835_v57 = vpop.f32.mrf.mxu0 }
 0x110   :  { %v1837_v58 = vpop.f32.mrf.mxu1 }
 0x111   :  { %2056 = vst [vmem:[#allocation2_spill] sm:$0xff] %v1837_v58  ;;  %v1839_v59 = vpop.f32.mrf.mxu0 }
 0x112   :  { %v1841_v60 = vpop.f32.mrf.mxu1 }
 0x113   :  { %2057 = vst [vmem:[#allocation3_spill] sm:$0xff] %v1841_v60  ;;  %v1843_v61 = vpop.f32.mrf.mxu0 }
 0x114   :  { %2058 = vst [vmem:[#allocation4_spill] sm:$0xff] %v1843_v61  ;;  %v1845_v62 = vpop.f32.mrf.mxu1  ;;  %v1354_v61 = vadd.f32 %v1353_v32, %v1352_v30  ;;  %v1363_v32 = vadd.f32 %v1809_v44, %v1805_v42  ;;  %v1369_v42 = vadd.f32 %v1825_v52, %v1821_v50  ;;  %v1311_v50 = vadd.f32 %v1839_v59, %v1835_v57 }
 0x115   :  { %2059 = vst [vmem:[#allocation5_spill] sm:$0xff] %v1845_v62  ;;  %v1847_v63 = vpop.f32.mrf.mxu0  ;;  %v1287_v62 = vadd.f32 %v1286_v27, %v1285_v25  ;;  %v1360_v25 = vadd.f32 %v1801_v40, %v1797_v38 }
 0x116   :  { %2060 = vst [vmem:[#allocation6_spill] sm:$0xff] %v1847_v63  ;;  %v1849_v0 = vpop.f32.mrf.mxu1 }
 0x117   :  { %2061 = vst [vmem:[#allocation7_spill] sm:$0xff] %v1849_v0  ;;  %v1851_v1 = vpop.f32.mrf.mxu0 }
 0x118   :  { %2062 = vst [vmem:[#allocation8_spill] sm:$0xff] %v1851_v1  ;;  %v1853_v2 = vpop.f32.mrf.mxu1  ;;  %v1284_v1 = vadd.f32 %v1283_v23, %v1282_v21  ;;  %v2074_v52 = vld [vmem:[#allocation2_spill] sm:$0xff] }
 0x119   :  { %2063 = vst [vmem:[#allocation9_spill] sm:$0xff] %v1853_v2  ;;  %v1855_v3 = vpop.f32.mrf.mxu0  ;;  %v1342_v2 = vadd.f32 %v1341_v16, %v1787_v13  ;;  %v1293_v16 = vadd.f32 %v1292_v35, %v1791_v33  ;;  %v1302_v35 = vadd.f32 %v1815_v47, %v1811_v45 }
 0x11a   :  { %2064 = vst [vmem:[#allocation10_spill] sm:$0xff] %v1855_v3  ;;  %v1857_v4 = vpop.f32.mrf.mxu1  ;;  %v1345_v3 = vadd.f32 %v1344_v20, %v1343_v18 }
 0x11b   :  { %2065 = vst [vmem:[#allocation11_spill] sm:$0xff] %v1857_v4  ;;  %v1859_v5 = vpop.f32.mrf.mxu0  ;;  %v1281_v4 = vadd.f32 %v1280_v19, %v1279_v17  ;;  %v1357_v17 = vadd.f32 %v1356_v36, %v1793_v34  ;;  %v1366_v36 = vadd.f32 %v1817_v48, %v1813_v46  ;;  %v1308_v46 = vadd.f32 %v1831_v55, %v1827_v53  ;;  %v2076_v53 = vld [vmem:[#allocation4_spill] sm:$0xff] }
 0x11c   :  { %2066 = vst [vmem:[#allocation12_spill] sm:$0xff] %v1859_v5  ;;  %v1861_v6 = vpop.f32.mrf.mxu1  ;;  %v1372_v48 = vadd.f32 %v1833_v56, %v1829_v54  ;;  %v2078_v54 = vld [vmem:[#allocation5_spill] sm:$0xff] }
 0x11d   :  { %2067 = vst [vmem:[#allocation13_spill] sm:$0xff] %v1861_v6  ;;  %v1863_v7 = vpop.f32.mrf.mxu0  ;;  %v714_v63 = vadd.f32 %v1345_v3, %v1281_v4  ;;  %v730_v30 = vadd.f32 %v1357_v17, %v1293_v16  ;;  %v743_v47 = vadd.f32 %v1366_v36, %v1302_v35  ;;  %v2077_v55 = vld [vmem:[#allocation6_spill] sm:$0xff] }
 0x11e   :  { %2068 = vst [vmem:[#allocation14_spill] sm:$0xff] %v1863_v7  ;;  %v1865_v8 = vpop.f32.mrf.mxu1  ;;  %v1348_v7 = vadd.f32 %v1347_v24, %v1346_v22  ;;  %v1296_v24 = vadd.f32 %v1799_v39, %v1795_v37  ;;  %v1314_v4 = vadd.f32 %v2077_v55, %v2076_v53  ;;  %v2079_v56 = vld [vmem:[#allocation7_spill] sm:$0xff] }
 0x11f   :  { %2069 = vst [vmem:[#allocation15_spill] sm:$0xff] %v1865_v8  ;;  %v1867_v9 = vpop.f32.mrf.mxu0 }
 0x120   :  { %2070 = vst [vmem:[#allocation16_spill] sm:$0xff] %v1867_v9  ;;  %v1869_v10 = vpop.f32.mrf.mxu1  ;;  %v1351_v9 = vadd.f32 %v1350_v28, %v1349_v26  ;;  %v719_v60 = vadd.f32 %v1348_v7, %v1284_v1  ;;  %v735_v38 = vadd.f32 %v1360_v25, %v1296_v24  ;;  %v751_v7 = vadd.f32 %v1372_v48, %v1308_v46 }
 0x121   :  { %2071 = vst [vmem:[#allocation17_spill] sm:$0xff] %v1869_v10  ;;  %v1871_v11 = vpop.f32.mrf.mxu0  ;;  %v711_v10 = vadd.f32 %v1342_v2, %v1789_v15  ;;  %v2081_v57 = vld [vmem:[#allocation10_spill] sm:$0xff] }
 0x122   :  { %2072 = vst [vmem:[#allocation18_spill] sm:$0xff] %v1871_v11  ;;  %v1873_v12 = vpop.f32.mrf.mxu1  ;;  %v1290_v11 = vadd.f32 %v1289_v31, %v1288_v29  ;;  %v722_v21 = vadd.f32 %v1351_v9, %v1287_v62  ;;  %v1299_v31 = vadd.f32 %v1807_v43, %v1803_v41  ;;  %v1305_v41 = vadd.f32 %v1823_v51, %v1819_v49 }
 0x123   :  { %2073 = vst [vmem:[#allocation19_spill] sm:$0xff] %v1873_v12  ;;  %v1410_v14 = vpop.f32.mrf.mxu0 }
 0x124   :  { %v1876_v5 = vpop.f32.mrf.mxu1  ;;  %v1885_v20 = vadd.f32 %v1410_v14, %v719_v60  ;;  %v727_v22 = vadd.f32 %v1354_v61, %v1290_v11  ;;  %v738_v60 = vadd.f32 %v1363_v32, %v1299_v31  ;;  %v746_v51 = vadd.f32 %v1369_v42, %v1305_v41  ;;  %v2082_v11 = vld [vmem:[#allocation9_spill] sm:$0xff] }
 0x125   :  { %v807_v6 = vpop.f32.mrf.mxu0  ;;  %v1943_v16 = vadd.f32 %v1876_v5, %v751_v7  ;;  %v2086_v24 = vld [vmem:[#allocation13_spill] sm:$0xff] }
 0x126   :  { %v839_v0 = vpop.f32.mrf.mxu1  ;;  %v1879_v58 = vadd.f32 %v807_v6, %v711_v10  ;;  %v1378_v6 = vadd.f32 %v2079_v56, %v2078_v54  ;;  %v2080_v10 = vld [vmem:[#allocation8_spill] sm:$0xff]  ;;  %v2087_v25 = vld [vmem:[#allocation15_spill] sm:$0xff] }
 0x127   :  { %v1411_v8 = vpop.f32.mrf.mxu0  ;;  %v1928_v2 = vadd.f32 %v839_v0, %v743_v47  ;;  %v1317_v59 = vadd.f32 %v2081_v57, %v2080_v10  ;;  %v2088_v32 = vld [vmem:[#allocation16_spill] sm:$0xff] }
 0x128   :  { %v1419_v18 = vpop.f32.mrf.mxu1  ;;  %v1893_v26 = vadd.f32 %v1411_v8, %v722_v21  ;;  %v759_v21 = vadd.f32 %v1378_v6, %v1314_v4  ;;  %v2090_v35 = vld [vmem:[#allocation17_spill] sm:$0xff] }
 0x129   :  { %v810_v12 = vpop.f32.mrf.mxu0 }
 0x12a   :  { %v1881_v13 = vadd.f32 %v810_v12, %v714_v63  ;;  %v842_v28 = vpop.f32.mrf.mxu1  ;;  %v2075_v63 = vld [vmem:[#allocation3_spill] sm:$0xff] }
 0x12b   :  { %v1414_v19 = vpop.f32.mrf.mxu0  ;;  %v1375_v1 = vadd.f32 %v2075_v63, %v2074_v52  ;;  %v1935_v8 = vadd.f32 %v842_v28, %v746_v51  ;;  %v2083_v12 = vld [vmem:[#allocation11_spill] sm:$0xff] }
 0x12c   :  { %v870_v15 = vadd.f32 %v1881_v13, %v1879_v58  ;;  %v1422_v43 = vpop.f32.mrf.mxu1  ;;  %v1914_v44 = vadd.f32 %v1414_v19, %v735_v38  ;;  %v1381_v0 = vadd.f32 %v2083_v12, %v2082_v11  ;;  %v2091_v36 = vld [vmem:[#allocation19_spill] sm:$0xff] }
 0x12d   :  { %v823_v23 = vpop.f32.mrf.mxu0  ;;  %v754_v17 = vadd.f32 %v1375_v1, %v1311_v50 }
 0x12e   :  { %v871_v27 = vadd.f32 %v870_v15, %v1885_v20  ;;  %v1900_v33 = vadd.f32 %v823_v23, %v727_v22  ;;  %v855_v62 = vpop.f32.mrf.mxu1  ;;  %v2084_v15 = vld [vmem:[#allocation12_spill] sm:$0xff]  ;;  %v2085_v22 = vld [vmem:[#allocation14_spill] sm:$0xff] }
 0x12f   :  { %v1415_v29 = vpop.f32.mrf.mxu0  ;;  %v1320_v23 = vadd.f32 %v2085_v22, %v2084_v15  ;;  %v1950_v28 = vadd.f32 %v1419_v18, %v754_v17  ;;  %v1957_v38 = vadd.f32 %v855_v62, %v759_v21 }
 0x130   :  { %v872_v34 = vadd.f32 %v871_v27, %v1893_v26  ;;  %v1921_v61 = vadd.f32 %v1415_v29, %v738_v60  ;;  %v1423_v14 = vpop.f32.mrf.mxu1  ;;  %v1384_v27 = vadd.f32 %v2087_v25, %v2086_v24 }
 0x131   :  { %v826_v37 = vpop.f32.mrf.mxu0 }
 0x132   :  { %v873_v39 = vadd.f32 %v872_v34, %v1900_v33  ;;  %v1908_v40 = vadd.f32 %v826_v37, %v730_v30  ;;  %v762_v30 = vadd.f32 %v1381_v0, %v1317_v59  ;;  %v858_v31 = vpop.f32.mrf.mxu1  ;;  %v2089_v34 = vld [vmem:[#allocation18_spill] sm:$0xff]  ;;  %v1387_v37 = vadd.f32 %v2091_v36, %v2090_v35 }
 0x133   :  { %v1323_v5 = vadd.f32 %v2089_v34, %v2088_v32  ;;  %v767_v41 = vadd.f32 %v1384_v27, %v1320_v23 }
 0x134   :  { %v874_v45 = vadd.f32 %v873_v39, %v1908_v40  ;;  %v1960_v42 = vadd.f32 %v858_v31, %v762_v30 }
 0x135   :  { %v1963_v60 = vadd.f32 %v1422_v43, %v767_v41 }
 0x136   :  { %v875_v49 = vadd.f32 %v874_v45, %v1914_v44  ;;  %v770_v45 = vadd.f32 %v1387_v37, %v1323_v5 }
 0x138   :  { %v876_v3 = vadd.f32 %v875_v49, %v1921_v61  ;;  %v1966_v46 = vadd.f32 %v1423_v14, %v770_v45 }
 0x13a   :  { %v877_v9 = vadd.f32 %v876_v3, %v1928_v2 }
 0x13c   :  { %v878_v19 = vadd.f32 %v877_v9, %v1935_v8 }
 0x13e   :  { %v879_v29 = vadd.f32 %v878_v19, %v1943_v16 }
 0x140   :  { %v880_v39 = vadd.f32 %v879_v29, %v1950_v28 }
 0x142   :  { %v881_v18 = vadd.f32 %v880_v39, %v1957_v38 }
 0x144   :  { %v882_v47 = vadd.f32 %v881_v18, %v1960_v42 }
 0x146   :  { %v883_v48 = vadd.f32 %v882_v47, %v1963_v60 }
 0x148   :  { %v884_v49 = vadd.f32 %v883_v48, %v1966_v46 }
 0x14a   :  { %v885_v51 = vrot.slane %v884_v49, 4 }
 0x14c   :  { %v886_v62 = vadd.f32 %v885_v51, %v884_v49 }
 0x14e   :  { %v887_v50 = vrot.slane %v886_v62, 2 }
 0x150   :  { %v888_v52 = vadd.f32 %v887_v50, %v886_v62 }
 0x152   :  { %v889_v63 = vrot.slane %v888_v52, 1 }
 0x154   :  { %v890_v1 = vadd.f32 %v889_v63, %v888_v52 }
 0x156   :  { %v1970_v3 = vmul.f32 0.0078125, %v890_v1 }
 0x158   :  { %v892_v43 = vsub.f32 %v1879_v58, %v1970_v3  ;;  %v893_v53 = vsub.f32 %v1881_v13, %v1970_v3  ;;  %v894_v55 = vsub.f32 %v1885_v20, %v1970_v3  ;;  %v895_v56 = vsub.f32 %v1893_v26, %v1970_v3 }
 0x159   :  { %v896_v6 = vsub.f32 %v1900_v33, %v1970_v3  ;;  %v897_v10 = vsub.f32 %v1908_v40, %v1970_v3  ;;  %v898_v11 = vsub.f32 %v1914_v44, %v1970_v3  ;;  %v899_v14 = vsub.f32 %v1921_v61, %v1970_v3 }
 0x15a   :  { %v908_v4 = vmul.f32 %v892_v43, %v892_v43  ;;  %v909_v54 = vmul.f32 %v893_v53, %v893_v53  ;;  %v910_v7 = vmul.f32 %v894_v55, %v894_v55  ;;  %v911_v57 = vmul.f32 %v895_v56, %v895_v56 }
 0x15b   :  { %v912_v12 = vmul.f32 %v896_v6, %v896_v6  ;;  %v913_v17 = vmul.f32 %v897_v10, %v897_v10  ;;  %v900_v21 = vsub.f32 %v1928_v2, %v1970_v3  ;;  %v914_v15 = vmul.f32 %v898_v11, %v898_v11 }
 0x15c   :  { %v924_v9 = vadd.f32 %v909_v54, %v908_v4  ;;  %v901_v23 = vsub.f32 %v1935_v8, %v1970_v3  ;;  %v915_v24 = vmul.f32 %v899_v14, %v899_v14  ;;  %v902_v27 = vsub.f32 %v1943_v16, %v1970_v3 }
 0x15d   :  { %v916_v29 = vmul.f32 %v900_v21, %v900_v21  ;;  %v903_v31 = vsub.f32 %v1950_v28, %v1970_v3  ;;  %v904_v5 = vsub.f32 %v1957_v38, %v1970_v3  ;;  %v905_v37 = vsub.f32 %v1960_v42, %v1970_v3 }
 0x15e   :  { %v925_v59 = vadd.f32 %v924_v9, %v910_v7  ;;  %v917_v32 = vmul.f32 %v901_v23, %v901_v23  ;;  %v918_v35 = vmul.f32 %v902_v27, %v902_v27  ;;  %v906_v18 = vsub.f32 %v1963_v60, %v1970_v3 }
 0x15f   :  { %v919_v39 = vmul.f32 %v903_v31, %v903_v31  ;;  %v920_v45 = vmul.f32 %v904_v5, %v904_v5  ;;  %v907_v48 = vsub.f32 %v1966_v46, %v1970_v3  ;;  %v921_v49 = vmul.f32 %v905_v37, %v905_v37 }
 0x160   :  { %v926_v0 = vadd.f32 %v925_v59, %v911_v57  ;;  %v922_v62 = vmul.f32 %v906_v18, %v906_v18  ;;  %v954_v9 = vlaneseq  ;;  %v948_v57 = vld [vmem:[%s2053_s2] sm:$0x1] }
 0x161   :  { %v923_v52 = vmul.f32 %v907_v48, %v907_v48 }
 0x162   :  { %v927_v19 = vadd.f32 %v926_v0, %v912_v12  ;;  %v955_v10 = vshrl.u32 %v954_v9, 7  ;;  %v950_v0 = vld [vmem:[%s2054_s3] sm:$0x1] }
 0x164   :  { %v928_v22 = vadd.f32 %v927_v19, %v913_v17  ;;  %v956_v59 = vsub.s32 0, %v955_v10 }
 0x166   :  { %v929_v25 = vadd.f32 %v928_v22, %v914_v15 }
 0x168   :  { %v930_v30 = vadd.f32 %v929_v25, %v915_v24 }
 0x16a   :  { %v931_v34 = vadd.f32 %v930_v30, %v916_v29 }
 0x16c   :  { %v932_v36 = vadd.f32 %v931_v34, %v917_v32 }
 0x16e   :  { %v933_v41 = vadd.f32 %v932_v36, %v918_v35 }
 0x170   :  { %v934_v47 = vadd.f32 %v933_v41, %v919_v39 }
 0x172   :  { %v935_v51 = vadd.f32 %v934_v47, %v920_v45 }
 0x174   :  { %v936_v50 = vadd.f32 %v935_v51, %v921_v49 }
 0x176   :  { %v937_v63 = vadd.f32 %v936_v50, %v922_v62 }
 0x178   :  { %v938_v1 = vadd.f32 %v937_v63, %v923_v52 }
 0x17a   :  { %v939_v43 = vrot.slane %v938_v1, 4 }
 0x17c   :  { %v940_v53 = vadd.f32 %v939_v43, %v938_v1 }
 0x17e   :  { %v941_v55 = vrot.slane %v940_v53, 2 }
 0x180   :  { %v942_v4 = vadd.f32 %v941_v55, %v940_v53 }
 0x182   :  { %v943_v54 = vrot.slane %v942_v4, 1 }
 0x184   :  { %v944_v56 = vadd.f32 %v943_v54, %v942_v4 }
 0x186   :  { %v945_v6 = vmul.f32 0.0078125, %v944_v56 }
 0x188   :  { %v946_v7 = vadd.f32 1e-05, %v945_v6 }
 0x18a   :  { %1524 = vrsqrt.f32 %v946_v7 }
 0x197   :  { %v1525_v11 = vpop.eup %1524 }
 0x198   :  { %v949_v12 = vmul.f32 %v1525_v11, %v948_v57 }
 0x19a   :  { %v951_v14 = vmul.f32 %v949_v12, %v1970_v3  ;;  %v957_v17 = vrot.slane %v949_v12, %v956_v59 }
 0x19c   :  { %v952_v19 = vsub.f32 %v950_v0, %v951_v14  ;;  %v959_v21 = vmul.f32 %v957_v17, %v1879_v58  ;;  %v960_v15 = vmul.f32 %v957_v17, %v1881_v13  ;;  %v961_v22 = vmul.f32 %v957_v17, %v1885_v20 }
 0x19d   :  { %v962_v23 = vmul.f32 %v957_v17, %v1893_v26  ;;  %v963_v24 = vmul.f32 %v957_v17, %v1900_v33  ;;  %v964_v25 = vmul.f32 %v957_v17, %v1908_v40  ;;  %v965_v27 = vmul.f32 %v957_v17, %v1914_v44 }
 0x19e   :  { %v966_v29 = vmul.f32 %v957_v17, %v1921_v61  ;;  %v967_v3 = vmul.f32 %v957_v17, %v1928_v2  ;;  %v968_v30 = vmul.f32 %v957_v17, %v1935_v8  ;;  %v969_v58 = vmul.f32 %v957_v17, %v1943_v16 }
 0x19f   :  { %v970_v13 = vmul.f32 %v957_v17, %v1950_v28  ;;  %v979_v31 = vrot.slane %v952_v19, %v956_v59  ;;  %v971_v20 = vmul.f32 %v957_v17, %v1957_v38  ;;  %v972_v26 = vmul.f32 %v957_v17, %v1960_v42 }
 0x1a0   :  { %v973_v33 = vmul.f32 %v957_v17, %v1963_v60  ;;  %v974_v40 = vmul.f32 %v957_v17, %v1966_v46 }
 0x1a1   :  { %v981_v44 = vadd.f32 %v979_v31, %v959_v21  ;;  %v982_v32 = vadd.f32 %v979_v31, %v960_v15  ;;  %v983_v61 = vadd.f32 %v979_v31, %v961_v22  ;;  %v984_v34 = vadd.f32 %v979_v31, %v962_v23 }
 0x1a2   :  { %v985_v2 = vadd.f32 %v979_v31, %v963_v24  ;;  %v986_v5 = vadd.f32 %v979_v31, %v964_v25  ;;  %v987_v8 = vadd.f32 %v979_v31, %v965_v27  ;;  %v988_v35 = vadd.f32 %v979_v31, %v966_v29 }
 0x1a3   :  { %v989_v16 = vadd.f32 %v979_v31, %v967_v3  ;;  %v990_v36 = vadd.f32 %v979_v31, %v968_v30  ;;  %v991_v28 = vadd.f32 %v979_v31, %v969_v58  ;;  %v992_v37 = vadd.f32 %v979_v31, %v970_v13 }
 0x1a4   :  { %v993_v39 = vadd.f32 %v979_v31, %v971_v20  ;;  %v994_v38 = vadd.f32 %v979_v31, %v972_v26  ;;  %v995_v41 = vadd.f32 %v979_v31, %v973_v33  ;;  %v996_v42 = vadd.f32 %v979_v31, %v974_v40 }
 0x1a5   :  { %v997_v18 = vmax.f32 %v981_v44, 0.0  ;;  %v998_v60 = vmax.f32 %v982_v32, 0.0  ;;  %v999_v45 = vmax.f32 %v983_v61, 0.0  ;;  %v1000_v46 = vmax.f32 %v984_v34, 0.0 }
 0x1a6   :  { %v1001_v47 = vmax.f32 %v985_v2, 0.0  ;;  %v1002_v48 = vmax.f32 %v986_v5, 0.0  ;;  %v1003_v49 = vmax.f32 %v987_v8, 0.0  ;;  %v1004_v51 = vmax.f32 %v988_v35, 0.0 }
 0x1a7   :  { %v1005_v62 = vmax.f32 %v989_v16, 0.0  ;;  %v1006_v50 = vmax.f32 %v990_v36, 0.0  ;;  %v1007_v52 = vmax.f32 %v991_v28, 0.0  ;;  %v1008_v63 = vmax.f32 %v992_v37, 0.0 }
 0x1a8   :  { %v1009_v1 = vmax.f32 %v993_v39, 0.0  ;;  %v1010_v43 = vmax.f32 %v994_v38, 0.0  ;;  %v1011_v53 = vmax.f32 %v995_v41, 0.0  ;;  %v1012_v55 = vmax.f32 %v996_v42, 0.0 }
 0x1a9   :  { %v1216_v4 = vpack.c.bf16 %v998_v60, %v997_v18  ;;  %v1221_v54 = vpack.c.bf16 %v1000_v46, %v999_v45  ;;  %v1226_v56 = vpack.c.bf16 %v1002_v48, %v1001_v47  ;;  %v1231_v6 = vpack.c.bf16 %v1004_v51, %v1003_v49 }
 0x1aa   :  { %v1236_v7 = vpack.c.bf16 %v1006_v50, %v1005_v62  ;;  %v1241_v9 = vpack.c.bf16 %v1008_v63, %v1007_v52  ;;  %v1246_v10 = vpack.c.bf16 %v1010_v43, %v1009_v1  ;;  %v1251_v57 = vpack.c.bf16 %v1012_v55, %v1011_v53 }
 0x1ab   :  { %1217 = vst [vmem:[%s2055_s4] sm:$0xff] %v1216_v4   ;;  %1253 = vst [vmem:[%s2055_s4 + $0x8] sm:$0xff] %v1221_v54  }
 0x1ac   :  { %1254 = vst [vmem:[%s2055_s4 + $0x10] sm:$0xff] %v1226_v56   ;;  %1255 = vst [vmem:[%s2055_s4 + $0x18] sm:$0xff] %v1231_v6  }
 0x1ad   :  { %1256 = vst [vmem:[%s2055_s4 + $0x20] sm:$0xff] %v1236_v7   ;;  %1257 = vst [vmem:[%s2055_s4 + $0x28] sm:$0xff] %v1241_v9  }
 0x1ae   :  { %1258 = vst [vmem:[%s2055_s4 + $0x30] sm:$0xff] %v1246_v10   ;;  %1259 = vst [vmem:[%s2055_s4 + $0x38] sm:$0xff] %v1251_v57  }

// kernel: conv2d_ae_forward.11
= control target key start
LH: loop header
LB: loop body
LE: loop exit
PB: predicated region body
PF: predicated region fallthrough
CT: control target
= control target key end

     0   :  { %v3636_v0 = vmov 0   ;;  %vm770_vm0 = vcmask 261120   ;;  %s4986_s1 = inlined_call_operand.vmem [shape: bf16[288,128], index: 1, kind: input, shape index: {}]   ;;  %s4987_s0 = inlined_call_operand.vmem [shape: bf16[512,288], index: 0, kind: input, shape index: {}]   ;;  %s4988_s2 = inlined_call_operand.vmem [shape: f32[1,128], index: 2, kind: input, shape index: {}]   ;;  %s4989_s3 = inlined_call_operand.vmem [shape: f32[1,128], index: 3, kind: input, shape index: {}]   ;;  %s4990_s4 = inlined_call_operand.vmem [shape: bf16[512,128], index: 4, kind: output, shape index: {}]  }
   0x1   :  { %867 = vmatprep.subr.bf16.mxu0 %v3636_v0  ;;  %3199 = vmatprep.subr.bf16.mxu1 %v3636_v0  ;;  %v3232_v1 = vld [vmem:[%s4986_s1 + $0x38] sm:$0xff]   ;;  %v3233_v2 = vld [vmem:[%s4986_s1 + $0x30] sm:$0xff]   ;;  %v3234_v3 = vld [vmem:[%s4986_s1 + $0x28] sm:$0xff]  }
   0x2   :  { %868 = vmatpush1.bf16.msra.mxu0 %v3232_v1  ;;  %3215 = vmatpush1.bf16.msra.mxu1 %v3232_v1  ;;  %v3235_v4 = vld [vmem:[%s4986_s1 + $0x20] sm:$0xff]   ;;  %v3236_v5 = vld [vmem:[%s4986_s1 + $0x18] sm:$0xff]   ;;  %v3237_v7 = vld [vmem:[%s4986_s1 + $0x10] sm:$0xff]  }
   0x3   :  { %869 = vmatprep.subr.bf16.mxu0 %v3636_v0  ;;  %3200 = vmatprep.subr.bf16.mxu1 %v3636_v0  ;;  %v3250_v6 = vld [vmem:[%s4987_s0 + $0x4] ss:$12 sps:$4 sm:$0xff]   ;;  %v3238_v9 = vld [vmem:[%s4986_s1 + $0x8] sm:$0xff]   ;;  %v3240_v11 = vld [vmem:[%s4986_s1 + $0x78] sm:$0xff]  }
   0x4   :  { %v3253_v8 = vld [vmem:[%s4987_s0 + $0x244] ss:$12 sps:$4 sm:$0xff]   ;;  %899 = vmatprep.mubr.bf16.mxu0 %v3250_v6  ;;  %v3242_v13 = vld [vmem:[%s4986_s1 + $0x68] sm:$0xff]   ;;  %v3244_v15 = vld [vmem:[%s4986_s1 + $0x58] sm:$0xff]  }
   0x5   :  { %1091 = vmatprep.mubr.bf16.mxu1 %v3253_v8  ;;  %v3239_v10 = vld [vmem:[%s4986_s1] sm:$0xff]   ;;  %v3241_v12 = vld [vmem:[%s4986_s1 + $0x70] sm:$0xff]   ;;  %v3246_v17 = vld [vmem:[%s4986_s1 + $0x48] sm:$0xff]  }
   0x6   :  { %870 = vmatpush1.bf16.msra.mxu0 %v3233_v2  ;;  %3216 = vmatpush1.bf16.msra.mxu1 %v3233_v2  ;;  %v3243_v14 = vld [vmem:[%s4986_s1 + $0x60] sm:$0xff]   ;;  %v3245_v16 = vld [vmem:[%s4986_s1 + $0x50] sm:$0xff]   ;;  %v3272_v19 = vld [vmem:[%s4986_s1 + $0x88] sm:$0xff]  }
   0x7   :  { %871 = vmatprep.subr.bf16.mxu0 %v3636_v0  ;;  %3201 = vmatprep.subr.bf16.mxu1 %v3636_v0  ;;  %v3247_v18 = vld [vmem:[%s4986_s1 + $0x40] sm:$0xff]   ;;  %v3254_v22 = vld [vmem:[%s4987_s0 + $0x1c] ss:$12 sps:$4 sm:$0xff]   ;;  %v3266_v31 = vld [vmem:[%s4987_s0 + $0x4c] ss:$12 sps:$4 sm:$0xff]  }
   0x8   :  { %v3248_v20 = vld [vmem:[%s4987_s0] ss:$12 sps:$4 sm:$0xff]   ;;  %v3256_v23 = vld [vmem:[%s4987_s0 + $0x25c] ss:$12 sps:$4 sm:$0xff]   ;;  %v3258_v25 = vld [vmem:[%s4987_s0 + $0x18] ss:$12 sps:$4 sm:$0xff]  }
   0x9   :  { %v3251_v21 = vld [vmem:[%s4987_s0 + $0x240] ss:$12 sps:$4 sm:$0xff]   ;;  %v3259_v26 = vld [vmem:[%s4987_s0 + $0x258] ss:$12 sps:$4 sm:$0xff]   ;;  %v3264_v29 = vld [vmem:[%s4987_s0 + $0x30] ss:$12 sps:$4 sm:$0xff]  }
   0xa   :  { %872 = vmatpush1.bf16.msra.mxu0 %v3234_v3  ;;  %3217 = vmatpush1.bf16.msra.mxu1 %v3234_v3  ;;  %v3297_v24 = vld [vmem:[%s4986_s1 + $0x80] sm:$0xff]   ;;  %v3265_v30 = vld [vmem:[%s4987_s0 + $0x270] ss:$12 sps:$4 sm:$0xff]   ;;  %v3268_v32 = vld [vmem:[%s4987_s0 + $0x28c] ss:$12 sps:$4 sm:$0xff]  }
   0xb   :  { %873 = vmatprep.subr.bf16.mxu0 %v3636_v0  ;;  %3202 = vmatprep.subr.bf16.mxu1 %v3636_v0  ;;  %v3260_v27 = vld [vmem:[%s4987_s0 + $0x34] ss:$12 sps:$4 sm:$0xff]   ;;  %v3273_v35 = vld [vmem:[%s4987_s0 + $0x64] ss:$12 sps:$4 sm:$0xff]   ;;  %v3279_v39 = vld [vmem:[%s4987_s0 + $0x7c] ss:$12 sps:$4 sm:$0xff]  }
   0xc   :  { %v3262_v28 = vld [vmem:[%s4987_s0 + $0x274] ss:$12 sps:$4 sm:$0xff]   ;;  %v3275_v36 = vld [vmem:[%s4987_s0 + $0x2a4] ss:$12 sps:$4 sm:$0xff]   ;;  %v3281_v40 = vld [vmem:[%s4987_s0 + $0x2bc] ss:$12 sps:$4 sm:$0xff]  }
   0xd   :  { %v3270_v33 = vld [vmem:[%s4987_s0 + $0x48] ss:$12 sps:$4 sm:$0xff]   ;;  %v3277_v37 = vld [vmem:[%s4987_s0 + $0x60] ss:$12 sps:$4 sm:$0xff]   ;;  %v3283_v41 = vld [vmem:[%s4987_s0 + $0x78] ss:$12 sps:$4 sm:$0xff]  }
   0xe   :  { %874 = vmatpush1.bf16.msra.mxu0 %v3235_v4  ;;  %3218 = vmatpush1.bf16.msra.mxu1 %v3235_v4  ;;  %v3271_v34 = vld [vmem:[%s4987_s0 + $0x288] ss:$12 sps:$4 sm:$0xff]   ;;  %v3278_v38 = vld [vmem:[%s4987_s0 + $0x2a0] ss:$12 sps:$4 sm:$0xff]   ;;  %v3284_v42 = vld [vmem:[%s4987_s0 + $0x2b8] ss:$12 sps:$4 sm:$0xff]  }
   0xf   :  { %875 = vmatprep.subr.bf16.mxu0 %v3636_v0  ;;  %3203 = vmatprep.subr.bf16.mxu1 %v3636_v0  ;;  %v3285_v43 = vld [vmem:[%s4987_s0 + $0x94] ss:$12 sps:$4 sm:$0xff]   ;;  %v3289_v45 = vld [vmem:[%s4987_s0 + $0x90] ss:$12 sps:$4 sm:$0xff]   ;;  %v3291_v47 = vld [vmem:[%s4987_s0 + $0xac] ss:$12 sps:$4 sm:$0xff]  }
  0x10   :  { %v3287_v44 = vld [vmem:[%s4987_s0 + $0x2d4] ss:$12 sps:$4 sm:$0xff]   ;;  %v3290_v46 = vld [vmem:[%s4987_s0 + $0x2d0] ss:$12 sps:$4 sm:$0xff]   ;;  %v3293_v48 = vld [vmem:[%s4987_s0 + $0x2ec] ss:$12 sps:$4 sm:$0xff]  }
  0x11   :  { %v3295_v49 = vld [vmem:[%s4987_s0 + $0xa8] ss:$12 sps:$4 sm:$0xff]   ;;  %v3298_v51 = vld [vmem:[%s4987_s0 + $0xc4] ss:$12 sps:$4 sm:$0xff]   ;;  %v3301_v53 = vld [vmem:[%s4987_s0 + $0xc0] ss:$12 sps:$4 sm:$0xff]  }
  0x12   :  { %876 = vmatpush1.bf16.msra.mxu0 %v3236_v5  ;;  %3219 = vmatpush1.bf16.msra.mxu1 %v3236_v5  ;;  %v3296_v50 = vld [vmem:[%s4987_s0 + $0x2e8] ss:$12 sps:$4 sm:$0xff]   ;;  %v3302_v54 = vld [vmem:[%s4987_s0 + $0x20] ss:$12 sps:$4 sm:$0xff]   ;;  %v3305_v56 = vld [vmem:[%s4987_s0 + $0x38] ss:$12 sps:$4 sm:$0xff]  }
  0x13   :  { %877 = vmatprep.subr.bf16.mxu0 %v3636_v0  ;;  %3204 = vmatprep.subr.bf16.mxu1 %v3636_v0  ;;  %v3300_v52 = vld [vmem:[%s4987_s0 + $0x8] ss:$12 sps:$4 sm:$0xff]   ;;  %v3306_v57 = vld [vmem:[%s4987_s0 + $0xd8] ss:$12 sps:$4 sm:$0xff]   ;;  %v3307_v58 = vld [vmem:[%s4987_s0 + $0x50] ss:$12 sps:$4 sm:$0xff]  }
  0x14   :  { %v3303_v55 = vld [vmem:[%s4987_s0 + $0xdc] ss:$12 sps:$4 sm:$0xff]   ;;  %v3308_v59 = vld [vmem:[%s4987_s0 + $0xf4] ss:$12 sps:$4 sm:$0xff]   ;;  %v3313_v63 = vld [vmem:[%s4987_s0 + $0x10c] ss:$12 sps:$4 sm:$0xff]  }
  0x15   :  { %v3310_v60 = vld [vmem:[%s4987_s0 + $0x68] ss:$12 sps:$4 sm:$0xff]   ;;  %v3311_v61 = vld [vmem:[%s4987_s0 + $0xf0] ss:$12 sps:$4 sm:$0xff]   ;;  %v3312_v62 = vld [vmem:[%s4987_s0 + $0x80] ss:$12 sps:$4 sm:$0xff]  }
  0x16   :  { %878 = vmatpush1.bf16.msra.mxu0 %v3237_v7  ;;  %3220 = vmatpush1.bf16.msra.mxu1 %v3237_v7  ;;  %v3316_v1 = vld [vmem:[%s4987_s0 + $0x108] ss:$12 sps:$4 sm:$0xff]   ;;  %v3317_v2 = vld [vmem:[%s4987_s0 + $0xb0] ss:$12 sps:$4 sm:$0xff]   ;;  %v3321_v5 = vld [vmem:[%s4987_s0 + $0x120] ss:$12 sps:$4 sm:$0xff]  }
  0x17   :  { %879 = vmatprep.subr.bf16.mxu0 %v3636_v0  ;;  %3205 = vmatprep.subr.bf16.mxu1 %v3636_v0  ;;  %v3318_v3 = vld [vmem:[%s4987_s0 + $0x124] ss:$12 sps:$4 sm:$0xff]   ;;  %v3320_v4 = vld [vmem:[%s4987_s0 + $0xc8] ss:$12 sps:$4 sm:$0xff]   ;;  %v3322_v6 = vld [vmem:[%s4987_s0 + $0xe0] ss:$12 sps:$4 sm:$0xff]  }
  0x18   :  { %v3323_v7 = vld [vmem:[%s4987_s0 + $0x13c] ss:$12 sps:$4 sm:$0xff]   ;;  %v3325_v8 = vld [vmem:[%s4987_s0 + $0xf8] ss:$12 sps:$4 sm:$0xff]  }
  0x1a   :  { %880 = vmatpush1.bf16.msra.mxu0 %v3238_v9  ;;  %3221 = vmatpush1.bf16.msra.mxu1 %v3238_v9  ;;  %v3326_v9 = vld [vmem:[%s4987_s0 + $0x138] ss:$12 sps:$4 sm:$0xff]  }
  0x1b   :  { %881 = vmatprep.subr.bf16.mxu0 %v3636_v0  ;;  %3206 = vmatprep.subr.bf16.mxu1 %v3636_v0 }
  0x1e   :  { %882 = vmatpush1.bf16.msra.mxu0 %v3239_v10  ;;  %3222 = vmatpush1.bf16.msra.mxu1 %v3239_v10  ;;  %v3327_v10 = vld [vmem:[%s4987_s0 + $0x110] ss:$12 sps:$4 sm:$0xff]  }
  0x1f   :  { %883 = vmatprep.subr.bf16.mxu0 %v3636_v0  ;;  %3207 = vmatprep.subr.bf16.mxu1 %v3636_v0 }
  0x22   :  { %884 = vmatpush2.bf16.msra.mxu0 %v3240_v11  ;;  %3223 = vmatpush2.bf16.msra.mxu1 %v3240_v11  ;;  %v3328_v11 = vld [vmem:[%s4987_s0 + $0x154] ss:$12 sps:$4 sm:$0xff]  }
  0x23   :  { %885 = vmatprep.subr.bf16.mxu0 %v3636_v0  ;;  %3208 = vmatprep.subr.bf16.mxu1 %v3636_v0 }
  0x26   :  { %886 = vmatpush2.bf16.msra.mxu0 %v3241_v12  ;;  %3224 = vmatpush2.bf16.msra.mxu1 %v3241_v12  ;;  %v3330_v12 = vld [vmem:[%s4987_s0 + $0x128] ss:$12 sps:$4 sm:$0xff]  }
  0x27   :  { %887 = vmatprep.subr.bf16.mxu0 %v3636_v0  ;;  %3209 = vmatprep.subr.bf16.mxu1 %v3636_v0 }
  0x2a   :  { %888 = vmatpush2.bf16.msra.mxu0 %v3242_v13  ;;  %3225 = vmatpush2.bf16.msra.mxu1 %v3242_v13  ;;  %v3331_v13 = vld [vmem:[%s4987_s0 + $0x150] ss:$12 sps:$4 sm:$0xff]  }
  0x2b   :  { %889 = vmatprep.subr.bf16.mxu0 %v3636_v0  ;;  %3210 = vmatprep.subr.bf16.mxu1 %v3636_v0 }
  0x2e   :  { %890 = vmatpush2.bf16.msra.mxu0 %v3243_v14  ;;  %3226 = vmatpush2.bf16.msra.mxu1 %v3243_v14  ;;  %v3332_v14 = vld [vmem:[%s4987_s0 + $0x140] ss:$12 sps:$4 sm:$0xff]  }
  0x2f   :  { %891 = vmatprep.subr.bf16.mxu0 %v3636_v0  ;;  %3211 = vmatprep.subr.bf16.mxu1 %v3636_v0 }
  0x32   :  { %892 = vmatpush2.bf16.msra.mxu0 %v3244_v15  ;;  %3227 = vmatpush2.bf16.msra.mxu1 %v3244_v15  ;;  %v3333_v15 = vld [vmem:[%s4987_s0 + $0x16c] ss:$12 sps:$4 sm:$0xff]  }
  0x33   :  { %893 = vmatprep.subr.bf16.mxu0 %v3636_v0  ;;  %3212 = vmatprep.subr.bf16.mxu1 %v3636_v0 }
  0x36   :  { %894 = vmatpush2.bf16.msra.mxu0 %v3245_v16  ;;  %3228 = vmatpush2.bf16.msra.mxu1 %v3245_v16  ;;  %v3335_v16 = vld [vmem:[%s4987_s0 + $0x158] ss:$12 sps:$4 sm:$0xff]  }
  0x37   :  { %895 = vmatprep.subr.bf16.mxu0 %v3636_v0  ;;  %3213 = vmatprep.subr.bf16.mxu1 %v3636_v0 }
  0x3a   :  { %896 = vmatpush2.bf16.msra.mxu0 %v3246_v17  ;;  %3229 = vmatpush2.bf16.msra.mxu1 %v3246_v17  ;;  %v3336_v17 = vld [vmem:[%s4987_s0 + $0x168] ss:$12 sps:$4 sm:$0xff]  }
  0x3b   :  { %897 = vmatprep.subr.bf16.mxu0 %v3636_v0  ;;  %3214 = vmatprep.subr.bf16.mxu1 %v3636_v0  ;;  %v3315_v0 = vld [vmem:[%s4987_s0 + $0x98] ss:$12 sps:$4 sm:$0xff]  }
  0x3e   :  { %898 = vmatpush2.bf16.msra.mxu0 %v3247_v18  ;;  %3230 = vmatpush2.bf16.msra.mxu1 %v3247_v18  ;;  %v3337_v18 = vld [vmem:[%s4987_s0 + $0x170] ss:$12 sps:$4 sm:$0xff]  }
  0x3f   :  { %3131 = vmatprep.subr.bf16.mxu1 %v3272_v19 }
  0x41   :  { %900 = vmatmul.mubr.bf16.vlgmr.msra.gmra.mxu0 %v3248_v20  ;;  %1092 = vmatmul.mubr.bf16.vlgmr.msra.gmra.mxu1 %v3251_v21  ;;  %v3340_v20 = vld [vmem:[%s4987_s0 + $0x188] ss:$12 sps:$4 sm:$0xff]   ;;  %v3341_v21 = vld [vmem:[%s4987_s0 + $0x180] ss:$12 sps:$4 sm:$0xff]  }
  0x42   :  { %907 = vmatprep.mubr.bf16.mxu0 %v3254_v22  ;;  %1099 = vmatprep.mubr.bf16.mxu1 %v3256_v23  ;;  %v3342_v22 = vld [vmem:[%s4987_s0 + $0x1a0] ss:$12 sps:$4 sm:$0xff]   ;;  %v3343_v23 = vld [vmem:[%s4987_s0 + $0x19c] ss:$12 sps:$4 sm:$0xff]  }
  0x43   :  { %3132 = vmatpush3.bf16.msra.mxu1 %v3272_v19  ;;  %v3338_v19 = vld [vmem:[%s4987_s0 + $0x184] ss:$12 sps:$4 sm:$0xff]  }
  0x44   :  { %3133 = vmatprep.subr.bf16.mxu1 %v3297_v24 }
  0x47   :  { %3134 = vmatpush3.bf16.msra.mxu1 %v3297_v24  ;;  %v3345_v24 = vld [vmem:[%s4987_s0 + $0x1b8] ss:$12 sps:$4 sm:$0xff]  }
  0x49   :  { %908 = vmatmul.mubr.bf16.gmra.mxu0 %v3258_v25  ;;  %1100 = vmatmul.mubr.bf16.gmra.mxu1 %v3259_v26  ;;  %v3346_v25 = vld [vmem:[%s4987_s0 + $0x198] ss:$12 sps:$4 sm:$0xff]   ;;  %v3347_v26 = vld [vmem:[%s4987_s0 + $0x1d0] ss:$12 sps:$4 sm:$0xff]  }
  0x4a   :  { %915 = vmatprep.mubr.bf16.mxu0 %v3260_v27  ;;  %1107 = vmatprep.mubr.bf16.mxu1 %v3262_v28  ;;  %v3348_v27 = vld [vmem:[%s4987_s0 + $0x1b4] ss:$12 sps:$4 sm:$0xff]  }
  0x4b   :  { %v3350_v28 = vld [vmem:[%s4987_s0 + $0x1e8] ss:$12 sps:$4 sm:$0xff]  }
  0x51   :  { %916 = vmatmul.mubr.bf16.gmra.mxu0 %v3264_v29  ;;  %1108 = vmatmul.mubr.bf16.gmra.mxu1 %v3265_v30  ;;  %v3351_v29 = vld [vmem:[%s4987_s0 + $0x1b0] ss:$12 sps:$4 sm:$0xff]   ;;  %v3352_v30 = vld [vmem:[%s4987_s0 + $0x200] ss:$12 sps:$4 sm:$0xff]  }
  0x52   :  { %923 = vmatprep.mubr.bf16.mxu0 %v3266_v31  ;;  %1115 = vmatprep.mubr.bf16.mxu1 %v3268_v32  ;;  %v3353_v31 = vld [vmem:[%s4987_s0 + $0x1cc] ss:$12 sps:$4 sm:$0xff]  }
  0x53   :  { %v3355_v32 = vld [vmem:[%s4987_s0 + $0x218] ss:$12 sps:$4 sm:$0xff]  }
  0x59   :  { %924 = vmatmul.mubr.bf16.gmra.mxu0 %v3270_v33  ;;  %1116 = vmatmul.mubr.bf16.gmra.mxu1 %v3271_v34  ;;  %v3356_v33 = vld [vmem:[%s4987_s0 + $0x1c8] ss:$12 sps:$4 sm:$0xff]   ;;  %v3357_v34 = vld [vmem:[%s4987_s0 + $0x230] ss:$12 sps:$4 sm:$0xff]  }
  0x5a   :  { %931 = vmatprep.mubr.bf16.mxu0 %v3273_v35  ;;  %1123 = vmatprep.mubr.bf16.mxu1 %v3275_v36  ;;  %v3358_v35 = vld [vmem:[%s4987_s0 + $0x1e4] ss:$12 sps:$4 sm:$0xff]   ;;  %v3360_v36 = vld [vmem:[%s4987_s0 + $0x248] ss:$12 sps:$4 sm:$0xff]  }
  0x61   :  { %932 = vmatmul.mubr.bf16.gmra.mxu0 %v3277_v37  ;;  %1124 = vmatmul.mubr.bf16.gmra.mxu1 %v3278_v38  ;;  %v3361_v37 = vld [vmem:[%s4987_s0 + $0x1e0] ss:$12 sps:$4 sm:$0xff]  }
  0x62   :  { %939 = vmatprep.mubr.bf16.mxu0 %v3279_v39  ;;  %1131 = vmatprep.mubr.bf16.mxu1 %v3281_v40  ;;  %v3362_v38 = vld [vmem:[%s4987_s0 + $0x260] ss:$12 sps:$4 sm:$0xff]   ;;  %v3363_v39 = vld [vmem:[%s4987_s0 + $0x1fc] ss:$12 sps:$4 sm:$0xff]   ;;  %v3365_v40 = vld [vmem:[%s4987_s0 + $0x278] ss:$12 sps:$4 sm:$0xff]  }
  0x69   :  { %940 = vmatmul.mubr.bf16.gmra.mxu0 %v3283_v41  ;;  %1132 = vmatmul.mubr.bf16.gmra.mxu1 %v3284_v42  ;;  %v3366_v41 = vld [vmem:[%s4987_s0 + $0x1f8] ss:$12 sps:$4 sm:$0xff]   ;;  %v3367_v42 = vld [vmem:[%s4987_s0 + $0x290] ss:$12 sps:$4 sm:$0xff]  }
  0x6a   :  { %947 = vmatprep.mubr.bf16.mxu0 %v3285_v43  ;;  %1139 = vmatprep.mubr.bf16.mxu1 %v3287_v44  ;;  %v3368_v43 = vld [vmem:[%s4987_s0 + $0x214] ss:$12 sps:$4 sm:$0xff]  }
  0x6b   :  { %v3370_v44 = vld [vmem:[%s4987_s0 + $0x2a8] ss:$12 sps:$4 sm:$0xff]  }
  0x71   :  { %948 = vmatmul.mubr.bf16.gmra.mxu0 %v3289_v45  ;;  %1140 = vmatmul.mubr.bf16.gmra.mxu1 %v3290_v46  ;;  %v3371_v45 = vld [vmem:[%s4987_s0 + $0x210] ss:$12 sps:$4 sm:$0xff]   ;;  %v3372_v46 = vld [vmem:[%s4987_s0 + $0x2c0] ss:$12 sps:$4 sm:$0xff]  }
  0x72   :  { %955 = vmatprep.mubr.bf16.mxu0 %v3291_v47  ;;  %1147 = vmatprep.mubr.bf16.mxu1 %v3293_v48  ;;  %v3373_v47 = vld [vmem:[%s4987_s0 + $0x22c] ss:$12 sps:$4 sm:$0xff]  }
  0x73   :  { %v3375_v48 = vld [vmem:[%s4987_s0 + $0x2d8] ss:$12 sps:$4 sm:$0xff]  }
  0x79   :  { %956 = vmatmul.mubr.bf16.gmra.mxu0 %v3295_v49  ;;  %1148 = vmatmul.mubr.bf16.gmra.mxu1 %v3296_v50  ;;  %v3376_v49 = vld [vmem:[%s4987_s0 + $0x228] ss:$12 sps:$4 sm:$0xff]   ;;  %v3377_v50 = vld [vmem:[%s4987_s0 + $0x2f0] ss:$12 sps:$4 sm:$0xff]  }
  0x7a   :  { %963 = vmatprep.mubr.bf16.mxu0 %v3298_v51  ;;  %3135 = vmatprep.mubr.msk.bf16.mxu1 %vm770_vm0, %v3300_v52 }
  0x81   :  { %964 = vmatmul.mubr.bf16.gmra.mxu0 %v3301_v53  ;;  %3136 = vmatmul.mubr.msk.bf16.vlgmr.msra.gmra.mxu1 %vm770_vm0, %v3302_v54 }
  0x82   :  { %971 = vmatprep.mubr.bf16.mxu0 %v3303_v55  ;;  %3139 = vmatprep.mubr.msk.bf16.mxu1 %vm770_vm0, %v3305_v56 }
  0x89   :  { %972 = vmatmul.mubr.bf16.gmra.mxu0 %v3306_v57  ;;  %3140 = vmatmul.mubr.msk.bf16.gmra.mxu1 %vm770_vm0, %v3307_v58 }
  0x8a   :  { %979 = vmatprep.mubr.bf16.mxu0 %v3308_v59  ;;  %3143 = vmatprep.mubr.msk.bf16.mxu1 %vm770_vm0, %v3310_v60 }
  0x91   :  { %980 = vmatmul.mubr.bf16.gmra.mxu0 %v3311_v61  ;;  %3144 = vmatmul.mubr.msk.bf16.gmra.mxu1 %vm770_vm0, %v3312_v62 }
  0x92   :  { %987 = vmatprep.mubr.bf16.mxu0 %v3313_v63  ;;  %3147 = vmatprep.mubr.msk.bf16.mxu1 %vm770_vm0, %v3315_v0 }
  0x99   :  { %988 = vmatmul.mubr.bf16.gmra.mxu0 %v3316_v1  ;;  %3148 = vmatmul.mubr.msk.bf16.gmra.mxu1 %vm770_vm0, %v3317_v2 }
  0x9a   :  { %995 = vmatprep.mubr.bf16.mxu0 %v3318_v3  ;;  %3151 = vmatprep.mubr.msk.bf16.mxu1 %vm770_vm0, %v3320_v4 }
  0xa1   :  { %996 = vmatmul.mubr.bf16.gmra.mxu0 %v3321_v5  ;;  %3152 = vmatmul.mubr.msk.bf16.gmra.mxu1 %vm770_vm0, %v3322_v6 }
  0xa2   :  { %1003 = vmatprep.mubr.bf16.mxu0 %v3323_v7  ;;  %3155 = vmatprep.mubr.msk.bf16.mxu1 %vm770_vm0, %v3325_v8 }
  0xa9   :  { %1004 = vmatmul.mubr.bf16.gmra.mxu0 %v3326_v9  ;;  %3156 = vmatmul.mubr.msk.bf16.gmra.mxu1 %vm770_vm0, %v3327_v10 }
  0xaa   :  { %1011 = vmatprep.mubr.bf16.mxu0 %v3328_v11  ;;  %3159 = vmatprep.mubr.msk.bf16.mxu1 %vm770_vm0, %v3330_v12 }
  0xb1   :  { %1012 = vmatmul.mubr.bf16.gmra.mxu0 %v3331_v13  ;;  %3160 = vmatmul.mubr.msk.bf16.gmra.mxu1 %vm770_vm0, %v3332_v14 }
  0xb2   :  { %1019 = vmatprep.mubr.bf16.mxu0 %v3333_v15  ;;  %3163 = vmatprep.mubr.msk.bf16.mxu1 %vm770_vm0, %v3335_v16 }
  0xb9   :  { %1020 = vmatmul.mubr.bf16.gmra.mxu0 %v3336_v17  ;;  %3164 = vmatmul.mubr.msk.bf16.gmra.mxu1 %vm770_vm0, %v3337_v18 }
  0xba   :  { %1027 = vmatprep.mubr.bf16.mxu0 %v3338_v19  ;;  %3167 = vmatprep.mubr.msk.bf16.mxu1 %vm770_vm0, %v3340_v20 }
  0xc1   :  { %1028 = vmatmul.mubr.bf16.gmra.mxu0 %v3341_v21  ;;  %3168 = vmatmul.mubr.msk.bf16.gmra.mxu1 %vm770_vm0, %v3342_v22 }
  0xc2   :  { %1035 = vmatprep.mubr.bf16.mxu0 %v3343_v23  ;;  %3171 = vmatprep.mubr.msk.bf16.mxu1 %vm770_vm0, %v3345_v24 }
  0xc9   :  { %1036 = vmatmul.mubr.bf16.gmra.mxu0 %v3346_v25  ;;  %3172 = vmatmul.mubr.msk.bf16.gmra.mxu1 %vm770_vm0, %v3347_v26 }
  0xca   :  { %1043 = vmatprep.mubr.bf16.mxu0 %v3348_v27  ;;  %3175 = vmatprep.mubr.msk.bf16.mxu1 %vm770_vm0, %v3350_v28 }
  0xd1   :  { %1044 = vmatmul.mubr.bf16.gmra.mxu0 %v3351_v29  ;;  %3176 = vmatmul.mubr.msk.bf16.gmra.mxu1 %vm770_vm0, %v3352_v30 }
  0xd2   :  { %1051 = vmatprep.mubr.bf16.mxu0 %v3353_v31  ;;  %3179 = vmatprep.mubr.msk.bf16.mxu1 %vm770_vm0, %v3355_v32 }
  0xd9   :  { %1052 = vmatmul.mubr.bf16.gmra.mxu0 %v3356_v33  ;;  %3180 = vmatmul.mubr.msk.bf16.gmra.mxu1 %vm770_vm0, %v3357_v34 }
  0xda   :  { %1059 = vmatprep.mubr.bf16.mxu0 %v3358_v35  ;;  %3183 = vmatprep.mubr.msk.bf16.mxu1 %vm770_vm0, %v3360_v36 }
  0xe1   :  { %1060 = vmatmul.mubr.bf16.gmra.mxu0 %v3361_v37  ;;  %3184 = vmatmul.mubr.msk.bf16.gmra.mxu1 %vm770_vm0, %v3362_v38 }
  0xe2   :  { %1067 = vmatprep.mubr.bf16.mxu0 %v3363_v39  ;;  %3187 = vmatprep.mubr.msk.bf16.mxu1 %vm770_vm0, %v3365_v40 }
  0xe9   :  { %1068 = vmatmul.mubr.bf16.gmra.mxu0 %v3366_v41  ;;  %3188 = vmatmul.mubr.msk.bf16.gmra.mxu1 %vm770_vm0, %v3367_v42 }
  0xea   :  { %1075 = vmatprep.mubr.bf16.mxu0 %v3368_v43  ;;  %3191 = vmatprep.mubr.msk.bf16.mxu1 %vm770_vm0, %v3370_v44 }
  0xf1   :  { %1076 = vmatmul.mubr.bf16.gmra.mxu0 %v3371_v45  ;;  %3192 = vmatmul.mubr.msk.bf16.gmra.mxu1 %vm770_vm0, %v3372_v46 }
  0xf2   :  { %1083 = vmatprep.mubr.bf16.mxu0 %v3373_v47  ;;  %3195 = vmatprep.mubr.msk.bf16.mxu1 %vm770_vm0, %v3375_v48 }
  0xf9   :  { %1084 = vmatmul.mubr.bf16.gmra.mxu0 %v3376_v49  ;;  %3196 = vmatmul.mubr.msk.bf16.gmra.mxu1 %vm770_vm0, %v3377_v50 }
 0x101   :  { %v4068_v51 = vpop.f32.mrf.mxu0  ;;  %v4070_v52 = vpop.f32.mrf.mxu1 }
 0x103   :  { %v903_v53 = vpop.f32.mrf.mxu0  ;;  %v1095_v54 = vpop.f32.mrf.mxu1 }
 0x105   :  { %v4072_v55 = vpop.f32.mrf.mxu0  ;;  %v4074_v56 = vpop.f32.mrf.mxu1 }
 0x107   :  { %v906_v57 = vpop.f32.mrf.mxu0  ;;  %v1098_v58 = vpop.f32.mrf.mxu1 }
 0x109   :  { %v4076_v59 = vpop.f32.mrf.mxu0  ;;  %v4078_v60 = vpop.f32.mrf.mxu1 }
 0x10b   :  { %v911_v61 = vpop.f32.mrf.mxu0  ;;  %v1103_v62 = vpop.f32.mrf.mxu1 }
 0x10d   :  { %v4080_v63 = vpop.f32.mrf.mxu0  ;;  %v4082_v0 = vpop.f32.mrf.mxu1 }
 0x10f   :  { %v914_v1 = vpop.f32.mrf.mxu0  ;;  %v1106_v2 = vpop.f32.mrf.mxu1 }
 0x111   :  { %v4084_v3 = vpop.f32.mrf.mxu0  ;;  %v4086_v4 = vpop.f32.mrf.mxu1 }
 0x113   :  { %v919_v5 = vpop.f32.mrf.mxu0  ;;  %v1111_v6 = vpop.f32.mrf.mxu1 }
 0x115   :  { %v4088_v7 = vpop.f32.mrf.mxu0  ;;  %v4090_v8 = vpop.f32.mrf.mxu1 }
 0x117   :  { %v922_v9 = vpop.f32.mrf.mxu0  ;;  %v1114_v10 = vpop.f32.mrf.mxu1 }
 0x119   :  { %v4092_v11 = vpop.f32.mrf.mxu0  ;;  %v4094_v12 = vpop.f32.mrf.mxu1 }
 0x11b   :  { %v927_v13 = vpop.f32.mrf.mxu0  ;;  %v1119_v14 = vpop.f32.mrf.mxu1 }
 0x11d   :  { %v4096_v15 = vpop.f32.mrf.mxu0  ;;  %v4098_v16 = vpop.f32.mrf.mxu1 }
 0x11f   :  { %v930_v17 = vpop.f32.mrf.mxu0  ;;  %v1122_v18 = vpop.f32.mrf.mxu1 }
 0x121   :  { %v4100_v19 = vpop.f32.mrf.mxu0  ;;  %v4102_v20 = vpop.f32.mrf.mxu1 }
 0x123   :  { %v935_v21 = vpop.f32.mrf.mxu0  ;;  %v1127_v22 = vpop.f32.mrf.mxu1 }
 0x125   :  { %v4104_v23 = vpop.f32.mrf.mxu0  ;;  %v4106_v24 = vpop.f32.mrf.mxu1 }
 0x127   :  { %v938_v25 = vpop.f32.mrf.mxu0  ;;  %v1130_v26 = vpop.f32.mrf.mxu1 }
 0x129   :  { %v4108_v27 = vpop.f32.mrf.mxu0  ;;  %v4110_v28 = vpop.f32.mrf.mxu1 }
 0x12b   :  { %v943_v29 = vpop.f32.mrf.mxu0  ;;  %v1135_v30 = vpop.f32.mrf.mxu1 }
 0x12d   :  { %v4112_v31 = vpop.f32.mrf.mxu0  ;;  %v4114_v32 = vpop.f32.mrf.mxu1 }
 0x12f   :  { %v946_v33 = vpop.f32.mrf.mxu0  ;;  %v1138_v34 = vpop.f32.mrf.mxu1 }
 0x131   :  { %v4116_v35 = vpop.f32.mrf.mxu0  ;;  %v4118_v36 = vpop.f32.mrf.mxu1 }
 0x133   :  { %v951_v37 = vpop.f32.mrf.mxu0  ;;  %v1143_v38 = vpop.f32.mrf.mxu1 }
 0x135   :  { %v4120_v39 = vpop.f32.mrf.mxu0  ;;  %v4122_v40 = vpop.f32.mrf.mxu1 }
 0x137   :  { %v954_v41 = vpop.f32.mrf.mxu0  ;;  %v1146_v42 = vpop.f32.mrf.mxu1 }
 0x139   :  { %v4124_v43 = vpop.f32.mrf.mxu0  ;;  %v4126_v44 = vpop.f32.mrf.mxu1 }
 0x13b   :  { %v959_v45 = vpop.f32.mrf.mxu0  ;;  %v1151_v46 = vpop.f32.mrf.mxu1 }
 0x13d   :  { %v4128_v47 = vpop.f32.mrf.mxu0  ;;  %v4130_v48 = vpop.f32.mrf.mxu1 }
 0x13f   :  { %v962_v49 = vpop.f32.mrf.mxu0  ;;  %v1154_v50 = vpop.f32.mrf.mxu1 }
 0x141   :  { %v4132_v53 = vpop.f32.mrf.mxu0  ;;  %v3137_v54 = vpop.f32.mrf.mxu1 }
 0x142   :  { %v4145_v13 = vadd.f32 %v3137_v54, %v4076_v59 }
 0x143   :  { %v967_v57 = vpop.f32.mrf.mxu0  ;;  %v1190_v58 = vpop.f32.mrf.mxu1 }
 0x144   :  { %v4137_v5 = vadd.f32 %v1190_v58, %v4068_v51 }
 0x145   :  { %v4134_v61 = vpop.f32.mrf.mxu0  ;;  %v3138_v62 = vpop.f32.mrf.mxu1 }
 0x146   :  { %v4150_v21 = vadd.f32 %v3138_v62, %v4080_v63 }
 0x147   :  { %v970_v1 = vpop.f32.mrf.mxu0  ;;  %v1193_v2 = vpop.f32.mrf.mxu1 }
 0x148   :  { %v4140_v6 = vadd.f32 %v1193_v2, %v4072_v55 }
 0x149   :  { %v4142_v9 = vpop.f32.mrf.mxu0  ;;  %v3141_v10 = vpop.f32.mrf.mxu1 }
 0x14a   :  { %v1445_v14 = vadd.f32 %v4140_v6, %v4137_v5  ;;  %v4162_v63 = vadd.f32 %v3141_v10, %v4092_v11 }
 0x14b   :  { %v975_v17 = vpop.f32.mrf.mxu0  ;;  %v1206_v18 = vpop.f32.mrf.mxu1 }
 0x14c   :  { %v1446_v51 = vadd.f32 %v1445_v14, %v4145_v13  ;;  %v4155_v26 = vadd.f32 %v1206_v18, %v4084_v3 }
 0x14d   :  { %v976_v22 = vpop.f32.mrf.mxu0  ;;  %v3142_v25 = vpop.f32.mrf.mxu1 }
 0x14e   :  { %v1447_v55 = vadd.f32 %v1446_v51, %v4150_v21  ;;  %v4166_v45 = vadd.f32 %v3142_v25, %v4096_v15 }
 0x14f   :  { %v978_v29 = vpop.f32.mrf.mxu0  ;;  %v1209_v59 = vpop.f32.mrf.mxu1 }
 0x150   :  { %v1448_v30 = vadd.f32 %v1447_v55, %v4155_v26  ;;  %v4159_v33 = vadd.f32 %v1209_v59, %v4088_v7 }
 0x151   :  { %v981_v34 = vpop.f32.mrf.mxu0  ;;  %v3145_v37 = vpop.f32.mrf.mxu1 }
 0x152   :  { %v1449_v38 = vadd.f32 %v1448_v30, %v4159_v33  ;;  %v4178_v15 = vadd.f32 %v3145_v37, %v4108_v27 }
 0x153   :  { %v983_v41 = vpop.f32.mrf.mxu0  ;;  %v1222_v42 = vpop.f32.mrf.mxu1 }
 0x154   :  { %v1450_v3 = vadd.f32 %v1449_v38, %v4162_v63  ;;  %v4170_v50 = vadd.f32 %v1222_v42, %v4100_v19 }
 0x155   :  { %v984_v46 = vpop.f32.mrf.mxu0  ;;  %v3146_v49 = vpop.f32.mrf.mxu1 }
 0x156   :  { %v1451_v7 = vadd.f32 %v1450_v3, %v4166_v45  ;;  %v4182_v19 = vadd.f32 %v3146_v49, %v4112_v31 }
 0x157   :  { %v986_v54 = vpop.f32.mrf.mxu0  ;;  %v1225_v57 = vpop.f32.mrf.mxu1 }
 0x158   :  { %v1452_v11 = vadd.f32 %v1451_v7, %v4170_v50  ;;  %v4175_v58 = vadd.f32 %v1225_v57, %v4104_v23  ;;  %5041 = vst [vmem:[#allocation2_spill] sm:$0xff] %v4182_v19 }
 0x159   :  { %v989_v62 = vpop.f32.mrf.mxu0  ;;  %v3149_v1 = vpop.f32.mrf.mxu1 }
 0x15a   :  { %v1453_v2 = vadd.f32 %v1452_v11, %v4175_v58  ;;  %v4194_v31 = vadd.f32 %v3149_v1, %v4124_v43 }
 0x15b   :  { %v991_v10 = vpop.f32.mrf.mxu0  ;;  %v1238_v14 = vpop.f32.mrf.mxu1 }
 0x15c   :  { %v1454_v17 = vadd.f32 %v1453_v2, %v4178_v15  ;;  %v4186_v25 = vadd.f32 %v1238_v14, %v4116_v35  ;;  %5044 = vst [vmem:[#allocation5_spill] sm:$0xff] %v4194_v31 }
 0x15d   :  { %v992_v18 = vpop.f32.mrf.mxu0  ;;  %v3150_v51 = vpop.f32.mrf.mxu1 }
 0x15e   :  { %5042 = vst [vmem:[#allocation3_spill] sm:$0xff] %v4186_v25  ;;  %v1455_v23 = vadd.f32 %v1454_v17, %v4182_v19  ;;  %v4198_v35 = vadd.f32 %v3150_v51, %v4128_v47 }
 0x15f   :  { %v994_v55 = vpop.f32.mrf.mxu0  ;;  %v1241_v29 = vpop.f32.mrf.mxu1 }
 0x160   :  { %v1456_v27 = vadd.f32 %v1455_v23, %v4186_v25  ;;  %v4191_v59 = vadd.f32 %v1241_v29, %v4120_v39  ;;  %5045 = vst [vmem:[#allocation6_spill] sm:$0xff] %v4198_v35 }
 0x161   :  { %v997_v30 = vpop.f32.mrf.mxu0  ;;  %v3153_v37 = vpop.f32.mrf.mxu1 }
 0x162   :  { %5043 = vst [vmem:[#allocation4_spill] sm:$0xff] %v4191_v59  ;;  %v1457_v38 = vadd.f32 %v1456_v27, %v4191_v59  ;;  %v4210_v47 = vadd.f32 %v3153_v37, %v4142_v9 }
 0x163   :  { %v999_v41 = vpop.f32.mrf.mxu0  ;;  %v1254_v42 = vpop.f32.mrf.mxu1 }
 0x164   :  { %v1458_v3 = vadd.f32 %v1457_v38, %v4194_v31  ;;  %v4202_v54 = vadd.f32 %v1254_v42, %v4132_v53  ;;  %5048 = vst [vmem:[#allocation9_spill] sm:$0xff] %v4210_v47 }
 0x165   :  { %v1000_v49 = vpop.f32.mrf.mxu0  ;;  %v3154_v7 = vpop.f32.mrf.mxu1 }
 0x166   :  { %5046 = vst [vmem:[#allocation7_spill] sm:$0xff] %v4202_v54  ;;  %v1459_v39 = vadd.f32 %v1458_v3, %v4198_v35  ;;  %v4213_v53 = vadd.f32 %v3154_v7, %v976_v22 }
 0x167   :  { %v1002_v57 = vpop.f32.mrf.mxu0  ;;  %v1257_v11 = vpop.f32.mrf.mxu1 }
 0x168   :  { %v1460_v43 = vadd.f32 %v1459_v39, %v4202_v54  ;;  %v4207_v1 = vadd.f32 %v1257_v11, %v4134_v61  ;;  %5049 = vst [vmem:[#allocation10_spill] sm:$0xff] %v4213_v53 }
 0x169   :  { %v1005_v2 = vpop.f32.mrf.mxu0  ;;  %v3157_v10 = vpop.f32.mrf.mxu1 }
 0x16a   :  { %5047 = vst [vmem:[#allocation8_spill] sm:$0xff] %v4207_v1  ;;  %v1461_v14 = vadd.f32 %v1460_v43, %v4207_v1  ;;  %v4223_v57 = vadd.f32 %v3157_v10, %v989_v62 }
 0x16b   :  { %v1007_v17 = vpop.f32.mrf.mxu0  ;;  %v1270_v51 = vpop.f32.mrf.mxu1 }
 0x16c   :  { %v1462_v23 = vadd.f32 %v1461_v14, %v4210_v47  ;;  %v4216_v27 = vadd.f32 %v1270_v51, %v981_v34  ;;  %5052 = vst [vmem:[#allocation13_spill] sm:$0xff] %v4223_v57 }
 0x16d   :  { %v1008_v55 = vpop.f32.mrf.mxu0  ;;  %v3158_v29 = vpop.f32.mrf.mxu1 }
 0x16e   :  { %5050 = vst [vmem:[#allocation11_spill] sm:$0xff] %v4216_v27  ;;  %v1463_v61 = vadd.f32 %v1462_v23, %v4213_v53  ;;  %v4226_v51 = vadd.f32 %v3158_v29, %v992_v18 }
 0x16f   :  { %v1010_v38 = vpop.f32.mrf.mxu0  ;;  %v1273_v41 = vpop.f32.mrf.mxu1 }
 0x170   :  { %v1464_v42 = vadd.f32 %v1463_v61, %v4216_v27  ;;  %v4220_v9 = vadd.f32 %v1273_v41, %v984_v46  ;;  %5053 = vst [vmem:[#allocation14_spill] sm:$0xff] %v4226_v51 }
 0x171   :  { %v1013_v37 = vpop.f32.mrf.mxu0  ;;  %v3161_v3 = vpop.f32.mrf.mxu1 }
 0x172   :  { %5051 = vst [vmem:[#allocation12_spill] sm:$0xff] %v4220_v9  ;;  %v1465_v39 = vadd.f32 %v1464_v42, %v4220_v9  ;;  %v4235_v47 = vadd.f32 %v3161_v3, %v1005_v2 }
 0x173   :  { %v1015_v22 = vpop.f32.mrf.mxu0  ;;  %v1286_v7 = vpop.f32.mrf.mxu1 }
 0x174   :  { %v1466_v34 = vadd.f32 %v1465_v39, %v4223_v57  ;;  %v4229_v27 = vadd.f32 %v1286_v7, %v997_v30  ;;  %5056 = vst [vmem:[#allocation17_spill] sm:$0xff] %v4235_v47 }
 0x175   :  { %v1016_v11 = vpop.f32.mrf.mxu0  ;;  %v3162_v43 = vpop.f32.mrf.mxu1 }
 0x176   :  { %v1467_v46 = vadd.f32 %v1466_v34, %v4226_v51  ;;  %5054 = vst [vmem:[#allocation15_spill] sm:$0xff] %v4229_v27  ;;  %v4238_v1 = vadd.f32 %v3162_v43, %v1008_v55 }
 0x177   :  { %v1018_v14 = vpop.f32.mrf.mxu0  ;;  %v1289_v17 = vpop.f32.mrf.mxu1 }
 0x178   :  { %v1468_v62 = vadd.f32 %v1467_v46, %v4229_v27  ;;  %v4232_v10 = vadd.f32 %v1289_v17, %v1000_v49  ;;  %5057 = vst [vmem:[#allocation18_spill] sm:$0xff] %v4238_v1 }
 0x179   :  { %v1021_v23 = vpop.f32.mrf.mxu0  ;;  %v3165_v61 = vpop.f32.mrf.mxu1 }
 0x17a   :  { %5055 = vst [vmem:[#allocation16_spill] sm:$0xff] %v4232_v10  ;;  %v1469_v18 = vadd.f32 %v1468_v62, %v4232_v10  ;;  %v4247_v31 = vadd.f32 %v3165_v61, %v1021_v23 }
 0x17b   :  { %v1023_v38 = vpop.f32.mrf.mxu0  ;;  %v1302_v41 = vpop.f32.mrf.mxu1 }
 0x17c   :  { %v1470_v30 = vadd.f32 %v1469_v18, %v4235_v47  ;;  %v4241_v54 = vadd.f32 %v1302_v41, %v1013_v37  ;;  %5060 = vst [vmem:[#allocation21_spill] sm:$0xff] %v4247_v31 }
 0x17d   :  { %v1024_v42 = vpop.f32.mrf.mxu0  ;;  %v3166_v22 = vpop.f32.mrf.mxu1 }
 0x17e   :  { %5058 = vst [vmem:[#allocation19_spill] sm:$0xff] %v4241_v54  ;;  %v4250_v59 = vadd.f32 %v3166_v22, %v1024_v42 }
 0x17f   :  { %v1026_v9 = vpop.f32.mrf.mxu0  ;;  %v1305_v39 = vpop.f32.mrf.mxu1 }
 0x180   :  { %v1471_v9 = vadd.f32 %v1470_v30, %v4238_v1  ;;  %v4244_v3 = vadd.f32 %v1305_v39, %v1016_v11  ;;  %5061 = vst [vmem:[#allocation22_spill] sm:$0xff] %v4250_v59 }
 0x181   :  { %v1029_v14 = vpop.f32.mrf.mxu0  ;;  %v3169_v57 = vpop.f32.mrf.mxu1 }
 0x182   :  { %v1472_v2 = vadd.f32 %v1471_v9, %v4241_v54  ;;  %5059 = vst [vmem:[#allocation20_spill] sm:$0xff] %v4244_v3 }
 0x183   :  { %v1031_v29 = vpop.f32.mrf.mxu0  ;;  %v1318_v53 = vpop.f32.mrf.mxu1 }
 0x184   :  { %v1473_v55 = vadd.f32 %v1472_v2, %v4244_v3  ;;  %v4253_v25 = vadd.f32 %v1318_v53, %v1029_v14 }
 0x185   :  { %v1032_v34 = vpop.f32.mrf.mxu0  ;;  %v3170_v38 = vpop.f32.mrf.mxu1 }
 0x186   :  { %v1474_v37 = vadd.f32 %v1473_v55, %v4247_v31  ;;  %5062 = vst [vmem:[#allocation23_spill] sm:$0xff] %v4253_v25 }
 0x187   :  { %v1034_v7 = vpop.f32.mrf.mxu0  ;;  %v1321_v51 = vpop.f32.mrf.mxu1 }
 0x188   :  { %v4256_v61 = vadd.f32 %v1321_v51, %v1032_v34 }
 0x189   :  { %v1037_v49 = vpop.f32.mrf.mxu0  ;;  %v3173_v17 = vpop.f32.mrf.mxu1 }
 0x18a   :  { %v4259_v22 = vadd.f32 %v3169_v57, %v1037_v49 }
 0x18b   :  { %v1039_v46 = vpop.f32.mrf.mxu0  ;;  %v1334_v27 = vpop.f32.mrf.mxu1 }
 0x18d   :  { %v1040_v62 = vpop.f32.mrf.mxu0  ;;  %v3174_v29 = vpop.f32.mrf.mxu1 }
 0x18f   :  { %v1042_v10 = vpop.f32.mrf.mxu0  ;;  %v1337_v18 = vpop.f32.mrf.mxu1 }
 0x190   :  { %v1475_v10 = vadd.f32 %v1474_v37, %v4250_v59 }
 0x191   :  { %v1045_v7 = vpop.f32.mrf.mxu0  ;;  %v3177_v47 = vpop.f32.mrf.mxu1 }
 0x192   :  { %v1476_v23 = vadd.f32 %v1475_v10, %v4253_v25  ;;  %v4264_v59 = vadd.f32 %v1334_v27, %v1045_v7 }
 0x193   :  { %v1047_v43 = vpop.f32.mrf.mxu0  ;;  %v1350_v35 = vpop.f32.mrf.mxu1 }
 0x194   :  { %v1477_v42 = vadd.f32 %v1476_v23, %v4256_v61 }
 0x195   :  { %v1048_v30 = vpop.f32.mrf.mxu0  ;;  %v3178_v46 = vpop.f32.mrf.mxu1 }
 0x196   :  { %v1478_v14 = vadd.f32 %v1477_v42, %v4259_v22 }
 0x197   :  { %v1050_v41 = vpop.f32.mrf.mxu0  ;;  %v1353_v1 = vpop.f32.mrf.mxu1 }
 0x199   :  { %v1053_v11 = vpop.f32.mrf.mxu0  ;;  %v3181_v39 = vpop.f32.mrf.mxu1 }
 0x19a   :  { %v4270_v57 = vadd.f32 %v3173_v17, %v1053_v11 }
 0x19b   :  { %v1055_v9 = vpop.f32.mrf.mxu0  ;;  %v1366_v54 = vpop.f32.mrf.mxu1 }
 0x19c   :  { %v4261_v9 = vadd.f32 %v3170_v38, %v1040_v62 }
 0x19d   :  { %v1056_v2 = vpop.f32.mrf.mxu0  ;;  %v3182_v43 = vpop.f32.mrf.mxu1 }
 0x19e   :  { %v1479_v34 = vadd.f32 %v1478_v14, %v4261_v9  ;;  %v4273_v62 = vadd.f32 %v3174_v29, %v1056_v2 }
 0x19f   :  { %v1058_v3 = vpop.f32.mrf.mxu0  ;;  %v1369_v55 = vpop.f32.mrf.mxu1 }
 0x1a0   :  { %v4267_v3 = vadd.f32 %v1337_v18, %v1048_v30  ;;  %v1480_v23 = vadd.f32 %v1479_v34, %v4264_v59 }
 0x1a1   :  { %v1061_v41 = vpop.f32.mrf.mxu0  ;;  %v3185_v31 = vpop.f32.mrf.mxu1 }
 0x1a2   :  { %v1481_v38 = vadd.f32 %v1480_v23, %v4267_v3  ;;  %v4276_v7 = vadd.f32 %v1350_v35, %v1061_v41 }
 0x1a3   :  { %v1063_v19 = vpop.f32.mrf.mxu0  ;;  %v1382_v37 = vpop.f32.mrf.mxu1 }
 0x1a4   :  { %v1482_v27 = vadd.f32 %v1481_v38, %v4270_v57 }
 0x1a5   :  { %v1064_v53 = vpop.f32.mrf.mxu0  ;;  %v3186_v10 = vpop.f32.mrf.mxu1 }
 0x1a6   :  { %v1483_v18 = vadd.f32 %v1482_v27, %v4273_v62  ;;  %v4279_v30 = vadd.f32 %v1353_v1, %v1064_v53 }
 0x1a7   :  { %v1066_v51 = vpop.f32.mrf.mxu0  ;;  %v1385_v19 = vpop.f32.mrf.mxu1 }
 0x1a8   :  { %v1484_v17 = vadd.f32 %v1483_v18, %v4276_v7 }
 0x1a9   :  { %v1069_v25 = vpop.f32.mrf.mxu0  ;;  %v3189_v51 = vpop.f32.mrf.mxu1 }
 0x1aa   :  { %v4282_v11 = vadd.f32 %v3177_v47, %v1069_v25  ;;  %v1485_v29 = vadd.f32 %v1484_v17, %v4279_v30 }
 0x1ab   :  { %v1071_v49 = vpop.f32.mrf.mxu0 }
 0x1ac   :  { %v1398_v49 = vpop.f32.mrf.mxu1  ;;  %v1486_v35 = vadd.f32 %v1485_v29, %v4282_v11 }
 0x1ad   :  { %v1072_v42 = vpop.f32.mrf.mxu0 }
 0x1ae   :  { %v4285_v2 = vadd.f32 %v3178_v46, %v1072_v42 }
 0x1af   :  { %v1074_v14 = vpop.f32.mrf.mxu0 }
 0x1b0   :  { %v3190_v14 = vpop.f32.mrf.mxu1  ;;  %v1487_v1 = vadd.f32 %v1486_v35, %v4285_v2  ;;  %v4301_v35 = vadd.f32 %v1382_v37, %v4070_v52  ;;  %v4317_v37 = vadd.f32 %v1398_v49, %v4086_v4 }
 0x1b1   :  { %v1077_v34 = vpop.f32.mrf.mxu0 }
 0x1b2   :  { %v4288_v41 = vadd.f32 %v1366_v54, %v1077_v34 }
 0x1b3   :  { %v1079_v23 = vpop.f32.mrf.mxu0 }
 0x1b4   :  { %v1488_v25 = vadd.f32 %v1487_v1, %v4288_v41  ;;  %v1401_v23 = vpop.f32.mrf.mxu1 }
 0x1b5   :  { %v1080_v38 = vpop.f32.mrf.mxu0 }
 0x1b6   :  { %v4291_v53 = vadd.f32 %v1369_v55, %v1080_v38  ;;  %v3193_v34 = vpop.f32.mrf.mxu1  ;;  %v4305_v38 = vadd.f32 %v1385_v19, %v4074_v56  ;;  %v4321_v19 = vadd.f32 %v1401_v23, %v4090_v8 }
 0x1b7   :  { %v1082_v27 = vpop.f32.mrf.mxu0 }
 0x1b8   :  { %v1489_v46 = vadd.f32 %v1488_v25, %v4291_v53  ;;  %v1414_v1 = vpop.f32.mrf.mxu1 }
 0x1b9   :  { %v1085_v18 = vpop.f32.mrf.mxu0  ;;  %v4333_v49 = vadd.f32 %v1414_v1, %v4102_v20 }
 0x1ba   :  { %v4294_v47 = vadd.f32 %v3181_v39, %v1085_v18  ;;  %v4309_v18 = vadd.f32 %v3185_v31, %v4078_v60  ;;  %v3194_v52 = vpop.f32.mrf.mxu1  ;;  %v4325_v31 = vadd.f32 %v3189_v51, %v4094_v12  ;;  %v4341_v51 = vadd.f32 %v3193_v34, %v4110_v28 }
 0x1bb   :  { %v1087_v17 = vpop.f32.mrf.mxu0 }
 0x1bc   :  { %v1490_v29 = vadd.f32 %v1489_v46, %v4294_v47  ;;  %v1417_v60 = vpop.f32.mrf.mxu1  ;;  %5064 = vst [vmem:[#allocation25_spill] sm:$0xff] %v4341_v51 }
 0x1bd   :  { %v1088_v42 = vpop.f32.mrf.mxu0  ;;  %v4337_v23 = vadd.f32 %v1417_v60, %v4106_v24 }
 0x1be   :  { %v4298_v54 = vadd.f32 %v3182_v43, %v1088_v42  ;;  %v4313_v43 = vadd.f32 %v3186_v10, %v4082_v0  ;;  %v4329_v10 = vadd.f32 %v3190_v14, %v4098_v16  ;;  %v3197_v4 = vpop.f32.mrf.mxu1  ;;  %v4345_v14 = vadd.f32 %v3194_v52, %v4114_v32 }
 0x1bf   :  { %v1090_v27 = vpop.f32.mrf.mxu0  ;;  %5063 = vst [vmem:[#allocation24_spill] sm:$0xff] %v4337_v23  ;;  %v4358_v34 = vadd.f32 %v3197_v4, %v4126_v44 }
 0x1c0   :  { %v1491_v55 = vadd.f32 %v1490_v29, %v4298_v54  ;;  %v1430_v12 = vpop.f32.mrf.mxu1  ;;  %5065 = vst [vmem:[#allocation26_spill] sm:$0xff] %v4345_v14 }
 0x1c1   :  { %5068 = vst [vmem:[#allocation29_spill] sm:$0xff] %v4358_v34 }
 0x1c2   :  { %v1492_v39 = vadd.f32 %v1491_v55, %v4301_v35  ;;  %v3198_v20 = vpop.f32.mrf.mxu1 }
 0x1c4   :  { %v1493_v25 = vadd.f32 %v1492_v39, %v4305_v38  ;;  %v4350_v39 = vadd.f32 %v1430_v12, %v4118_v36  ;;  %v1433_v24 = vpop.f32.mrf.mxu1 }
 0x1c6   :  { %v1494_v17 = vadd.f32 %v1493_v25, %v4309_v18  ;;  %5066 = vst [vmem:[#allocation27_spill] sm:$0xff] %v4350_v39  ;;  %v4354_v25 = vadd.f32 %v1433_v24, %v4122_v40 }
 0x1c8   :  { %v1495_v56 = vadd.f32 %v1494_v17, %v4313_v43  ;;  %5067 = vst [vmem:[#allocation28_spill] sm:$0xff] %v4354_v25  ;;  %v4362_v17 = vadd.f32 %v3198_v20, %v4130_v48 }
 0x1ca   :  { %v1496_v46 = vadd.f32 %v1495_v56, %v4317_v37 }
 0x1cc   :  { %v1497_v0 = vadd.f32 %v1496_v46, %v4321_v19 }
 0x1ce   :  { %v1498_v42 = vadd.f32 %v1497_v0, %v4325_v31 }
 0x1d0   :  { %v1499_v8 = vadd.f32 %v1498_v42, %v4329_v10 }
 0x1d2   :  { %v1500_v29 = vadd.f32 %v1499_v8, %v4333_v49 }
 0x1d4   :  { %v1501_v16 = vadd.f32 %v1500_v29, %v4337_v23 }
 0x1d6   :  { %v1502_v27 = vadd.f32 %v1501_v16, %v4341_v51 }
 0x1d8   :  { %v1503_v55 = vadd.f32 %v1502_v27, %v4345_v14 }
 0x1da   :  { %v1504_v1 = vadd.f32 %v1503_v55, %v4350_v39 }
 0x1dc   :  { %v1505_v28 = vadd.f32 %v1504_v1, %v4354_v25 }
 0x1de   :  { %v1506_v32 = vadd.f32 %v1505_v28, %v4358_v34 }
 0x1e0   :  { %v1507_v52 = vadd.f32 %v1506_v32, %v4362_v17 }
 0x1e2   :  { %v1508_v36 = vrot.slane %v1507_v52, 4 }
 0x1e4   :  { %v1509_v56 = vadd.f32 %v1508_v36, %v1507_v52 }
 0x1e6   :  { %v1510_v46 = vrot.slane %v1509_v56, 2 }
 0x1e8   :  { %v1511_v60 = vadd.f32 %v1510_v46, %v1509_v56 }
 0x1ea   :  { %v1512_v0 = vrot.slane %v1511_v60, 1 }
 0x1ec   :  { %v1513_v42 = vadd.f32 %v1512_v0, %v1511_v60 }
 0x1ee   :  { %v4365_v40 = vmul.f32 0.001953125, %v1513_v42 }
 0x1f0   :  { %v1515_v8 = vsub.f32 %v4137_v5, %v4365_v40  ;;  %v1516_v44 = vsub.f32 %v4140_v6, %v4365_v40  ;;  %v1517_v48 = vsub.f32 %v4145_v13, %v4365_v40  ;;  %v1518_v12 = vsub.f32 %v4150_v21, %v4365_v40 }
 0x1f1   :  { %v1519_v16 = vsub.f32 %v4155_v26, %v4365_v40  ;;  %v1520_v55 = vsub.f32 %v4159_v33, %v4365_v40  ;;  %v1521_v28 = vsub.f32 %v4162_v63, %v4365_v40  ;;  %v1522_v36 = vsub.f32 %v4166_v45, %v4365_v40 }
 0x1f2   :  { %v1579_v4 = vmul.f32 %v1515_v8, %v1515_v8  ;;  %v1580_v29 = vmul.f32 %v1516_v44, %v1516_v44  ;;  %v1581_v27 = vmul.f32 %v1517_v48, %v1517_v48  ;;  %v1582_v24 = vmul.f32 %v1518_v12, %v1518_v12 }
 0x1f3   :  { %v1583_v32 = vmul.f32 %v1519_v16, %v1519_v16  ;;  %v1584_v56 = vmul.f32 %v1520_v55, %v1520_v55  ;;  %v1523_v60 = vsub.f32 %v4170_v50, %v4365_v40  ;;  %v1585_v0 = vmul.f32 %v1521_v28, %v1521_v28  ;;  %v5069_v16 = vld [vmem:[#allocation2_spill] sm:$0xff] }
 0x1f4   :  { %v1643_v20 = vadd.f32 %v1580_v29, %v1579_v4  ;;  %v1524_v8 = vsub.f32 %v4175_v58, %v4365_v40  ;;  %v1586_v44 = vmul.f32 %v1522_v36, %v1522_v36  ;;  %v1525_v4 = vsub.f32 %v4178_v15, %v4365_v40 }
 0x1f5   :  { %v1587_v29 = vmul.f32 %v1523_v60, %v1523_v60 }
 0x1f6   :  { %v1644_v1 = vadd.f32 %v1643_v20, %v1581_v27  ;;  %v1526_v27 = vsub.f32 %v5069_v16, %v4365_v40  ;;  %v1588_v20 = vmul.f32 %v1524_v8, %v1524_v8  ;;  %v1589_v28 = vmul.f32 %v1525_v4, %v1525_v4 }
 0x1f8   :  { %v1645_v52 = vadd.f32 %v1644_v1, %v1582_v24  ;;  %v5070_v24 = vld [vmem:[#allocation3_spill] sm:$0xff]  ;;  %v1590_v36 = vmul.f32 %v1526_v27, %v1526_v27 }
 0x1f9   :  { %v1527_v1 = vsub.f32 %v5070_v24, %v4365_v40 }
 0x1fa   :  { %v1646_v46 = vadd.f32 %v1645_v52, %v1583_v32  ;;  %v5071_v52 = vld [vmem:[#allocation4_spill] sm:$0xff] }
 0x1fb   :  { %v1591_v60 = vmul.f32 %v1527_v1, %v1527_v1 }
 0x1fc   :  { %v1647_v42 = vadd.f32 %v1646_v46, %v1584_v56  ;;  %v1528_v56 = vsub.f32 %v5071_v52, %v4365_v40 }
 0x1fe   :  { %v1648_v48 = vadd.f32 %v1647_v42, %v1585_v0  ;;  %v5072_v0 = vld [vmem:[#allocation5_spill] sm:$0xff]  ;;  %v1592_v8 = vmul.f32 %v1528_v56, %v1528_v56 }
 0x1ff   :  { %v1529_v42 = vsub.f32 %v5072_v0, %v4365_v40 }
 0x200   :  { %v1649_v12 = vadd.f32 %v1648_v48, %v1586_v44  ;;  %v5073_v48 = vld [vmem:[#allocation6_spill] sm:$0xff] }
 0x201   :  { %v1530_v16 = vsub.f32 %v5073_v48, %v4365_v40  ;;  %v1593_v4 = vmul.f32 %v1529_v42, %v1529_v42 }
 0x202   :  { %v1650_v55 = vadd.f32 %v1649_v12, %v1587_v29  ;;  %v5074_v12 = vld [vmem:[#allocation7_spill] sm:$0xff] }
 0x203   :  { %v1531_v24 = vsub.f32 %v5074_v12, %v4365_v40  ;;  %v1594_v27 = vmul.f32 %v1530_v16, %v1530_v16 }
 0x204   :  { %v1651_v32 = vadd.f32 %v1650_v55, %v1588_v20  ;;  %v5075_v55 = vld [vmem:[#allocation8_spill] sm:$0xff] }
 0x205   :  { %v1532_v52 = vsub.f32 %v5075_v55, %v4365_v40  ;;  %v1595_v1 = vmul.f32 %v1531_v24, %v1531_v24 }
 0x206   :  { %v1652_v46 = vadd.f32 %v1651_v32, %v1589_v28  ;;  %v5076_v32 = vld [vmem:[#allocation9_spill] sm:$0xff] }
 0x207   :  { %v1533_v0 = vsub.f32 %v5076_v32, %v4365_v40  ;;  %v1596_v56 = vmul.f32 %v1532_v52, %v1532_v52 }
 0x208   :  { %v1653_v44 = vadd.f32 %v1652_v46, %v1590_v36  ;;  %v5077_v46 = vld [vmem:[#allocation10_spill] sm:$0xff] }
 0x209   :  { %v1534_v48 = vsub.f32 %v5077_v46, %v4365_v40  ;;  %v1597_v42 = vmul.f32 %v1533_v0, %v1533_v0 }
 0x20a   :  { %v1654_v29 = vadd.f32 %v1653_v44, %v1591_v60  ;;  %v5078_v44 = vld [vmem:[#allocation11_spill] sm:$0xff] }
 0x20b   :  { %v1535_v12 = vsub.f32 %v5078_v44, %v4365_v40  ;;  %v1598_v16 = vmul.f32 %v1534_v48, %v1534_v48 }
 0x20c   :  { %v1655_v20 = vadd.f32 %v1654_v29, %v1592_v8  ;;  %v5079_v29 = vld [vmem:[#allocation12_spill] sm:$0xff] }
 0x20d   :  { %v1536_v55 = vsub.f32 %v5079_v29, %v4365_v40  ;;  %v1599_v24 = vmul.f32 %v1535_v12, %v1535_v12 }
 0x20e   :  { %v1656_v28 = vadd.f32 %v1655_v20, %v1593_v4  ;;  %v5080_v20 = vld [vmem:[#allocation13_spill] sm:$0xff] }
 0x20f   :  { %v1537_v32 = vsub.f32 %v5080_v20, %v4365_v40  ;;  %v1600_v52 = vmul.f32 %v1536_v55, %v1536_v55 }
 0x210   :  { %v1657_v36 = vadd.f32 %v1656_v28, %v1594_v27  ;;  %v5081_v28 = vld [vmem:[#allocation14_spill] sm:$0xff] }
 0x211   :  { %v1538_v46 = vsub.f32 %v5081_v28, %v4365_v40  ;;  %v1601_v0 = vmul.f32 %v1537_v32, %v1537_v32 }
 0x212   :  { %v1658_v60 = vadd.f32 %v1657_v36, %v1595_v1  ;;  %v5082_v36 = vld [vmem:[#allocation15_spill] sm:$0xff] }
 0x213   :  { %v1539_v44 = vsub.f32 %v5082_v36, %v4365_v40  ;;  %v1602_v48 = vmul.f32 %v1538_v46, %v1538_v46 }
 0x214   :  { %v1659_v8 = vadd.f32 %v1658_v60, %v1596_v56  ;;  %v5083_v60 = vld [vmem:[#allocation16_spill] sm:$0xff] }
 0x215   :  { %v1540_v29 = vsub.f32 %v5083_v60, %v4365_v40  ;;  %v1603_v12 = vmul.f32 %v1539_v44, %v1539_v44 }
 0x216   :  { %v1660_v4 = vadd.f32 %v1659_v8, %v1597_v42  ;;  %v5084_v8 = vld [vmem:[#allocation17_spill] sm:$0xff] }
 0x217   :  { %v1541_v20 = vsub.f32 %v5084_v8, %v4365_v40  ;;  %v1604_v55 = vmul.f32 %v1540_v29, %v1540_v29 }
 0x218   :  { %v1661_v27 = vadd.f32 %v1660_v4, %v1598_v16  ;;  %v5085_v4 = vld [vmem:[#allocation18_spill] sm:$0xff] }
 0x219   :  { %v1542_v28 = vsub.f32 %v5085_v4, %v4365_v40  ;;  %v1605_v32 = vmul.f32 %v1541_v20, %v1541_v20 }
 0x21a   :  { %v1662_v1 = vadd.f32 %v1661_v27, %v1599_v24  ;;  %v5086_v27 = vld [vmem:[#allocation19_spill] sm:$0xff] }
 0x21b   :  { %v1543_v36 = vsub.f32 %v5086_v27, %v4365_v40  ;;  %v1606_v46 = vmul.f32 %v1542_v28, %v1542_v28 }
 0x21c   :  { %v1663_v56 = vadd.f32 %v1662_v1, %v1600_v52  ;;  %v5087_v1 = vld [vmem:[#allocation20_spill] sm:$0xff] }
 0x21d   :  { %v1544_v60 = vsub.f32 %v5087_v1, %v4365_v40  ;;  %v1607_v44 = vmul.f32 %v1543_v36, %v1543_v36 }
 0x21e   :  { %v1664_v42 = vadd.f32 %v1663_v56, %v1601_v0  ;;  %v5088_v56 = vld [vmem:[#allocation21_spill] sm:$0xff] }
 0x21f   :  { %v1545_v8 = vsub.f32 %v5088_v56, %v4365_v40  ;;  %v1608_v29 = vmul.f32 %v1544_v60, %v1544_v60 }
 0x220   :  { %v1665_v16 = vadd.f32 %v1664_v42, %v1602_v48  ;;  %v5089_v42 = vld [vmem:[#allocation22_spill] sm:$0xff] }
 0x221   :  { %v1546_v4 = vsub.f32 %v5089_v42, %v4365_v40  ;;  %v1609_v20 = vmul.f32 %v1545_v8, %v1545_v8 }
 0x222   :  { %v1666_v24 = vadd.f32 %v1665_v16, %v1603_v12  ;;  %v5090_v16 = vld [vmem:[#allocation23_spill] sm:$0xff] }
 0x223   :  { %v1547_v27 = vsub.f32 %v5090_v16, %v4365_v40  ;;  %v1610_v28 = vmul.f32 %v1546_v4, %v1546_v4 }
 0x224   :  { %v1667_v52 = vadd.f32 %v1666_v24, %v1604_v55  ;;  %v1548_v24 = vsub.f32 %v4256_v61, %v4365_v40 }
 0x225   :  { %v1611_v36 = vmul.f32 %v1547_v27, %v1547_v27 }
 0x226   :  { %v1668_v0 = vadd.f32 %v1667_v52, %v1605_v32  ;;  %v1549_v52 = vsub.f32 %v4259_v22, %v4365_v40  ;;  %v1612_v60 = vmul.f32 %v1548_v24, %v1548_v24 }
 0x228   :  { %v1669_v48 = vadd.f32 %v1668_v0, %v1606_v46  ;;  %v1550_v0 = vsub.f32 %v4261_v9, %v4365_v40  ;;  %v1613_v8 = vmul.f32 %v1549_v52, %v1549_v52 }
 0x22a   :  { %v1670_v12 = vadd.f32 %v1669_v48, %v1607_v44  ;;  %v1551_v48 = vsub.f32 %v4264_v59, %v4365_v40  ;;  %v1614_v4 = vmul.f32 %v1550_v0, %v1550_v0 }
 0x22c   :  { %v1671_v55 = vadd.f32 %v1670_v12, %v1608_v29  ;;  %v1552_v12 = vsub.f32 %v4267_v3, %v4365_v40  ;;  %v1615_v27 = vmul.f32 %v1551_v48, %v1551_v48 }
 0x22e   :  { %v1672_v32 = vadd.f32 %v1671_v55, %v1609_v20  ;;  %v1553_v55 = vsub.f32 %v4270_v57, %v4365_v40  ;;  %v1616_v24 = vmul.f32 %v1552_v12, %v1552_v12 }
 0x230   :  { %v1673_v46 = vadd.f32 %v1672_v32, %v1610_v28  ;;  %v1554_v32 = vsub.f32 %v4273_v62, %v4365_v40  ;;  %v1617_v52 = vmul.f32 %v1553_v55, %v1553_v55 }
 0x232   :  { %v1674_v44 = vadd.f32 %v1673_v46, %v1611_v36  ;;  %v1555_v46 = vsub.f32 %v4276_v7, %v4365_v40  ;;  %v1618_v0 = vmul.f32 %v1554_v32, %v1554_v32 }
 0x234   :  { %v1675_v29 = vadd.f32 %v1674_v44, %v1612_v60  ;;  %v1556_v44 = vsub.f32 %v4279_v30, %v4365_v40  ;;  %v1619_v48 = vmul.f32 %v1555_v46, %v1555_v46 }
 0x236   :  { %v1676_v20 = vadd.f32 %v1675_v29, %v1613_v8  ;;  %v1557_v29 = vsub.f32 %v4282_v11, %v4365_v40  ;;  %v1620_v12 = vmul.f32 %v1556_v44, %v1556_v44 }
 0x238   :  { %v1677_v28 = vadd.f32 %v1676_v20, %v1614_v4  ;;  %v1558_v20 = vsub.f32 %v4285_v2, %v4365_v40  ;;  %v1621_v55 = vmul.f32 %v1557_v29, %v1557_v29 }
 0x23a   :  { %v1678_v36 = vadd.f32 %v1677_v28, %v1615_v27  ;;  %v1559_v28 = vsub.f32 %v4288_v41, %v4365_v40  ;;  %v1622_v32 = vmul.f32 %v1558_v20, %v1558_v20 }
 0x23c   :  { %v1679_v60 = vadd.f32 %v1678_v36, %v1616_v24  ;;  %v1560_v36 = vsub.f32 %v4291_v53, %v4365_v40  ;;  %v1623_v46 = vmul.f32 %v1559_v28, %v1559_v28 }
 0x23e   :  { %v1680_v8 = vadd.f32 %v1679_v60, %v1617_v52  ;;  %v1561_v60 = vsub.f32 %v4294_v47, %v4365_v40  ;;  %v1624_v44 = vmul.f32 %v1560_v36, %v1560_v36 }
 0x240   :  { %v1681_v4 = vadd.f32 %v1680_v8, %v1618_v0  ;;  %v1562_v8 = vsub.f32 %v4298_v54, %v4365_v40  ;;  %v1625_v29 = vmul.f32 %v1561_v60, %v1561_v60 }
 0x242   :  { %v1682_v27 = vadd.f32 %v1681_v4, %v1619_v48  ;;  %v1563_v4 = vsub.f32 %v4301_v35, %v4365_v40  ;;  %v1626_v20 = vmul.f32 %v1562_v8, %v1562_v8 }
 0x244   :  { %v1683_v24 = vadd.f32 %v1682_v27, %v1620_v12  ;;  %v1564_v27 = vsub.f32 %v4305_v38, %v4365_v40  ;;  %v1627_v28 = vmul.f32 %v1563_v4, %v1563_v4 }
 0x246   :  { %v1684_v52 = vadd.f32 %v1683_v24, %v1621_v55  ;;  %v1565_v24 = vsub.f32 %v4309_v18, %v4365_v40  ;;  %v1628_v36 = vmul.f32 %v1564_v27, %v1564_v27 }
 0x248   :  { %v1685_v0 = vadd.f32 %v1684_v52, %v1622_v32  ;;  %v1566_v52 = vsub.f32 %v4313_v43, %v4365_v40  ;;  %v1629_v60 = vmul.f32 %v1565_v24, %v1565_v24 }
 0x24a   :  { %v1686_v48 = vadd.f32 %v1685_v0, %v1623_v46  ;;  %v1567_v0 = vsub.f32 %v4317_v37, %v4365_v40  ;;  %v1630_v8 = vmul.f32 %v1566_v52, %v1566_v52 }
 0x24c   :  { %v1687_v12 = vadd.f32 %v1686_v48, %v1624_v44  ;;  %v1568_v48 = vsub.f32 %v4321_v19, %v4365_v40  ;;  %v1631_v4 = vmul.f32 %v1567_v0, %v1567_v0 }
 0x24e   :  { %v1688_v55 = vadd.f32 %v1687_v12, %v1625_v29  ;;  %v1569_v12 = vsub.f32 %v4325_v31, %v4365_v40  ;;  %v1632_v27 = vmul.f32 %v1568_v48, %v1568_v48 }
 0x250   :  { %v1689_v32 = vadd.f32 %v1688_v55, %v1626_v20  ;;  %v1570_v55 = vsub.f32 %v4329_v10, %v4365_v40  ;;  %v1633_v24 = vmul.f32 %v1569_v12, %v1569_v12 }
 0x252   :  { %v1690_v46 = vadd.f32 %v1689_v32, %v1627_v28  ;;  %v1571_v32 = vsub.f32 %v4333_v49, %v4365_v40  ;;  %v1634_v52 = vmul.f32 %v1570_v55, %v1570_v55 }
 0x254   :  { %v1691_v44 = vadd.f32 %v1690_v46, %v1628_v36  ;;  %v1572_v46 = vsub.f32 %v4337_v23, %v4365_v40  ;;  %v1635_v0 = vmul.f32 %v1571_v32, %v1571_v32 }
 0x256   :  { %v1692_v29 = vadd.f32 %v1691_v44, %v1629_v60  ;;  %v1573_v44 = vsub.f32 %v4341_v51, %v4365_v40  ;;  %v1636_v48 = vmul.f32 %v1572_v46, %v1572_v46 }
 0x258   :  { %v1693_v20 = vadd.f32 %v1692_v29, %v1630_v8  ;;  %v1574_v29 = vsub.f32 %v4345_v14, %v4365_v40  ;;  %v1637_v12 = vmul.f32 %v1573_v44, %v1573_v44 }
 0x25a   :  { %v1694_v28 = vadd.f32 %v1693_v20, %v1631_v4  ;;  %v1575_v20 = vsub.f32 %v4350_v39, %v4365_v40  ;;  %v1638_v55 = vmul.f32 %v1574_v29, %v1574_v29 }
 0x25c   :  { %v1695_v36 = vadd.f32 %v1694_v28, %v1632_v27  ;;  %v1576_v28 = vsub.f32 %v4354_v25, %v4365_v40  ;;  %v1639_v32 = vmul.f32 %v1575_v20, %v1575_v20 }
 0x25e   :  { %v1696_v60 = vadd.f32 %v1695_v36, %v1633_v24  ;;  %v1577_v36 = vsub.f32 %v4358_v34, %v4365_v40  ;;  %v1640_v46 = vmul.f32 %v1576_v28, %v1576_v28  ;;  %v1715_v28 = vld [vmem:[%s4988_s2] sm:$0x1] }
 0x260   :  { %v1697_v8 = vadd.f32 %v1696_v60, %v1634_v52  ;;  %v1578_v60 = vsub.f32 %v4362_v17, %v4365_v40 }
 0x262   :  { %v1698_v4 = vadd.f32 %v1697_v8, %v1635_v0  ;;  %v1641_v8 = vmul.f32 %v1577_v36, %v1577_v36  ;;  %v1642_v39 = vmul.f32 %v1578_v60, %v1578_v60 }
 0x264   :  { %v1699_v27 = vadd.f32 %v1698_v4, %v1636_v48 }
 0x266   :  { %v1700_v24 = vadd.f32 %v1699_v27, %v1637_v12 }
 0x268   :  { %v1701_v52 = vadd.f32 %v1700_v24, %v1638_v55  ;;  %v1721_v55 = vlaneseq }
 0x26a   :  { %v1702_v0 = vadd.f32 %v1701_v52, %v1639_v32  ;;  %v1722_v36 = vshrl.u32 %v1721_v55, 7 }
 0x26c   :  { %v1703_v14 = vadd.f32 %v1702_v0, %v1640_v46 }
 0x26e   :  { %v1704_v44 = vadd.f32 %v1703_v14, %v1641_v8 }
 0x270   :  { %v1705_v48 = vadd.f32 %v1704_v44, %v1642_v39  ;;  %v1717_v39 = vld [vmem:[%s4989_s3] sm:$0x1] }
 0x272   :  { %v1706_v4 = vrot.slane %v1705_v48, 4 }
 0x274   :  { %v1707_v51 = vadd.f32 %v1706_v4, %v1705_v48 }
 0x276   :  { %v1708_v25 = vrot.slane %v1707_v51, 2 }
 0x278   :  { %v1709_v29 = vadd.f32 %v1708_v25, %v1707_v51  ;;  %v1723_v51 = vsub.s32 0, %v1722_v36 }
 0x27a   :  { %v1710_v12 = vrot.slane %v1709_v29, 1 }
 0x27c   :  { %v1711_v27 = vadd.f32 %v1710_v12, %v1709_v29 }
 0x27e   :  { %v1712_v23 = vmul.f32 0.001953125, %v1711_v27 }
 0x280   :  { %v1713_v34 = vadd.f32 1e-05, %v1712_v23 }
 0x282   :  { %3378 = vrsqrt.f32 %v1713_v34 }
 0x28f   :  { %v3379_v20 = vpop.eup %3378 }
 0x290   :  { %v1716_v24 = vmul.f32 %v3379_v20, %v1715_v28 }
 0x292   :  { %v1718_v14 = vmul.f32 %v1716_v24, %v4365_v40  ;;  %v4502_v32 = vrot.slane %v1716_v24, %v1723_v51  ;;  %v5091_v24 = vld [vmem:[#allocation2_spill] sm:$0xff] }
 0x294   :  { %v1719_v25 = vsub.f32 %v1717_v39, %v1718_v14  ;;  %v1726_v34 = vmul.f32 %v4502_v32, %v4137_v5  ;;  %v1727_v52 = vmul.f32 %v4502_v32, %v4140_v6  ;;  %v1728_v60 = vmul.f32 %v4502_v32, %v4145_v13 }
 0x295   :  { %v1729_v40 = vmul.f32 %v4502_v32, %v4150_v21  ;;  %v1730_v46 = vmul.f32 %v4502_v32, %v4155_v26  ;;  %v1731_v5 = vmul.f32 %v4502_v32, %v4159_v33  ;;  %v1732_v13 = vmul.f32 %v4502_v32, %v4162_v63 }
 0x296   :  { %v4504_v23 = vrot.slane %v1719_v25, %v1723_v51  ;;  %v1733_v21 = vmul.f32 %v4502_v32, %v4166_v45  ;;  %v1734_v26 = vmul.f32 %v4502_v32, %v4170_v50  ;;  %v1735_v20 = vmul.f32 %v4502_v32, %v4175_v58  ;;  %v5092_v51 = vld [vmem:[#allocation3_spill] sm:$0xff] }
 0x297   :  { %v1736_v55 = vmul.f32 %v4502_v32, %v4178_v15  ;;  %v1737_v36 = vmul.f32 %v4502_v32, %v5091_v24  ;;  %v1738_v58 = vmul.f32 %v4502_v32, %v5092_v51 }
 0x298   :  { %v1796_v0 = vadd.f32 %v4504_v23, %v1726_v34  ;;  %v1797_v8 = vadd.f32 %v4504_v23, %v1727_v52  ;;  %v1798_v44 = vadd.f32 %v4504_v23, %v1728_v60  ;;  %v1799_v6 = vadd.f32 %v4504_v23, %v1729_v40  ;;  %v5093_v52 = vld [vmem:[#allocation4_spill] sm:$0xff] }
 0x299   :  { %v1800_v48 = vadd.f32 %v4504_v23, %v1730_v46  ;;  %v1801_v4 = vadd.f32 %v4504_v23, %v1731_v5  ;;  %v1802_v29 = vadd.f32 %v4504_v23, %v1732_v13  ;;  %v1803_v63 = vadd.f32 %v4504_v23, %v1733_v21  ;;  %v5094_v46 = vld [vmem:[#allocation5_spill] sm:$0xff]  ;;  %v5095_v5 = vld [vmem:[#allocation6_spill] sm:$0xff]  ;;  %v5096_v21 = vld [vmem:[#allocation7_spill] sm:$0xff] }
 0x29a   :  { %v2714_v12 = vmul.f32 -1.442695, %v1796_v0  ;;  %v2715_v27 = vmul.f32 -1.442695, %v1797_v8  ;;  %v2716_v33 = vmul.f32 -1.442695, %v1798_v44  ;;  %v1804_v45 = vadd.f32 %v4504_v23, %v1734_v26 }
 0x29b   :  { %v2717_v28 = vmul.f32 -1.442695, %v1799_v6  ;;  %v2718_v50 = vmul.f32 -1.442695, %v1800_v48  ;;  %v1805_v14 = vadd.f32 %v4504_v23, %v1735_v20  ;;  %v2719_v39 = vmul.f32 -1.442695, %v1801_v4 }
 0x29c   :  { %3380 = vpow2.f32 %v2714_v12  ;;  %v1806_v25 = vadd.f32 %v4504_v23, %v1736_v55  ;;  %v2720_v34 = vmul.f32 -1.442695, %v1802_v29  ;;  %v1739_v15 = vmul.f32 %v4502_v32, %v5093_v52  ;;  %v5097_v12 = vld [vmem:[#allocation8_spill] sm:$0xff] }
 0x29d   :  { %3382 = vpow2.f32 %v2715_v27  ;;  %v1807_v60 = vadd.f32 %v4504_v23, %v1737_v36  ;;  %v2721_v40 = vmul.f32 -1.442695, %v1803_v63  ;;  %v1740_v0 = vmul.f32 %v4502_v32, %v5094_v46  ;;  %v5098_v63 = vld [vmem:[#allocation9_spill] sm:$0xff] }
 0x29e   :  { %3384 = vpow2.f32 %v2716_v33  ;;  %v1808_v8 = vadd.f32 %v4504_v23, %v1738_v58  ;;  %v2722_v44 = vmul.f32 -1.442695, %v1804_v45  ;;  %v1741_v6 = vmul.f32 %v4502_v32, %v5095_v5  ;;  %v5103_v5 = vld [vmem:[#allocation14_spill] sm:$0xff] }
 0x29f   :  { %3386 = vpow2.f32 %v2717_v28  ;;  %v1809_v13 = vadd.f32 %v4504_v23, %v1739_v15  ;;  %v2723_v48 = vmul.f32 -1.442695, %v1805_v14  ;;  %v1742_v26 = vmul.f32 %v4502_v32, %v5096_v21 }
 0x2a0   :  { %3388 = vpow2.f32 %v2718_v50  ;;  %v1810_v4 = vadd.f32 %v4504_v23, %v1740_v0  ;;  %v2724_v29 = vmul.f32 -1.442695, %v1806_v25  ;;  %v1743_v27 = vmul.f32 %v4502_v32, %v5097_v12  ;;  %v5099_v50 = vld [vmem:[#allocation10_spill] sm:$0xff] }
 0x2a1   :  { %3390 = vpow2.f32 %v2719_v39  ;;  %v1811_v33 = vadd.f32 %v4504_v23, %v1741_v6  ;;  %v2725_v20 = vmul.f32 -1.442695, %v1807_v60  ;;  %v1744_v28 = vmul.f32 %v4502_v32, %v5098_v63  ;;  %v5100_v39 = vld [vmem:[#allocation11_spill] sm:$0xff] }
 0x2a2   :  { %3392 = vpow2.f32 %v2720_v34  ;;  %v1812_v55 = vadd.f32 %v4504_v23, %v1742_v26  ;;  %v2726_v45 = vmul.f32 -1.442695, %v1808_v8  ;;  %v1745_v24 = vmul.f32 %v4502_v32, %v5099_v50  ;;  %v5101_v34 = vld [vmem:[#allocation12_spill] sm:$0xff]  ;;  %v5104_v26 = vld [vmem:[#allocation15_spill] sm:$0xff] }
 0x2a3   :  { %3394 = vpow2.f32 %v2721_v40  ;;  %v1813_v36 = vadd.f32 %v4504_v23, %v1743_v27  ;;  %v2727_v14 = vmul.f32 -1.442695, %v1809_v13  ;;  %v1746_v51 = vmul.f32 %v4502_v32, %v5100_v39  ;;  %v5102_v40 = vld [vmem:[#allocation13_spill] sm:$0xff]  ;;  %v5107_v39 = vld [vmem:[#allocation18_spill] sm:$0xff] }
 0x2a4   :  { %3396 = vpow2.f32 %v2722_v44  ;;  %v1814_v58 = vadd.f32 %v4504_v23, %v1744_v28  ;;  %v2728_v25 = vmul.f32 -1.442695, %v1810_v4  ;;  %v1747_v52 = vmul.f32 %v4502_v32, %v5101_v34 }
 0x2a5   :  { %3398 = vpow2.f32 %v2723_v48  ;;  %v1815_v15 = vadd.f32 %v4504_v23, %v1745_v24  ;;  %v2729_v60 = vmul.f32 -1.442695, %v1811_v33  ;;  %v1748_v46 = vmul.f32 %v4502_v32, %v5102_v40  ;;  %v5105_v33 = vld [vmem:[#allocation16_spill] sm:$0xff] }
 0x2a6   :  { %3400 = vpow2.f32 %v2724_v29  ;;  %v1816_v0 = vadd.f32 %v4504_v23, %v1746_v51  ;;  %v2730_v8 = vmul.f32 -1.442695, %v1812_v55  ;;  %v1749_v6 = vmul.f32 %v4502_v32, %v5103_v5 }
 0x2a7   :  { %3402 = vpow2.f32 %v2725_v20  ;;  %v1817_v13 = vadd.f32 %v4504_v23, %v1747_v52  ;;  %v2731_v48 = vmul.f32 -1.442695, %v1813_v36  ;;  %v1750_v4 = vmul.f32 %v4502_v32, %v5104_v26  ;;  %v5108_v52 = vld [vmem:[#allocation19_spill] sm:$0xff] }
 0x2a8   :  { %3404 = vpow2.f32 %v2726_v45  ;;  %v1818_v29 = vadd.f32 %v4504_v23, %v1748_v46  ;;  %v2732_v12 = vmul.f32 -1.442695, %v1814_v58  ;;  %v1751_v20 = vmul.f32 %v4502_v32, %v5105_v33  ;;  %v5106_v45 = vld [vmem:[#allocation17_spill] sm:$0xff] }
 0x2a9   :  { %v4573_v44 = vpop.eup %3380  ;;  %3406 = vpow2.f32 %v2727_v14  ;;  %v1819_v63 = vadd.f32 %v4504_v23, %v1749_v6  ;;  %v2733_v28 = vmul.f32 -1.442695, %v1815_v15  ;;  %v1752_v50 = vmul.f32 %v4502_v32, %v5106_v45 }
 0x2aa   :  { %v4578_v21 = vpop.eup %3382  ;;  %3408 = vpow2.f32 %v2728_v25  ;;  %v1820_v24 = vadd.f32 %v4504_v23, %v1750_v4  ;;  %v2734_v36 = vmul.f32 -1.442695, %v1816_v0  ;;  %v1753_v51 = vmul.f32 %v4502_v32, %v5107_v39 }
 0x2ab   :  { %v4583_v27 = vpop.eup %3384  ;;  %3410 = vpow2.f32 %v2729_v60  ;;  %v1821_v58 = vadd.f32 %v4504_v23, %v1751_v20  ;;  %v2735_v25 = vmul.f32 -1.442695, %v1817_v13  ;;  %v1754_v15 = vmul.f32 %v4502_v32, %v5108_v52 }
 0x2ac   :  { %v4588_v55 = vpop.eup %3386  ;;  %3412 = vpow2.f32 %v2730_v8  ;;  %v1822_v60 = vadd.f32 %v4504_v23, %v1752_v50  ;;  %v2736_v40 = vmul.f32 -1.442695, %v1818_v29  ;;  %v1755_v0 = vmul.f32 %v4502_v32, %v5087_v1 }
 0x2ad   :  { %v4593_v14 = vpop.eup %3388  ;;  %3414 = vpow2.f32 %v2731_v48  ;;  %v1823_v8 = vadd.f32 %v4504_v23, %v1753_v51  ;;  %v2737_v5 = vmul.f32 -1.442695, %v1819_v63  ;;  %v1756_v13 = vmul.f32 %v4502_v32, %v5088_v56 }
 0x2ae   :  { %v4598_v34 = vpop.eup %3390  ;;  %3416 = vpow2.f32 %v2732_v12  ;;  %v1824_v48 = vadd.f32 %v4504_v23, %v1754_v15  ;;  %v2738_v26 = vmul.f32 -1.442695, %v1820_v24  ;;  %v1757_v29 = vmul.f32 %v4502_v32, %v5089_v42 }
 0x2af   :  { %v4603_v46 = vpop.eup %3392  ;;  %3418 = vpow2.f32 %v2733_v28  ;;  %v1825_v1 = vadd.f32 %v4504_v23, %v1755_v0  ;;  %v2739_v12 = vmul.f32 -1.442695, %v1821_v58  ;;  %v1758_v20 = vmul.f32 %v4502_v32, %v5090_v16 }
 0x2b0   :  { %v4608_v6 = vpop.eup %3394  ;;  %3420 = vpow2.f32 %v2734_v36  ;;  %v1826_v56 = vadd.f32 %v4504_v23, %v1756_v13  ;;  %v2740_v63 = vmul.f32 -1.442695, %v1822_v60  ;;  %v1759_v45 = vmul.f32 %v4502_v32, %v4256_v61 }
 0x2b1   :  { %v4613_v4 = vpop.eup %3396  ;;  %3422 = vpow2.f32 %v2735_v25  ;;  %v1827_v42 = vadd.f32 %v4504_v23, %v1757_v29  ;;  %v2741_v50 = vmul.f32 -1.442695, %v1823_v8  ;;  %v1760_v36 = vmul.f32 %v4502_v32, %v4259_v22 }
 0x2b2   :  { %v4618_v33 = vpop.eup %3398  ;;  %3424 = vpow2.f32 %v2736_v40  ;;  %v1828_v16 = vadd.f32 %v4504_v23, %v1758_v20  ;;  %v2742_v39 = vmul.f32 -1.442695, %v1824_v48  ;;  %v1761_v58 = vmul.f32 %v4502_v32, %v4261_v9 }
 0x2b3   :  { %v4623_v28 = vpop.eup %3400  ;;  %3426 = vpow2.f32 %v2737_v5  ;;  %v1829_v61 = vadd.f32 %v4504_v23, %v1759_v45  ;;  %v2743_v25 = vmul.f32 -1.442695, %v1825_v1  ;;  %v1762_v15 = vmul.f32 %v4502_v32, %v4264_v59 }
 0x2b4   :  { %v4628_v24 = vpop.eup %3402  ;;  %3428 = vpow2.f32 %v2738_v26  ;;  %v1830_v22 = vadd.f32 %v4504_v23, %v1760_v36  ;;  %v2744_v60 = vmul.f32 -1.442695, %v1826_v56  ;;  %v1763_v0 = vmul.f32 %v4502_v32, %v4267_v3 }
 0x2b5   :  { %v4633_v51 = vpop.eup %3404  ;;  %3430 = vpow2.f32 %v2739_v12  ;;  %v1831_v9 = vadd.f32 %v4504_v23, %v1761_v58  ;;  %v2745_v8 = vmul.f32 -1.442695, %v1827_v42  ;;  %v1764_v13 = vmul.f32 %v4502_v32, %v4270_v57 }
 0x2b6   :  { %v4638_v52 = vpop.eup %3406  ;;  %3432 = vpow2.f32 %v2740_v63  ;;  %v1832_v59 = vadd.f32 %v4504_v23, %v1762_v15  ;;  %v2746_v48 = vmul.f32 -1.442695, %v1828_v16  ;;  %v1765_v29 = vmul.f32 %v4502_v32, %v4273_v62 }
 0x2b7   :  { %v4643_v40 = vpop.eup %3408  ;;  %3434 = vpow2.f32 %v2741_v50  ;;  %v1833_v3 = vadd.f32 %v4504_v23, %v1763_v0  ;;  %v2747_v1 = vmul.f32 -1.442695, %v1829_v61  ;;  %v1766_v20 = vmul.f32 %v4502_v32, %v4276_v7 }
 0x2b8   :  { %v4648_v5 = vpop.eup %3410  ;;  %3436 = vpow2.f32 %v2742_v39  ;;  %v1834_v57 = vadd.f32 %v4504_v23, %v1764_v13  ;;  %v2748_v56 = vmul.f32 -1.442695, %v1830_v22  ;;  %v1767_v45 = vmul.f32 %v4502_v32, %v4279_v30 }
 0x2b9   :  { %v4653_v26 = vpop.eup %3412  ;;  %3438 = vpow2.f32 %v2743_v25  ;;  %v1835_v62 = vadd.f32 %v4504_v23, %v1765_v29  ;;  %v2749_v42 = vmul.f32 -1.442695, %v1831_v9  ;;  %v1768_v36 = vmul.f32 %v4502_v32, %v4282_v11 }
 0x2ba   :  { %v4658_v12 = vpop.eup %3414  ;;  %3440 = vpow2.f32 %v2744_v60  ;;  %v1836_v7 = vadd.f32 %v4504_v23, %v1766_v20  ;;  %v2750_v16 = vmul.f32 -1.442695, %v1832_v59  ;;  %v1769_v58 = vmul.f32 %v4502_v32, %v4285_v2 }
 0x2bb   :  { %v4663_v63 = vpop.eup %3416  ;;  %3442 = vpow2.f32 %v2745_v8  ;;  %v1837_v30 = vadd.f32 %v4504_v23, %v1767_v45  ;;  %v2751_v61 = vmul.f32 -1.442695, %v1833_v3  ;;  %v1770_v15 = vmul.f32 %v4502_v32, %v4288_v41 }
 0x2bc   :  { %v4668_v50 = vpop.eup %3418  ;;  %3444 = vpow2.f32 %v2746_v48  ;;  %v1838_v11 = vadd.f32 %v4504_v23, %v1768_v36  ;;  %v2752_v22 = vmul.f32 -1.442695, %v1834_v57  ;;  %v1771_v0 = vmul.f32 %v4502_v32, %v4291_v53 }
 0x2bd   :  { %v4673_v39 = vpop.eup %3420  ;;  %3446 = vpow2.f32 %v2747_v1  ;;  %v1839_v2 = vadd.f32 %v4504_v23, %v1769_v58  ;;  %v2753_v9 = vmul.f32 -1.442695, %v1835_v62  ;;  %v1772_v13 = vmul.f32 %v4502_v32, %v4294_v47 }
 0x2be   :  { %v4678_v25 = vpop.eup %3422  ;;  %3448 = vpow2.f32 %v2748_v56  ;;  %v1840_v41 = vadd.f32 %v4504_v23, %v1770_v15  ;;  %v2754_v59 = vmul.f32 -1.442695, %v1836_v7  ;;  %v1773_v29 = vmul.f32 %v4502_v32, %v4298_v54 }
 0x2bf   :  { %v4683_v60 = vpop.eup %3424  ;;  %3450 = vpow2.f32 %v2749_v42  ;;  %v1841_v53 = vadd.f32 %v4504_v23, %v1771_v0  ;;  %v2755_v3 = vmul.f32 -1.442695, %v1837_v30  ;;  %v1774_v20 = vmul.f32 %v4502_v32, %v4301_v35 }
 0x2c0   :  { %v4688_v8 = vpop.eup %3426  ;;  %3452 = vpow2.f32 %v2750_v16  ;;  %v1842_v47 = vadd.f32 %v4504_v23, %v1772_v13  ;;  %v2756_v57 = vmul.f32 -1.442695, %v1838_v11  ;;  %v1775_v45 = vmul.f32 %v4502_v32, %v4305_v38 }
 0x2c1   :  { %v4693_v48 = vpop.eup %3428  ;;  %3454 = vpow2.f32 %v2751_v61  ;;  %v1843_v54 = vadd.f32 %v4504_v23, %v1773_v29  ;;  %v2757_v62 = vmul.f32 -1.442695, %v1839_v2  ;;  %v1776_v36 = vmul.f32 %v4502_v32, %v4309_v18 }
 0x2c2   :  { %v4698_v1 = vpop.eup %3430  ;;  %3456 = vpow2.f32 %v2752_v22  ;;  %v1844_v35 = vadd.f32 %v4504_v23, %v1774_v20  ;;  %v2758_v7 = vmul.f32 -1.442695, %v1840_v41  ;;  %v1777_v58 = vmul.f32 %v4502_v32, %v4313_v43 }
 0x2c3   :  { %v4703_v56 = vpop.eup %3432  ;;  %3458 = vpow2.f32 %v2753_v9  ;;  %v1845_v38 = vadd.f32 %v4504_v23, %v1775_v45  ;;  %v2759_v30 = vmul.f32 -1.442695, %v1841_v53  ;;  %v1778_v15 = vmul.f32 %v4502_v32, %v4317_v37  ;;  %v5109_v45 = vld [vmem:[#allocation24_spill] sm:$0xff] }
 0x2c4   :  { %v4708_v42 = vpop.eup %3434  ;;  %3460 = vpow2.f32 %v2754_v59  ;;  %v1846_v18 = vadd.f32 %v4504_v23, %v1776_v36  ;;  %v2760_v11 = vmul.f32 -1.442695, %v1842_v47  ;;  %v1779_v0 = vmul.f32 %v4502_v32, %v4321_v19 }
 0x2c5   :  { %v4713_v16 = vpop.eup %3436  ;;  %3462 = vpow2.f32 %v2755_v3  ;;  %v1847_v43 = vadd.f32 %v4504_v23, %v1777_v58  ;;  %v2761_v2 = vmul.f32 -1.442695, %v1843_v54  ;;  %v1780_v13 = vmul.f32 %v4502_v32, %v4325_v31 }
 0x2c6   :  { %v4718_v61 = vpop.eup %3438  ;;  %3464 = vpow2.f32 %v2756_v57  ;;  %v1848_v37 = vadd.f32 %v4504_v23, %v1778_v15  ;;  %v2762_v41 = vmul.f32 -1.442695, %v1844_v35  ;;  %v1781_v29 = vmul.f32 %v4502_v32, %v4329_v10  ;;  %v5110_v35 = vld [vmem:[#allocation25_spill] sm:$0xff] }
 0x2c7   :  { %v4723_v22 = vpop.eup %3440  ;;  %3466 = vpow2.f32 %v2757_v62  ;;  %v1849_v19 = vadd.f32 %v4504_v23, %v1779_v0  ;;  %v2763_v53 = vmul.f32 -1.442695, %v1845_v38  ;;  %v1782_v20 = vmul.f32 %v4502_v32, %v4333_v49 }
 0x2c8   :  { %v4728_v9 = vpop.eup %3442  ;;  %3468 = vpow2.f32 %v2758_v7  ;;  %v1850_v31 = vadd.f32 %v4504_v23, %v1780_v13  ;;  %v2764_v47 = vmul.f32 -1.442695, %v1846_v18  ;;  %v1783_v54 = vmul.f32 %v4502_v32, %v5109_v45 }
 0x2c9   :  { %v4733_v59 = vpop.eup %3444  ;;  %3470 = vpow2.f32 %v2759_v30  ;;  %v1851_v10 = vadd.f32 %v4504_v23, %v1781_v29  ;;  %v2765_v62 = vmul.f32 -1.442695, %v1847_v43  ;;  %v1784_v7 = vmul.f32 %v4502_v32, %v5110_v35  ;;  %v5111_v30 = vld [vmem:[#allocation26_spill] sm:$0xff]  ;;  %v5112_v43 = vld [vmem:[#allocation27_spill] sm:$0xff] }
 0x2ca   :  { %v4738_v3 = vpop.eup %3446  ;;  %3472 = vpow2.f32 %v2760_v11  ;;  %v1852_v49 = vadd.f32 %v4504_v23, %v1782_v20  ;;  %v2766_v58 = vmul.f32 -1.442695, %v1848_v37  ;;  %v1785_v15 = vmul.f32 %v4502_v32, %v5111_v30  ;;  %v5113_v37 = vld [vmem:[#allocation28_spill] sm:$0xff] }
 0x2cb   :  { %v4743_v57 = vpop.eup %3448  ;;  %3474 = vpow2.f32 %v2761_v2  ;;  %v1853_v18 = vadd.f32 %v4504_v23, %v1783_v54  ;;  %v2767_v11 = vmul.f32 -1.442695, %v1849_v19  ;;  %v1786_v2 = vmul.f32 %v4502_v32, %v5112_v43  ;;  %v5114_v19 = vld [vmem:[#allocation29_spill] sm:$0xff] }
 0x2cc   :  { %v4748_v36 = vpop.eup %3450  ;;  %3476 = vpow2.f32 %v2762_v41  ;;  %v1854_v13 = vadd.f32 %v4504_v23, %v1784_v7  ;;  %v2768_v29 = vmul.f32 -1.442695, %v1850_v31  ;;  %v1787_v20 = vmul.f32 %v4502_v32, %v5113_v37 }
 0x2cd   :  { %v4753_v38 = vpop.eup %3452  ;;  %3478 = vpow2.f32 %v2763_v53  ;;  %v1855_v45 = vadd.f32 %v4504_v23, %v1785_v15  ;;  %v2769_v54 = vmul.f32 -1.442695, %v1851_v10  ;;  %v1788_v35 = vmul.f32 %v4502_v32, %v5114_v19 }
 0x2ce   :  { %v4758_v0 = vpop.eup %3454  ;;  %3480 = vpow2.f32 %v2764_v47  ;;  %v1856_v30 = vadd.f32 %v4504_v23, %v1786_v2  ;;  %v2770_v7 = vmul.f32 -1.442695, %v1852_v49  ;;  %v1789_v31 = vmul.f32 %v4502_v32, %v4362_v17 }
 0x2cf   :  { %v4763_v41 = vpop.eup %3456  ;;  %3482 = vpow2.f32 %v2765_v62  ;;  %v1857_v43 = vadd.f32 %v4504_v23, %v1787_v20  ;;  %v2771_v15 = vmul.f32 -1.442695, %v1853_v18  ;;  %v1858_v10 = vadd.f32 %v4504_v23, %v1788_v35 }
 0x2d0   :  { %v4768_v53 = vpop.eup %3458  ;;  %3484 = vpow2.f32 %v2766_v58  ;;  %v2772_v37 = vmul.f32 -1.442695, %v1854_v13  ;;  %v1859_v58 = vadd.f32 %v4504_v23, %v1789_v31  ;;  %v2773_v49 = vmul.f32 -1.442695, %v1855_v45 }
 0x2d1   :  { %v4773_v47 = vpop.eup %3460  ;;  %3486 = vpow2.f32 %v2767_v11  ;;  %v2774_v17 = vmul.f32 -1.442695, %v1856_v30  ;;  %v2775_v18 = vmul.f32 -1.442695, %v1857_v43  ;;  %v2776_v20 = vmul.f32 -1.442695, %v1858_v10 }
 0x2d2   :  { %v4778_v62 = vpop.eup %3462  ;;  %3488 = vpow2.f32 %v2768_v29  ;;  %v2777_v13 = vmul.f32 -1.442695, %v1859_v58  ;;  %v2052_v23 = vadd.f32 1.0, %v4573_v44  ;;  %v2055_v43 = vadd.f32 1.0, %v4588_v55 }
 0x2d3   :  { %v4781_v19 = vpop.eup %3464  ;;  %3490 = vpow2.f32 %v2769_v54  ;;  %v2053_v54 = vadd.f32 1.0, %v4578_v21  ;;  %v2056_v10 = vadd.f32 1.0, %v4593_v14  ;;  %v2058_v58 = vadd.f32 1.0, %v4603_v46 }
 0x2d4   :  { %v4784_v2 = vpop.eup %3466  ;;  %3492 = vpow2.f32 %v2770_v7  ;;  %v2054_v7 = vadd.f32 1.0, %v4583_v27  ;;  %v2060_v14 = vadd.f32 1.0, %v4613_v4  ;;  %v2062_v46 = vadd.f32 1.0, %v4623_v28 }
 0x2d5   :  { %v4786_v32 = vpop.eup %3468  ;;  %3494 = vpow2.f32 %v2771_v15  ;;  %v2064_v4 = vadd.f32 1.0, %v4633_v51  ;;  %v2066_v28 = vadd.f32 1.0, %v4643_v40  ;;  %v2068_v51 = vadd.f32 1.0, %v4653_v26 }
 0x2d6   :  { %v4788_v11 = vpop.eup %3470  ;;  %3496 = vpow2.f32 %v2772_v37  ;;  %v2057_v37 = vadd.f32 1.0, %v4598_v34  ;;  %v2061_v34 = vadd.f32 1.0, %v4618_v33  ;;  %v2065_v33 = vadd.f32 1.0, %v4638_v52 }
 0x2d7   :  { %v4790_v29 = vpop.eup %3472  ;;  %3498 = vpow2.f32 %v2773_v49  ;;  %v2059_v49 = vadd.f32 1.0, %v4608_v6  ;;  %v2063_v6 = vadd.f32 1.0, %v4628_v24  ;;  %v2067_v24 = vadd.f32 1.0, %v4648_v5 }
 0x2d8   :  { %v4792_v35 = vpop.eup %3474  ;;  %3500 = vpow2.f32 %v2774_v17  ;;  %v2073_v26 = vadd.f32 1.0, %v4678_v25 }
 0x2d9   :  { %v4795_v45 = vpop.eup %3476  ;;  %3502 = vpow2.f32 %v2775_v18 }
 0x2da   :  { %v4798_v30 = vpop.eup %3478  ;;  %3504 = vpow2.f32 %v2776_v20 }
 0x2db   :  { %v4801_v31 = vpop.eup %3480  ;;  %3506 = vpow2.f32 %v2777_v13 }
 0x2dc   :  { %v4804_v15 = vpop.eup %3482  ;;  %3508 = vrcp.f32 %v2052_v23 }
 0x2dd   :  { %v4807_v44 = vpop.eup %3484  ;;  %3510 = vrcp.f32 %v2053_v54 }
 0x2de   :  { %v4810_v21 = vpop.eup %3486  ;;  %3512 = vrcp.f32 %v2054_v7 }
 0x2df   :  { %v4813_v27 = vpop.eup %3488  ;;  %3514 = vrcp.f32 %v2055_v43 }
 0x2e0   :  { %v4816_v55 = vpop.eup %3490  ;;  %3516 = vrcp.f32 %v2056_v10 }
 0x2e1   :  { %v4819_v17 = vpop.eup %3492  ;;  %3518 = vrcp.f32 %v2057_v37  ;;  %v2069_v37 = vadd.f32 1.0, %v4658_v12 }
 0x2e2   :  { %v4822_v18 = vpop.eup %3494  ;;  %3520 = vrcp.f32 %v2058_v58  ;;  %v2070_v58 = vadd.f32 1.0, %v4663_v63 }
 0x2e3   :  { %v4825_v20 = vpop.eup %3496  ;;  %3522 = vrcp.f32 %v2059_v49  ;;  %v2071_v49 = vadd.f32 1.0, %v4668_v50 }
 0x2e4   :  { %v4828_v13 = vpop.eup %3498  ;;  %3524 = vrcp.f32 %v2060_v14 }
 0x2e5   :  { %v4831_v23 = vpop.eup %3500  ;;  %3526 = vrcp.f32 %v2061_v34  ;;  %v2072_v34 = vadd.f32 1.0, %v4673_v39 }
 0x2e6   :  { %v4834_v54 = vpop.eup %3502  ;;  %3528 = vrcp.f32 %v2062_v46 }
 0x2e7   :  { %v4837_v7 = vpop.eup %3504  ;;  %3530 = vrcp.f32 %v2063_v6  ;;  %v2074_v6 = vadd.f32 1.0, %v4683_v60 }
 0x2e8   :  { %v4840_v43 = vpop.eup %3506  ;;  %3532 = vrcp.f32 %v2064_v4  ;;  %v2075_v4 = vadd.f32 1.0, %v4688_v8 }
 0x2e9   :  { %v3509_v10 = vpop.eup %3508  ;;  %3534 = vrcp.f32 %v2065_v33  ;;  %v2076_v33 = vadd.f32 1.0, %v4693_v48 }
 0x2ea   :  { %v3511_v52 = vpop.eup %3510  ;;  %3536 = vrcp.f32 %v2066_v28 }
 0x2eb   :  { %v3513_v40 = vpop.eup %3512  ;;  %3538 = vrcp.f32 %v2067_v24  ;;  %v2909_v14 = vpack.c.bf16 %v3511_v52, %v3509_v10  ;;  %v2077_v24 = vadd.f32 1.0, %v4698_v1  ;;  %v2080_v52 = vadd.f32 1.0, %v4713_v16 }
 0x2ec   :  { %v3515_v5 = vpop.eup %3514  ;;  %3540 = vrcp.f32 %v2068_v51  ;;  %v2078_v51 = vadd.f32 1.0, %v4703_v56 }
 0x2ed   :  { %v3517_v46 = vpop.eup %3516  ;;  %3542 = vrcp.f32 %v2069_v37  ;;  %2910 = vst [vmem:[%s4990_s4] sm:$0xff] %v2909_v14   ;;  %v2914_v12 = vpack.c.bf16 %v3515_v5, %v3513_v40  ;;  %v2079_v37 = vadd.f32 1.0, %v4708_v42  ;;  %v2081_v40 = vadd.f32 1.0, %v4718_v61 }
 0x2ee   :  { %v3519_v63 = vpop.eup %3518  ;;  %3544 = vrcp.f32 %v2070_v58  ;;  %v2083_v5 = vadd.f32 1.0, %v4728_v9 }
 0x2ef   :  { %v3521_v50 = vpop.eup %3520  ;;  %3546 = vrcp.f32 %v2071_v49  ;;  %3066 = vst [vmem:[%s4990_s4 + $0x8] sm:$0xff] %v2914_v12   ;;  %v2919_v39 = vpack.c.bf16 %v3519_v63, %v3517_v46  ;;  %v2082_v49 = vadd.f32 1.0, %v4723_v22  ;;  %v2086_v12 = vadd.f32 1.0, %v4743_v57 }
 0x2f0   :  { %v3523_v25 = vpop.eup %3522  ;;  %3548 = vrcp.f32 %v2072_v34  ;;  %v2084_v34 = vadd.f32 1.0, %v4733_v59 }
 0x2f1   :  { %v3525_v28 = vpop.eup %3524  ;;  %3550 = vrcp.f32 %v2073_v26  ;;  %3067 = vst [vmem:[%s4990_s4 + $0x10] sm:$0xff] %v2919_v39   ;;  %v2924_v60 = vpack.c.bf16 %v3523_v25, %v3521_v50  ;;  %v2085_v26 = vadd.f32 1.0, %v4738_v3  ;;  %v2088_v50 = vadd.f32 1.0, %v4753_v38 }
 0x2f2   :  { %v3527_v8 = vpop.eup %3526  ;;  %3552 = vrcp.f32 %v2074_v6  ;;  %v2087_v6 = vadd.f32 1.0, %v4748_v36  ;;  %v2089_v39 = vadd.f32 1.0, %v4758_v0  ;;  %v2090_v25 = vadd.f32 1.0, %v4763_v41 }
 0x2f3   :  { %v3529_v10 = vpop.eup %3528  ;;  %3554 = vrcp.f32 %v2075_v4  ;;  %3068 = vst [vmem:[%s4990_s4 + $0x18] sm:$0xff] %v2924_v60   ;;  %v2929_v48 = vpack.c.bf16 %v3527_v8, %v3525_v28  ;;  %v2091_v28 = vadd.f32 1.0, %v4768_v53  ;;  %v2093_v8 = vadd.f32 1.0, %v4778_v62 }
 0x2f4   :  { %v3531_v1 = vpop.eup %3530  ;;  %3556 = vrcp.f32 %v2076_v33 }
 0x2f5   :  { %v3533_v58 = vpop.eup %3532  ;;  %3558 = vrcp.f32 %v2077_v24  ;;  %3069 = vst [vmem:[%s4990_s4 + $0x20] sm:$0xff] %v2929_v48   ;;  %v2934_v56 = vpack.c.bf16 %v3531_v1, %v3529_v10  ;;  %v2092_v24 = vadd.f32 1.0, %v4773_v47  ;;  %v2096_v48 = vadd.f32 1.0, %v4786_v32 }
 0x2f6   :  { %v3535_v42 = vpop.eup %3534  ;;  %3560 = vrcp.f32 %v2078_v51  ;;  %v2094_v51 = vadd.f32 1.0, %v4781_v19 }
 0x2f7   :  { %v3537_v14 = vpop.eup %3536  ;;  %3562 = vrcp.f32 %v2079_v37  ;;  %3070 = vst [vmem:[%s4990_s4 + $0x28] sm:$0xff] %v2934_v56   ;;  %v2939_v16 = vpack.c.bf16 %v3535_v42, %v3533_v58  ;;  %v2095_v37 = vadd.f32 1.0, %v4784_v2  ;;  %v2098_v58 = vadd.f32 1.0, %v4790_v29 }
 0x2f8   :  { %v3539_v61 = vpop.eup %3538  ;;  %3564 = vrcp.f32 %v2080_v52  ;;  %v2097_v52 = vadd.f32 1.0, %v4788_v11  ;;  %v2099_v56 = vadd.f32 1.0, %v4792_v35  ;;  %v2100_v42 = vadd.f32 1.0, %v4795_v45 }
 0x2f9   :  { %v3541_v46 = vpop.eup %3540  ;;  %3566 = vrcp.f32 %v2081_v40  ;;  %3071 = vst [vmem:[%s4990_s4 + $0x30] sm:$0xff] %v2939_v16   ;;  %v2944_v22 = vpack.c.bf16 %v3539_v61, %v3537_v14  ;;  %v2101_v14 = vadd.f32 1.0, %v4798_v30  ;;  %v2103_v61 = vadd.f32 1.0, %v4804_v15 }
 0x2fa   :  { %v3543_v9 = vpop.eup %3542  ;;  %3568 = vrcp.f32 %v2082_v49 }
 0x2fb   :  { %v3545_v63 = vpop.eup %3544  ;;  %3570 = vrcp.f32 %v2083_v5  ;;  %3072 = vst [vmem:[%s4990_s4 + $0x38] sm:$0xff] %v2944_v22   ;;  %v2949_v59 = vpack.c.bf16 %v3543_v9, %v3541_v46  ;;  %v2102_v5 = vadd.f32 1.0, %v4801_v31  ;;  %v2106_v22 = vadd.f32 1.0, %v4813_v27 }
 0x2fc   :  { %v3547_v3 = vpop.eup %3546  ;;  %3572 = vrcp.f32 %v2084_v34  ;;  %v2104_v34 = vadd.f32 1.0, %v4807_v44 }
 0x2fd   :  { %v3549_v4 = vpop.eup %3548  ;;  %3574 = vrcp.f32 %v2085_v26  ;;  %3073 = vst [vmem:[%s4990_s4 + $0x40] sm:$0xff] %v2949_v59   ;;  %v2954_v57 = vpack.c.bf16 %v3547_v3, %v3545_v63  ;;  %v2105_v26 = vadd.f32 1.0, %v4810_v21  ;;  %v2108_v63 = vadd.f32 1.0, %v4819_v17 }
 0x2fe   :  { %v3551_v36 = vpop.eup %3550  ;;  %3576 = vrcp.f32 %v2086_v12  ;;  %v2107_v12 = vadd.f32 1.0, %v4816_v55  ;;  %v2109_v59 = vadd.f32 1.0, %v4822_v18  ;;  %v2110_v3 = vadd.f32 1.0, %v4825_v20 }
 0x2ff   :  { %v3553_v33 = vpop.eup %3552  ;;  %3578 = vrcp.f32 %v2087_v6  ;;  %3074 = vst [vmem:[%s4990_s4 + $0x48] sm:$0xff] %v2954_v57   ;;  %v2959_v38 = vpack.c.bf16 %v3551_v36, %v3549_v4  ;;  %v2111_v4 = vadd.f32 1.0, %v4828_v13  ;;  %v2113_v36 = vadd.f32 1.0, %v4834_v54 }
 0x300   :  { %v3555_v0 = vpop.eup %3554  ;;  %3580 = vrcp.f32 %v2088_v50 }
 0x301   :  { %v3557_v60 = vpop.eup %3556  ;;  %3582 = vrcp.f32 %v2089_v39  ;;  %3075 = vst [vmem:[%s4990_s4 + $0x50] sm:$0xff] %v2959_v38   ;;  %v2964_v41 = vpack.c.bf16 %v3555_v0, %v3553_v33  ;;  %v2112_v39 = vadd.f32 1.0, %v4831_v23 }
 0x302   :  { %v3559_v53 = vpop.eup %3558  ;;  %3584 = vrcp.f32 %v2090_v25  ;;  %v2114_v25 = vadd.f32 1.0, %v4837_v7 }
 0x303   :  { %v3561_v10 = vpop.eup %3560  ;;  %3586 = vrcp.f32 %v2091_v28  ;;  %3076 = vst [vmem:[%s4990_s4 + $0x58] sm:$0xff] %v2964_v41   ;;  %v2969_v47 = vpack.c.bf16 %v3559_v53, %v3557_v60  ;;  %v2115_v28 = vadd.f32 1.0, %v4840_v43 }
 0x304   :  { %v3563_v62 = vpop.eup %3562  ;;  %3588 = vrcp.f32 %v2092_v24 }
 0x305   :  { %v3565_v1 = vpop.eup %3564  ;;  %3590 = vrcp.f32 %v2093_v8  ;;  %3077 = vst [vmem:[%s4990_s4 + $0x60] sm:$0xff] %v2969_v47   ;;  %v2974_v19 = vpack.c.bf16 %v3563_v62, %v3561_v10 }
 0x306   :  { %v3567_v2 = vpop.eup %3566  ;;  %3592 = vrcp.f32 %v2094_v51 }
 0x307   :  { %v3569_v40 = vpop.eup %3568  ;;  %3594 = vrcp.f32 %v2095_v37  ;;  %3078 = vst [vmem:[%s4990_s4 + $0x68] sm:$0xff] %v2974_v19   ;;  %v2979_v32 = vpack.c.bf16 %v3567_v2, %v3565_v1 }
 0x308   :  { %v3571_v11 = vpop.eup %3570  ;;  %3596 = vrcp.f32 %v2096_v48 }
 0x309   :  { %v3573_v49 = vpop.eup %3572  ;;  %3598 = vrcp.f32 %v2097_v52  ;;  %3079 = vst [vmem:[%s4990_s4 + $0x70] sm:$0xff] %v2979_v32   ;;  %v2984_v29 = vpack.c.bf16 %v3571_v11, %v3569_v40 }
 0x30a   :  { %v3575_v35 = vpop.eup %3574  ;;  %3600 = vrcp.f32 %v2098_v58 }
 0x30b   :  { %v3577_v16 = vpop.eup %3576  ;;  %3602 = vrcp.f32 %v2099_v56  ;;  %3080 = vst [vmem:[%s4990_s4 + $0x78] sm:$0xff] %v2984_v29   ;;  %v2989_v45 = vpack.c.bf16 %v3575_v35, %v3573_v49 }
 0x30c   :  { %v3579_v30 = vpop.eup %3578  ;;  %3604 = vrcp.f32 %v2100_v42 }
 0x30d   :  { %v3581_v46 = vpop.eup %3580  ;;  %3606 = vrcp.f32 %v2101_v14  ;;  %3081 = vst [vmem:[%s4990_s4 + $0x80] sm:$0xff] %v2989_v45   ;;  %v2994_v31 = vpack.c.bf16 %v3579_v30, %v3577_v16 }
 0x30e   :  { %v3583_v15 = vpop.eup %3582  ;;  %3608 = vrcp.f32 %v2102_v5 }
 0x30f   :  { %v3585_v9 = vpop.eup %3584  ;;  %3610 = vrcp.f32 %v2103_v61  ;;  %3082 = vst [vmem:[%s4990_s4 + $0x88] sm:$0xff] %v2994_v31   ;;  %v2999_v44 = vpack.c.bf16 %v3583_v15, %v3581_v46 }
 0x310   :  { %v3587_v21 = vpop.eup %3586  ;;  %3612 = vrcp.f32 %v2104_v34 }
 0x311   :  { %v3589_v6 = vpop.eup %3588  ;;  %3614 = vrcp.f32 %v2105_v26  ;;  %3083 = vst [vmem:[%s4990_s4 + $0x90] sm:$0xff] %v2999_v44   ;;  %v3004_v27 = vpack.c.bf16 %v3587_v21, %v3585_v9 }
 0x312   :  { %v3591_v55 = vpop.eup %3590  ;;  %3616 = vrcp.f32 %v2106_v22 }
 0x313   :  { %v3593_v50 = vpop.eup %3592  ;;  %3618 = vrcp.f32 %v2107_v12  ;;  %3084 = vst [vmem:[%s4990_s4 + $0x98] sm:$0xff] %v3004_v27   ;;  %v3009_v17 = vpack.c.bf16 %v3591_v55, %v3589_v6 }
 0x314   :  { %v3595_v18 = vpop.eup %3594  ;;  %3620 = vrcp.f32 %v2108_v63 }
 0x315   :  { %v3597_v57 = vpop.eup %3596  ;;  %3622 = vrcp.f32 %v2109_v59  ;;  %3085 = vst [vmem:[%s4990_s4 + $0xa0] sm:$0xff] %v3009_v17   ;;  %v3014_v20 = vpack.c.bf16 %v3595_v18, %v3593_v50 }
 0x316   :  { %v3599_v13 = vpop.eup %3598  ;;  %3624 = vrcp.f32 %v2110_v3 }
 0x317   :  { %v3601_v33 = vpop.eup %3600  ;;  %3626 = vrcp.f32 %v2111_v4  ;;  %3086 = vst [vmem:[%s4990_s4 + $0xa8] sm:$0xff] %v3014_v20   ;;  %v3019_v23 = vpack.c.bf16 %v3599_v13, %v3597_v57 }
 0x318   :  { %v3603_v54 = vpop.eup %3602  ;;  %3628 = vrcp.f32 %v2112_v39 }
 0x319   :  { %v3605_v38 = vpop.eup %3604  ;;  %3630 = vrcp.f32 %v2113_v36  ;;  %3087 = vst [vmem:[%s4990_s4 + $0xb0] sm:$0xff] %v3019_v23   ;;  %v3024_v0 = vpack.c.bf16 %v3603_v54, %v3601_v33 }
 0x31a   :  { %v3607_v7 = vpop.eup %3606  ;;  %3632 = vrcp.f32 %v2114_v25 }
 0x31b   :  { %v3609_v24 = vpop.eup %3608  ;;  %3634 = vrcp.f32 %v2115_v28  ;;  %3088 = vst [vmem:[%s4990_s4 + $0xb8] sm:$0xff] %v3024_v0   ;;  %v3029_v43 = vpack.c.bf16 %v3607_v7, %v3605_v38 }
 0x31c   :  { %v3611_v60 = vpop.eup %3610 }
 0x31d   :  { %v3613_v8 = vpop.eup %3612  ;;  %3089 = vst [vmem:[%s4990_s4 + $0xc0] sm:$0xff] %v3029_v43   ;;  %v3034_v41 = vpack.c.bf16 %v3611_v60, %v3609_v24 }
 0x31e   :  { %v3615_v53 = vpop.eup %3614 }
 0x31f   :  { %v3617_v51 = vpop.eup %3616  ;;  %3090 = vst [vmem:[%s4990_s4 + $0xc8] sm:$0xff] %v3034_v41   ;;  %v3039_v10 = vpack.c.bf16 %v3615_v53, %v3613_v8 }
 0x320   :  { %v3619_v37 = vpop.eup %3618 }
 0x321   :  { %v3621_v47 = vpop.eup %3620  ;;  %3091 = vst [vmem:[%s4990_s4 + $0xd0] sm:$0xff] %v3039_v10   ;;  %v3044_v62 = vpack.c.bf16 %v3619_v37, %v3617_v51 }
 0x322   :  { %v3623_v48 = vpop.eup %3622 }
 0x323   :  { %v3625_v1 = vpop.eup %3624  ;;  %3092 = vst [vmem:[%s4990_s4 + $0xd8] sm:$0xff] %v3044_v62   ;;  %v3049_v52 = vpack.c.bf16 %v3623_v48, %v3621_v47 }
 0x324   :  { %v3627_v19 = vpop.eup %3626 }
 0x325   :  { %v3629_v2 = vpop.eup %3628  ;;  %3093 = vst [vmem:[%s4990_s4 + $0xe0] sm:$0xff] %v3049_v52   ;;  %v3054_v58 = vpack.c.bf16 %v3627_v19, %v3625_v1 }
 0x326   :  { %v3631_v40 = vpop.eup %3630 }
 0x327   :  { %v3633_v56 = vpop.eup %3632  ;;  %3094 = vst [vmem:[%s4990_s4 + $0xe8] sm:$0xff] %v3054_v58   ;;  %v3059_v32 = vpack.c.bf16 %v3631_v40, %v3629_v2 }
 0x328   :  { %v3635_v11 = vpop.eup %3634 }
 0x329   :  { %3095 = vst [vmem:[%s4990_s4 + $0xf0] sm:$0xff] %v3059_v32   ;;  %v3064_v42 = vpack.c.bf16 %v3635_v11, %v3633_v56 }
 0x32b   :  { %3096 = vst [vmem:[%s4990_s4 + $0xf8] sm:$0xff] %v3064_v42  }

</bundles_post_ra>
